<compile_context>
chip_gen: v7x
topology: tpu7x:2x2x1
jax: 0.10.0
libtpu: 0.0.40
codegen_flags: <defaults>
</compile_context>

<pallas_src>
import functools

import jax
import jax.numpy as jnp
from jax.experimental import pallas as pl
from jax.experimental.pallas import tpu as pltpu

LANE = 128


def _round_up(v, m):
    return ((v + m - 1) // m) * m


def _choose_tile(n_pad, target):
    t = min(target, n_pad)
    while n_pad % t != 0:
        t //= 2
    return max(t, 8)


def _pad2(a, rows, cols, dtype=None):
    out = jnp.pad(a, ((0, rows - a.shape[0]), (0, cols - a.shape[1])))
    return out if dtype is None else out.astype(dtype)


def _sage_layer_kernel(adj_ref, xn_ref, xr_ref, dinv_ref, wl_ref, wr_ref, b_ref,
                       out_ref, acc_ref, *, apply_relu):
    """One SAGEConv layer, tiled over (row tiles i, reduction tiles k).

    out_i = mean_{j->i}(x_j) @ W_l + x_i @ W_r + b   [+ ReLU]
    """
    k = pl.program_id(1)

    @pl.when(k == 0)
    def _init():
        acc_ref[...] = jnp.zeros_like(acc_ref)

    # (TM, TK) bf16 @ (TK, Fpad) bf16 -> f32 accumulation on the MXU.
    acc_ref[...] += jnp.dot(adj_ref[...], xn_ref[...],
                            preferred_element_type=jnp.float32)

    @pl.when(k == pl.num_programs(1) - 1)
    def _epilogue():
        # Row-wise mean: scale the accumulated neighbor sum by 1/deg (VPU).
        agg = acc_ref[...] * dinv_ref[...]
        out = (jnp.dot(agg, wl_ref[...], preferred_element_type=jnp.float32)
               + jnp.dot(xr_ref[...].astype(jnp.float32), wr_ref[...],
                         preferred_element_type=jnp.float32)
               + b_ref[...])
        if apply_relu:
            out = jnp.maximum(out, 0.0)
        out_ref[...] = out.astype(out_ref.dtype)


def sage_layer(adj, deg_inv, x, w_l, w_r, b, *, apply_relu, out_dtype, tm, tk):
    """adj: (Np, Np) bf16 counts; deg_inv: (Np, 1) f32; x: (Np, Fin_pad) bf16;
    w_l/w_r: (Fin_pad, Fout_pad) f32; b: (1, Fout_pad) f32."""
    n_pad = adj.shape[0]
    f_in = w_l.shape[0]
    f_out = w_l.shape[1]
    grid = (n_pad // tm, n_pad // tk)
    kernel = functools.partial(_sage_layer_kernel, apply_relu=apply_relu)
    return pl.pallas_call(
        kernel,
        out_shape=jax.ShapeDtypeStruct((n_pad, f_out), out_dtype),
        grid_spec=pltpu.PrefetchScalarGridSpec(
            num_scalar_prefetch=0,
            grid=grid,
            in_specs=[
                pl.BlockSpec((tm, tk), lambda i, k: (i, k)),        # adj tile
                pl.BlockSpec((tk, f_in), lambda i, k: (k, 0)),      # neighbor rows
                pl.BlockSpec((tm, f_in), lambda i, k: (i, 0)),      # root rows
                pl.BlockSpec((tm, 1), lambda i, k: (i, 0)),         # 1/deg
                pl.BlockSpec((f_in, f_out), lambda i, k: (0, 0)),   # W_l
                pl.BlockSpec((f_in, f_out), lambda i, k: (0, 0)),   # W_r
                pl.BlockSpec((1, f_out), lambda i, k: (0, 0)),      # bias
            ],
            out_specs=pl.BlockSpec((tm, f_out), lambda i, k: (i, 0)),
            scratch_shapes=[pltpu.VMEM((tm, f_in), jnp.float32)],
        ),
        compiler_params=pltpu.CompilerParams(
            dimension_semantics=("parallel", "arbitrary")),
    )(adj, x, x, deg_inv, w_l, w_r, b)


def build_graph_tensors(edge_index, num_nodes, n_pad):
    """edge_index: (2, E) int32, row 0 = source j, row 1 = target i.
    Returns (adjacency counts as bf16 (Np,Np), 1/in-degree as f32 (Np,1)).
    Nodes with no incoming edges aggregate to 0 (matches PyG mean aggr)."""
    src, dst = edge_index[0], edge_index[1]
    adj = jnp.zeros((n_pad, n_pad), jnp.float32).at[dst, src].add(1.0)
    deg = adj.sum(axis=1, keepdims=True)
    deg_inv = jnp.where(deg > 0, 1.0 / jnp.maximum(deg, 1.0), 0.0)
    return adj.astype(jnp.bfloat16), deg_inv.astype(jnp.float32)


def graphsage_forward(x, edge_index, params):
    n, f_in = x.shape
    hidden = params["w1_l"].shape[1]
    classes = params["w2_l"].shape[1]

    n_pad = _round_up(max(n, 8), LANE)
    tm = _choose_tile(n_pad, 256)
    tk = _choose_tile(n_pad, 512)
    f_pad = _round_up(f_in, LANE)
    h_pad = _round_up(hidden, LANE)
    c_pad = _round_up(classes, LANE)

    adj, deg_inv = build_graph_tensors(edge_index, n, n_pad)

    x_p = _pad2(x, n_pad, f_pad, jnp.bfloat16)
    w1l = _pad2(params["w1_l"], f_pad, h_pad)
    w1r = _pad2(params["w1_r"], f_pad, h_pad)
    b1 = _pad2(params["b1_l"], 1, h_pad)
    w2l = _pad2(params["w2_l"], h_pad, c_pad)
    w2r = _pad2(params["w2_r"], h_pad, c_pad)
    b2 = _pad2(params["b2_l"], 1, c_pad)

    h = sage_layer(adj, deg_inv, x_p, w1l, w1r, b1,
                   apply_relu=True, out_dtype=jnp.bfloat16, tm=tm, tk=tk)
    # dropout: identity (eval mode)
    out = sage_layer(adj, deg_inv, h, w2l, w2r, b2,
                     apply_relu=False, out_dtype=jnp.float32, tm=tm, tk=tk)
    return out[:n, :classes]


def graphsage_reference(x, edge_index, params):
    """Pure-JAX f32 reference for validation."""
    n = x.shape[0]
    src, dst = edge_index[0], edge_index[1]
    adj = jnp.zeros((n, n), jnp.float32).at[dst, src].add(1.0)
    deg = adj.sum(axis=1, keepdims=True)
    adj_mean = jnp.where(deg > 0, adj / jnp.maximum(deg, 1.0), 0.0)
    h = (adj_mean @ x) @ params["w1_l"] + x @ params["w1_r"] + params["b1_l"]
    h = jnp.maximum(h, 0.0)
    return (adj_mean @ h) @ params["w2_l"] + h @ params["w2_r"] + params["b2_l"]


def init_params(key, attributes, hidden, classes):
    """Glorot-uniform-ish init matching SAGEConv parameter shapes.
    Weights stored transposed relative to torch.nn.Linear: (Fin, Fout)."""
    ks = jax.random.split(key, 4)

    def glorot(k, fan_in, fan_out):
        limit = (6.0 / (fan_in + fan_out)) ** 0.5
        return jax.random.uniform(k, (fan_in, fan_out), jnp.float32,
                                  minval=-limit, maxval=limit)

    return {
        "w1_l": glorot(ks[0], attributes, hidden),   # lin_l of conv1 (has bias)
        "w1_r": glorot(ks[1], attributes, hidden),   # lin_r of conv1 (no bias)
        "b1_l": jnp.zeros((1, hidden), jnp.float32),
        "w2_l": glorot(ks[2], hidden, classes),      # lin_l of conv2
        "w2_r": glorot(ks[3], hidden, classes),      # lin_r of conv2 (no bias)
        "b2_l": jnp.zeros((1, classes), jnp.float32),
    }


if __name__ == "__main__":
    key = jax.random.PRNGKey(0)
    k_x, k_p, k_src, k_dst = jax.random.split(key, 4)

    num_nodes = 1000     # pads to 1024 -> grid (4, 2) with TM=256, TK=512
    num_edges = 5000
    attributes = 16
    hidden = 32
    classes = 7

    x = jax.random.normal(k_x, (num_nodes, attributes), jnp.float32)
    src = jax.random.randint(k_src, (num_edges,), 0, num_nodes, dtype=jnp.int32)
    dst = jax.random.randint(k_dst, (num_edges,), 0, num_nodes, dtype=jnp.int32)
    edge_index = jnp.stack([src, dst], axis=0)

    params = init_params(k_p, attributes, hidden, classes)

    fwd = jax.jit(graphsage_forward)
    out = jax.block_until_ready(fwd(x, edge_index, params))
    assert out.shape == (num_nodes, classes)
    assert bool(jnp.all(jnp.isfinite(out)))

    ref = graphsage_reference(x, edge_index, params)
    max_err = float(jnp.max(jnp.abs(out - ref)))
    assert max_err < 1e-1, f"mismatch vs reference: {max_err}"

    print("KERNEL_OK")
</pallas_src>

<mosaic_0001>
module attributes {stable_mosaic.version = 11 : i64} {
  func.func @_sage_layer_kernel(%arg0: i32, %arg1: i32, %arg2: memref<256x512xbf16, #tpu.memory_space<vmem>>, %arg3: memref<512x128xbf16, #tpu.memory_space<vmem>>, %arg4: memref<256x128xbf16, #tpu.memory_space<vmem>>, %arg5: memref<256x1xf32, #tpu.memory_space<vmem>>, %arg6: memref<128x128xf32, #tpu.memory_space<vmem>>, %arg7: memref<128x128xf32, #tpu.memory_space<vmem>>, %arg8: memref<1x128xf32, #tpu.memory_space<vmem>>, %arg9: memref<256x128xbf16, #tpu.memory_space<vmem>>, %arg10: memref<256x128xf32, #tpu.memory_space<vmem>>) attributes {dimension_semantics = [#tpu.dimension_semantics<parallel>, #tpu.dimension_semantics<arbitrary>], iteration_bounds = array<i64: 4, 2>, scalar_prefetch = 0 : i64, scratch_operands = 1 : i64, tpu.core_type = #tpu.core_type<tc>, window_params = [{transform_indices = @transform_0, window_bounds = array<i64: 256, 512>}, {transform_indices = @transform_1, window_bounds = array<i64: 512, 128>}, {transform_indices = @transform_2, window_bounds = array<i64: 256, 128>}, {transform_indices = @transform_3, window_bounds = array<i64: 256, 1>}, {pipeline_mode = #tpu.pipeline_mode<synchronous>, transform_indices = @transform_4, window_bounds = array<i64: 128, 128>}, {pipeline_mode = #tpu.pipeline_mode<synchronous>, transform_indices = @transform_5, window_bounds = array<i64: 128, 128>}, {pipeline_mode = #tpu.pipeline_mode<synchronous>, transform_indices = @transform_6, window_bounds = array<i64: 1, 128>}, {transform_indices = @transform_7, window_bounds = array<i64: 256, 128>}]} {
    %c0_i32 = arith.constant 0 : i32
    %0 = arith.cmpi eq, %arg1, %c0_i32 : i32
    %1 = arith.extui %0 : i1 to i32
    %c0_i32_0 = arith.constant 0 : i32
    %2 = arith.cmpi ne, %1, %c0_i32_0 : i32
    scf.if %2 {
      %cst_9 = arith.constant 0.000000e+00 : f32
      %12 = vector.broadcast %cst_9 : f32 to vector<256x128xf32>
      %c0_10 = arith.constant 0 : index
      %c0_11 = arith.constant 0 : index
      %13 = vector.load %arg10[%c0_10, %c0_11] : memref<256x128xf32, #tpu.memory_space<vmem>>, vector<256x128xf32>
      tpu.vector_store %arg10[%c0_10, %c0_11], %12 {strides = array<i32>} : memref<256x128xf32, #tpu.memory_space<vmem>>, vector<256x128xf32>,
    } else {
    }
    %c0 = arith.constant 0 : index
    %c0_1 = arith.constant 0 : index
    %3 = vector.load %arg10[%c0, %c0_1] : memref<256x128xf32, #tpu.memory_space<vmem>>, vector<256x128xf32>
    %c0_2 = arith.constant 0 : index
    %c0_3 = arith.constant 0 : index
    %4 = vector.load %arg2[%c0_2, %c0_3] : memref<256x512xbf16, #tpu.memory_space<vmem>>, vector<256x512xbf16>
    %c0_4 = arith.constant 0 : index
    %c0_5 = arith.constant 0 : index
    %5 = vector.load %arg3[%c0_4, %c0_5] : memref<512x128xbf16, #tpu.memory_space<vmem>>, vector<512x128xbf16>
    %cst = arith.constant dense<0.000000e+00> : vector<256x128xf32>
    %6 = tpu.matmul %4, %5, %cst {dimension_numbers = #tpu.dot_dimension_numbers<[1], [0], [0], [1], [0, 0, 1, 1], [], []>} : vector<256x512xbf16>, vector<512x128xbf16>, vector<256x128xf32> -> vector<256x128xf32>
    %7 = arith.addf %3, %6 : vector<256x128xf32>
    %c0_6 = arith.constant 0 : index
    %c0_7 = arith.constant 0 : index
    %8 = vector.load %arg10[%c0_6, %c0_7] : memref<256x128xf32, #tpu.memory_space<vmem>>, vector<256x128xf32>
    tpu.vector_store %arg10[%c0_6, %c0_7], %7 {strides = array<i32>} : memref<256x128xf32, #tpu.memory_space<vmem>>, vector<256x128xf32>,
    %c1_i32 = arith.constant 1 : i32
    %9 = arith.cmpi eq, %arg1, %c1_i32 : i32
    %10 = arith.extui %9 : i1 to i32
    %c0_i32_8 = arith.constant 0 : i32
    %11 = arith.cmpi ne, %10, %c0_i32_8 : i32
    scf.if %11 {
      %c0_9 = arith.constant 0 : index
      %c0_10 = arith.constant 0 : index
      %12 = vector.load %arg10[%c0_9, %c0_10] : memref<256x128xf32, #tpu.memory_space<vmem>>, vector<256x128xf32>
      %c0_11 = arith.constant 0 : index
      %c0_12 = arith.constant 0 : index
      %13 = vector.load %arg5[%c0_11, %c0_12] : memref<256x1xf32, #tpu.memory_space<vmem>>, vector<256x1xf32>
      %14 = vector.broadcast %13 : vector<256x1xf32> to vector<256x128xf32>
      %15 = arith.mulf %12, %14 : vector<256x128xf32>
      %c0_13 = arith.constant 0 : index
      %c0_14 = arith.constant 0 : index
      %16 = vector.load %arg6[%c0_13, %c0_14] : memref<128x128xf32, #tpu.memory_space<vmem>>, vector<128x128xf32>
      %cst_15 = arith.constant dense<0.000000e+00> : vector<256x128xf32>
      %17 = tpu.matmul %15, %16, %cst_15 {dimension_numbers = #tpu.dot_dimension_numbers<[1], [0], [0], [1], [0, 0, 1, 1], [], []>} : vector<256x128xf32>, vector<128x128xf32>, vector<256x128xf32> -> vector<256x128xf32>
      %c0_16 = arith.constant 0 : index
      %c0_17 = arith.constant 0 : index
      %18 = vector.load %arg4[%c0_16, %c0_17] : memref<256x128xbf16, #tpu.memory_space<vmem>>, vector<256x128xbf16>
      %19 = arith.extf %18 : vector<256x128xbf16> to vector<256x128xf32>
      %c0_18 = arith.constant 0 : index
      %c0_19 = arith.constant 0 : index
      %20 = vector.load %arg7[%c0_18, %c0_19] : memref<128x128xf32, #tpu.memory_space<vmem>>, vector<128x128xf32>
      %cst_20 = arith.constant dense<0.000000e+00> : vector<256x128xf32>
      %21 = tpu.matmul %19, %20, %cst_20 {dimension_numbers = #tpu.dot_dimension_numbers<[1], [0], [0], [1], [0, 0, 1, 1], [], []>} : vector<256x128xf32>, vector<128x128xf32>, vector<256x128xf32> -> vector<256x128xf32>
      %22 = arith.addf %17, %21 : vector<256x128xf32>
      %c0_21 = arith.constant 0 : index
      %c0_22 = arith.constant 0 : index
      %23 = vector.load %arg8[%c0_21, %c0_22] : memref<1x128xf32, #tpu.memory_space<vmem>>, vector<1x128xf32>
      %24 = vector.broadcast %23 : vector<1x128xf32> to vector<256x128xf32>
      %25 = arith.addf %22, %24 : vector<256x128xf32>
      %cst_23 = arith.constant 0.000000e+00 : f32
      %26 = vector.broadcast %cst_23 : f32 to vector<256x128xf32>
      %27 = arith.maximumf %25, %26 : vector<256x128xf32>
      %28 = arith.truncf %27 : vector<256x128xf32> to vector<256x128xbf16>
      %c0_24 = arith.constant 0 : index
      %c0_25 = arith.constant 0 : index
      %29 = vector.load %arg9[%c0_24, %c0_25] : memref<256x128xbf16, #tpu.memory_space<vmem>>, vector<256x128xbf16>
      tpu.vector_store %arg9[%c0_24, %c0_25], %28 {strides = array<i32>} : memref<256x128xbf16, #tpu.memory_space<vmem>>, vector<256x128xbf16>,
    } else {
    }
    return
  }
  func.func @transform_0(%arg0: i32, %arg1: i32) -> (i32, i32) {
    %c0_i32 = arith.constant 0 : i32
    return %arg0, %arg1 : i32, i32
  }
  func.func @transform_1(%arg0: i32, %arg1: i32) -> (i32, i32) {
    %c0_i32 = arith.constant 0 : i32
    %c0_i32_0 = arith.constant 0 : i32
    return %arg1, %c0_i32 : i32, i32
  }
  func.func @transform_2(%arg0: i32, %arg1: i32) -> (i32, i32) {
    %c0_i32 = arith.constant 0 : i32
    %c0_i32_0 = arith.constant 0 : i32
    return %arg0, %c0_i32 : i32, i32
  }
  func.func @transform_3(%arg0: i32, %arg1: i32) -> (i32, i32) {
    %c0_i32 = arith.constant 0 : i32
    %c0_i32_0 = arith.constant 0 : i32
    return %arg0, %c0_i32 : i32, i32
  }
  func.func @transform_4(%arg0: i32, %arg1: i32) -> (i32, i32) {
    %c0_i32 = arith.constant 0 : i32
    %c0_i32_0 = arith.constant 0 : i32
    %c0_i32_1 = arith.constant 0 : i32
    return %c0_i32, %c0_i32_0 : i32, i32
  }
  func.func @transform_5(%arg0: i32, %arg1: i32) -> (i32, i32) {
    %c0_i32 = arith.constant 0 : i32
    %c0_i32_0 = arith.constant 0 : i32
    %c0_i32_1 = arith.constant 0 : i32
    return %c0_i32, %c0_i32_0 : i32, i32
  }
  func.func @transform_6(%arg0: i32, %arg1: i32) -> (i32, i32) {
    %c0_i32 = arith.constant 0 : i32
    %c0_i32_0 = arith.constant 0 : i32
    %c0_i32_1 = arith.constant 0 : i32
    return %c0_i32, %c0_i32_0 : i32, i32
  }
  func.func @transform_7(%arg0: i32, %arg1: i32) -> (i32, i32) {
    %c0_i32 = arith.constant 0 : i32
    %c0_i32_0 = arith.constant 0 : i32
    return %arg0, %c0_i32 : i32, i32
  }
}

module attributes {stable_mosaic.version = 11 : i64} {
  func.func @_sage_layer_kernel(%arg0: i32, %arg1: i32, %arg2: memref<256x512xbf16, #tpu.memory_space<vmem>>, %arg3: memref<512x128xbf16, #tpu.memory_space<vmem>>, %arg4: memref<256x128xbf16, #tpu.memory_space<vmem>>, %arg5: memref<256x1xf32, #tpu.memory_space<vmem>>, %arg6: memref<128x128xf32, #tpu.memory_space<vmem>>, %arg7: memref<128x128xf32, #tpu.memory_space<vmem>>, %arg8: memref<1x128xf32, #tpu.memory_space<vmem>>, %arg9: memref<256x128xf32, #tpu.memory_space<vmem>>, %arg10: memref<256x128xf32, #tpu.memory_space<vmem>>) attributes {dimension_semantics = [#tpu.dimension_semantics<parallel>, #tpu.dimension_semantics<arbitrary>], iteration_bounds = array<i64: 4, 2>, scalar_prefetch = 0 : i64, scratch_operands = 1 : i64, tpu.core_type = #tpu.core_type<tc>, window_params = [{transform_indices = @transform_0, window_bounds = array<i64: 256, 512>}, {transform_indices = @transform_1, window_bounds = array<i64: 512, 128>}, {transform_indices = @transform_2, window_bounds = array<i64: 256, 128>}, {transform_indices = @transform_3, window_bounds = array<i64: 256, 1>}, {pipeline_mode = #tpu.pipeline_mode<synchronous>, transform_indices = @transform_4, window_bounds = array<i64: 128, 128>}, {pipeline_mode = #tpu.pipeline_mode<synchronous>, transform_indices = @transform_5, window_bounds = array<i64: 128, 128>}, {pipeline_mode = #tpu.pipeline_mode<synchronous>, transform_indices = @transform_6, window_bounds = array<i64: 1, 128>}, {transform_indices = @transform_7, window_bounds = array<i64: 256, 128>}]} {
    %c0_i32 = arith.constant 0 : i32
    %0 = arith.cmpi eq, %arg1, %c0_i32 : i32
    %1 = arith.extui %0 : i1 to i32
    %c0_i32_0 = arith.constant 0 : i32
    %2 = arith.cmpi ne, %1, %c0_i32_0 : i32
    scf.if %2 {
      %cst_9 = arith.constant 0.000000e+00 : f32
      %12 = vector.broadcast %cst_9 : f32 to vector<256x128xf32>
      %c0_10 = arith.constant 0 : index
      %c0_11 = arith.constant 0 : index
      %13 = vector.load %arg10[%c0_10, %c0_11] : memref<256x128xf32, #tpu.memory_space<vmem>>, vector<256x128xf32>
      tpu.vector_store %arg10[%c0_10, %c0_11], %12 {strides = array<i32>} : memref<256x128xf32, #tpu.memory_space<vmem>>, vector<256x128xf32>,
    } else {
    }
    %c0 = arith.constant 0 : index
    %c0_1 = arith.constant 0 : index
    %3 = vector.load %arg10[%c0, %c0_1] : memref<256x128xf32, #tpu.memory_space<vmem>>, vector<256x128xf32>
    %c0_2 = arith.constant 0 : index
    %c0_3 = arith.constant 0 : index
    %4 = vector.load %arg2[%c0_2, %c0_3] : memref<256x512xbf16, #tpu.memory_space<vmem>>, vector<256x512xbf16>
    %c0_4 = arith.constant 0 : index
    %c0_5 = arith.constant 0 : index
    %5 = vector.load %arg3[%c0_4, %c0_5] : memref<512x128xbf16, #tpu.memory_space<vmem>>, vector<512x128xbf16>
    %cst = arith.constant dense<0.000000e+00> : vector<256x128xf32>
    %6 = tpu.matmul %4, %5, %cst {dimension_numbers = #tpu.dot_dimension_numbers<[1], [0], [0], [1], [0, 0, 1, 1], [], []>} : vector<256x512xbf16>, vector<512x128xbf16>, vector<256x128xf32> -> vector<256x128xf32>
    %7 = arith.addf %3, %6 : vector<256x128xf32>
    %c0_6 = arith.constant 0 : index
    %c0_7 = arith.constant 0 : index
    %8 = vector.load %arg10[%c0_6, %c0_7] : memref<256x128xf32, #tpu.memory_space<vmem>>, vector<256x128xf32>
    tpu.vector_store %arg10[%c0_6, %c0_7], %7 {strides = array<i32>} : memref<256x128xf32, #tpu.memory_space<vmem>>, vector<256x128xf32>,
    %c1_i32 = arith.constant 1 : i32
    %9 = arith.cmpi eq, %arg1, %c1_i32 : i32
    %10 = arith.extui %9 : i1 to i32
    %c0_i32_8 = arith.constant 0 : i32
    %11 = arith.cmpi ne, %10, %c0_i32_8 : i32
    scf.if %11 {
      %c0_9 = arith.constant 0 : index
      %c0_10 = arith.constant 0 : index
      %12 = vector.load %arg10[%c0_9, %c0_10] : memref<256x128xf32, #tpu.memory_space<vmem>>, vector<256x128xf32>
      %c0_11 = arith.constant 0 : index
      %c0_12 = arith.constant 0 : index
      %13 = vector.load %arg5[%c0_11, %c0_12] : memref<256x1xf32, #tpu.memory_space<vmem>>, vector<256x1xf32>
      %14 = vector.broadcast %13 : vector<256x1xf32> to vector<256x128xf32>
      %15 = arith.mulf %12, %14 : vector<256x128xf32>
      %c0_13 = arith.constant 0 : index
      %c0_14 = arith.constant 0 : index
      %16 = vector.load %arg6[%c0_13, %c0_14] : memref<128x128xf32, #tpu.memory_space<vmem>>, vector<128x128xf32>
      %cst_15 = arith.constant dense<0.000000e+00> : vector<256x128xf32>
      %17 = tpu.matmul %15, %16, %cst_15 {dimension_numbers = #tpu.dot_dimension_numbers<[1], [0], [0], [1], [0, 0, 1, 1], [], []>} : vector<256x128xf32>, vector<128x128xf32>, vector<256x128xf32> -> vector<256x128xf32>
      %c0_16 = arith.constant 0 : index
      %c0_17 = arith.constant 0 : index
      %18 = vector.load %arg4[%c0_16, %c0_17] : memref<256x128xbf16, #tpu.memory_space<vmem>>, vector<256x128xbf16>
      %19 = arith.extf %18 : vector<256x128xbf16> to vector<256x128xf32>
      %c0_18 = arith.constant 0 : index
      %c0_19 = arith.constant 0 : index
      %20 = vector.load %arg7[%c0_18, %c0_19] : memref<128x128xf32, #tpu.memory_space<vmem>>, vector<128x128xf32>
      %cst_20 = arith.constant dense<0.000000e+00> : vector<256x128xf32>
      %21 = tpu.matmul %19, %20, %cst_20 {dimension_numbers = #tpu.dot_dimension_numbers<[1], [0], [0], [1], [0, 0, 1, 1], [], []>} : vector<256x128xf32>, vector<128x128xf32>, vector<256x128xf32> -> vector<256x128xf32>
      %22 = arith.addf %17, %21 : vector<256x128xf32>
      %c0_21 = arith.constant 0 : index
      %c0_22 = arith.constant 0 : index
      %23 = vector.load %arg8[%c0_21, %c0_22] : memref<1x128xf32, #tpu.memory_space<vmem>>, vector<1x128xf32>
      %24 = vector.broadcast %23 : vector<1x128xf32> to vector<256x128xf32>
      %25 = arith.addf %22, %24 : vector<256x128xf32>
      %c0_23 = arith.constant 0 : index
      %c0_24 = arith.constant 0 : index
      %26 = vector.load %arg9[%c0_23, %c0_24] : memref<256x128xf32, #tpu.memory_space<vmem>>, vector<256x128xf32>
      tpu.vector_store %arg9[%c0_23, %c0_24], %25 {strides = array<i32>} : memref<256x128xf32, #tpu.memory_space<vmem>>, vector<256x128xf32>,
    } else {
    }
    return
  }
  func.func @transform_0(%arg0: i32, %arg1: i32) -> (i32, i32) {
    %c0_i32 = arith.constant 0 : i32
    return %arg0, %arg1 : i32, i32
  }
  func.func @transform_1(%arg0: i32, %arg1: i32) -> (i32, i32) {
    %c0_i32 = arith.constant 0 : i32
    %c0_i32_0 = arith.constant 0 : i32
    return %arg1, %c0_i32 : i32, i32
  }
  func.func @transform_2(%arg0: i32, %arg1: i32) -> (i32, i32) {
    %c0_i32 = arith.constant 0 : i32
    %c0_i32_0 = arith.constant 0 : i32
    return %arg0, %c0_i32 : i32, i32
  }
  func.func @transform_3(%arg0: i32, %arg1: i32) -> (i32, i32) {
    %c0_i32 = arith.constant 0 : i32
    %c0_i32_0 = arith.constant 0 : i32
    return %arg0, %c0_i32 : i32, i32
  }
  func.func @transform_4(%arg0: i32, %arg1: i32) -> (i32, i32) {
    %c0_i32 = arith.constant 0 : i32
    %c0_i32_0 = arith.constant 0 : i32
    %c0_i32_1 = arith.constant 0 : i32
    return %c0_i32, %c0_i32_0 : i32, i32
  }
  func.func @transform_5(%arg0: i32, %arg1: i32) -> (i32, i32) {
    %c0_i32 = arith.constant 0 : i32
    %c0_i32_0 = arith.constant 0 : i32
    %c0_i32_1 = arith.constant 0 : i32
    return %c0_i32, %c0_i32_0 : i32, i32
  }
  func.func @transform_6(%arg0: i32, %arg1: i32) -> (i32, i32) {
    %c0_i32 = arith.constant 0 : i32
    %c0_i32_0 = arith.constant 0 : i32
    %c0_i32_1 = arith.constant 0 : i32
    return %c0_i32, %c0_i32_0 : i32, i32
  }
  func.func @transform_7(%arg0: i32, %arg1: i32) -> (i32, i32) {
    %c0_i32 = arith.constant 0 : i32
    %c0_i32_0 = arith.constant 0 : i32
    return %arg0, %c0_i32 : i32, i32
  }
}

</mosaic_0001>

<bundles_post_ra>
// kernel: graphsage_forward.2
= control target key start
LH: loop header
LB: loop body
LE: loop exit
PB: predicated region body
PF: predicated region fallthrough
CT: control target
= control target key end

     0   :  { %s4585_s0 = inlined_call_operand.vmem [shape: bf16[1024,1024], index: 0, kind: input, shape index: {}]   ;;  %s4586_s1 = inlined_call_operand.vmem [shape: bf16[1024,128], index: 1, kind: input, shape index: {}, may-alias: {1,2}]   ;;  %s4587_s2 = inlined_call_operand.vmem [shape: bf16[1024,128], index: 2, kind: input, shape index: {}, may-alias: {1,2}]   ;;  %s4588_s3 = inlined_call_operand.vmem [shape: f32[1024,1], index: 3, kind: input, shape index: {}]   ;;  %s4589_s4 = inlined_call_operand.vmem [shape: f32[128,128], index: 4, kind: input, shape index: {}]   ;;  %s4590_s5 = inlined_call_operand.vmem [shape: f32[128,128], index: 5, kind: input, shape index: {}]   ;;  %s4591_s6 = inlined_call_operand.vmem [shape: f32[1,128], index: 6, kind: input, shape index: {}]   ;;  %s4592_s7 = inlined_call_operand.vmem [shape: bf16[1024,128], index: 7, kind: output, shape index: {}]  }
   0x1   :  { %4594 = sst [smem:[#allocation5_spill]] %s4585_s0 }
   0x2   :  { %s3977_s24 = smov 0   ;;  %s3979_s25 = smov 0  }
   0x3   :  { %s3981_s26 = smov 0   ;;  %s3983_s27 = smov 0  }
   0x4   :  { %s3985_s28 = smov 0   ;;  %s3987_s29 = smov 0  }
   0x5   :  { %s3989_s30 = smov 0  }
   0x6 LB: > { %s26_s8 = sadd.s32 1, %s3925_s28  ;;  %s29_s9 = sadd.s32 1, %s3929_s29  ;;  %s3933_s30 = sphi %s3989_s30, %s17_s30   ;;  %s3929_s29 = sphi %s3987_s29, %s4603_s29   ;;  %s3925_s28 = sphi %s3985_s28, %s4602_s28   ;;  %s3921_s27 = sphi %s3983_s27, %s4601_s27   ;;  %s3917_s26 = sphi %s3981_s26, %s4600_s26   ;;  %s3913_s25 = sphi %s3979_s25, %s4599_s25   ;;  %s3909_s24 = sphi %s3977_s24, %s4598_s24  }
   0x7   : > { %p27_p0 = scmp.ge.s32.totalorder %s26_s8, 2  ;;  %p45_p1 = scmp.ne.s32.totalorder %s3913_s25, %s3909_s24 }
   0x8   : > { %p46_p2 = scmp.eq.s32.totalorder %s3933_s30, 0  ;;  %s38_s13 = sadd.s32 1, %s3913_s25 }
   0x9   : > { %s4605_s8 = smov (%p27_p0, %s26_s8), 0  ;;  %s4607_s9 = smov (!%p27_p0, %s29_s9), %s3929_s29 }
   0xa   : > { %p47_p3 = por %p46_p2, %p45_p1  ;;  %p31_p4 = scmp.ge.s32.totalorder %s4607_s9, 4 }
   0xb   : > { %s34_s10 = ssub.s32 %s3925_s28, %s4605_s8  ;;  %p2759_p6 = scmp.ge.s32.totalorder %s3933_s30, 8 }
   0xc   : > { %s4609_s9 = smov (%p31_p4, %s4607_s9), 0 }
   0xd   : > { %4595 = sst [smem:[#allocation4_spill]] %s4609_s9  ;;  %s33_s11 = ssub.s32 %s3929_s29, %s4609_s9 }
   0xe   : > { %s35_s12 = sor.u32 %s34_s10, %s33_s11  ;;  %247 = sbr.rel (%p2759_p6) target bundleno = 63 (0x3f), region = 28 }
   0xf   : > { %p36_p5 = scmp.eq.s32.totalorder %s35_s12, 0 }
  0x11   : > { %s4028_s14 = scalar_select %p36_p5, %s3913_s25, %s38_s13  }
  0x15   : > { %250 = sbr.rel (!%p47_p3) target bundleno = 63 (0x3f), region = 32  ;;  %s252_s15 = sand.u32 (%p47_p3), 1, %s3913_s25  }
  0x16   : > { %s2762_s16 = sshll.u32 (%p47_p3), %s3925_s28, 2  ;;  %s2760_s17 = sshll.u32 (%p47_p3), %s252_s15, 9 }
  0x17   : > { %s2908_s18 = sshll.u32 (%p47_p3), %s3929_s29, 8  ;;  %s4596_s0 = sld [smem:[#allocation5_spill]] (%p47_p3) }
  0x18   : > { %s258_s19 = sadd.s32 (%p47_p3), %s2908_s18, %s2762_s16  ;;  %s4042_s10 = scalar_lea.vmem (%p47_p3), [#allocation3], %s2760_s17 }
  0x19   : > { %s2764_s20 = sshll.u32 (%p47_p3), %s258_s19, 2 }
  0x1d   : > { %s4037_s23 = scalar_lea.vmem %s4596_s0, %s2764_s20 }
  0x1e   : > { %v273_v0 = vld [vmem:[%s4037_s23] sm:$0xff]  ;;  %v275_v1 = vld [vmem:[%s4037_s23 + $0x8] sm:$0xff] }
  0x1f   : > { %v277_v2 = vld [vmem:[%s4037_s23 + $0x20] sm:$0xff]  ;;  %274 = vst [vmem:[%s4042_s10] sm:$0xff] %v273_v0  ;;  %276 = vst [vmem:[%s4042_s10 + $0x8] sm:$0xff] %v275_v1  ;;  %v279_v3 = vld [vmem:[%s4037_s23 + $0x28] sm:$0xff] }
  0x20   : > { %278 = vst [vmem:[%s4042_s10 + $0x10] sm:$0xff] %v277_v2  ;;  %v281_v4 = vld [vmem:[%s4037_s23 + $0x40] sm:$0xff]  ;;  %v283_v5 = vld [vmem:[%s4037_s23 + $0x48] sm:$0xff]  ;;  %280 = vst [vmem:[%s4042_s10 + $0x18] sm:$0xff] %v279_v3 }
  0x21   : > { %282 = vst [vmem:[%s4042_s10 + $0x20] sm:$0xff] %v281_v4  ;;  %284 = vst [vmem:[%s4042_s10 + $0x28] sm:$0xff] %v283_v5  ;;  %v285_v6 = vld [vmem:[%s4037_s23 + $0x60] sm:$0xff]  ;;  %v287_v7 = vld [vmem:[%s4037_s23 + $0x68] sm:$0xff] }
  0x22   : > { %v289_v8 = vld [vmem:[%s4037_s23 + $0x80] sm:$0xff]  ;;  %286 = vst [vmem:[%s4042_s10 + $0x30] sm:$0xff] %v285_v6  ;;  %288 = vst [vmem:[%s4042_s10 + $0x38] sm:$0xff] %v287_v7  ;;  %v291_v9 = vld [vmem:[%s4037_s23 + $0x88] sm:$0xff] }
  0x23   : > { %290 = vst [vmem:[%s4042_s10 + $0x40] sm:$0xff] %v289_v8  ;;  %v293_v10 = vld [vmem:[%s4037_s23 + $0xa0] sm:$0xff]  ;;  %v295_v11 = vld [vmem:[%s4037_s23 + $0xa8] sm:$0xff]  ;;  %292 = vst [vmem:[%s4042_s10 + $0x48] sm:$0xff] %v291_v9 }
  0x24   : > { %294 = vst [vmem:[%s4042_s10 + $0x50] sm:$0xff] %v293_v10  ;;  %296 = vst [vmem:[%s4042_s10 + $0x58] sm:$0xff] %v295_v11  ;;  %v297_v12 = vld [vmem:[%s4037_s23 + $0xc0] sm:$0xff]  ;;  %v299_v13 = vld [vmem:[%s4037_s23 + $0xc8] sm:$0xff] }
  0x25   : > { %v301_v14 = vld [vmem:[%s4037_s23 + $0xe0] sm:$0xff]  ;;  %298 = vst [vmem:[%s4042_s10 + $0x60] sm:$0xff] %v297_v12  ;;  %300 = vst [vmem:[%s4042_s10 + $0x68] sm:$0xff] %v299_v13  ;;  %v303_v15 = vld [vmem:[%s4037_s23 + $0xe8] sm:$0xff] }
  0x26   : > { %302 = vst [vmem:[%s4042_s10 + $0x70] sm:$0xff] %v301_v14  ;;  %v305_v16 = vld [vmem:[%s4037_s23 + $0x100] sm:$0xff]  ;;  %v307_v17 = vld [vmem:[%s4037_s23 + $0x108] sm:$0xff]  ;;  %304 = vst [vmem:[%s4042_s10 + $0x78] sm:$0xff] %v303_v15 }
  0x27   : > { %306 = vst [vmem:[%s4042_s10 + $0x80] sm:$0xff] %v305_v16  ;;  %308 = vst [vmem:[%s4042_s10 + $0x88] sm:$0xff] %v307_v17  ;;  %v309_v18 = vld [vmem:[%s4037_s23 + $0x120] sm:$0xff]  ;;  %v311_v19 = vld [vmem:[%s4037_s23 + $0x128] sm:$0xff] }
  0x28   : > { %v313_v20 = vld [vmem:[%s4037_s23 + $0x140] sm:$0xff]  ;;  %310 = vst [vmem:[%s4042_s10 + $0x90] sm:$0xff] %v309_v18  ;;  %312 = vst [vmem:[%s4042_s10 + $0x98] sm:$0xff] %v311_v19  ;;  %v315_v21 = vld [vmem:[%s4037_s23 + $0x148] sm:$0xff] }
  0x29   : > { %314 = vst [vmem:[%s4042_s10 + $0xa0] sm:$0xff] %v313_v20  ;;  %v317_v22 = vld [vmem:[%s4037_s23 + $0x160] sm:$0xff]  ;;  %v319_v23 = vld [vmem:[%s4037_s23 + $0x168] sm:$0xff]  ;;  %316 = vst [vmem:[%s4042_s10 + $0xa8] sm:$0xff] %v315_v21 }
  0x2a   : > { %318 = vst [vmem:[%s4042_s10 + $0xb0] sm:$0xff] %v317_v22  ;;  %320 = vst [vmem:[%s4042_s10 + $0xb8] sm:$0xff] %v319_v23  ;;  %v321_v24 = vld [vmem:[%s4037_s23 + $0x180] sm:$0xff]  ;;  %v323_v25 = vld [vmem:[%s4037_s23 + $0x188] sm:$0xff] }
  0x2b   : > { %v325_v26 = vld [vmem:[%s4037_s23 + $0x1a0] sm:$0xff]  ;;  %322 = vst [vmem:[%s4042_s10 + $0xc0] sm:$0xff] %v321_v24  ;;  %324 = vst [vmem:[%s4042_s10 + $0xc8] sm:$0xff] %v323_v25  ;;  %v327_v27 = vld [vmem:[%s4037_s23 + $0x1a8] sm:$0xff] }
  0x2c   : > { %326 = vst [vmem:[%s4042_s10 + $0xd0] sm:$0xff] %v325_v26  ;;  %v329_v28 = vld [vmem:[%s4037_s23 + $0x1c0] sm:$0xff]  ;;  %v331_v29 = vld [vmem:[%s4037_s23 + $0x1c8] sm:$0xff]  ;;  %328 = vst [vmem:[%s4042_s10 + $0xd8] sm:$0xff] %v327_v27 }
  0x2d   : > { %330 = vst [vmem:[%s4042_s10 + $0xe0] sm:$0xff] %v329_v28  ;;  %332 = vst [vmem:[%s4042_s10 + $0xe8] sm:$0xff] %v331_v29  ;;  %v333_v30 = vld [vmem:[%s4037_s23 + $0x1e0] sm:$0xff]  ;;  %v335_v31 = vld [vmem:[%s4037_s23 + $0x1e8] sm:$0xff] }
  0x2e   : > { %v337_v32 = vld [vmem:[%s4037_s23 + $0x200] sm:$0xff]  ;;  %334 = vst [vmem:[%s4042_s10 + $0xf0] sm:$0xff] %v333_v30  ;;  %336 = vst [vmem:[%s4042_s10 + $0xf8] sm:$0xff] %v335_v31  ;;  %v339_v33 = vld [vmem:[%s4037_s23 + $0x208] sm:$0xff] }
  0x2f   : > { %338 = vst [vmem:[%s4042_s10 + $0x100] sm:$0xff] %v337_v32  ;;  %v341_v34 = vld [vmem:[%s4037_s23 + $0x220] sm:$0xff]  ;;  %v343_v35 = vld [vmem:[%s4037_s23 + $0x228] sm:$0xff]  ;;  %340 = vst [vmem:[%s4042_s10 + $0x108] sm:$0xff] %v339_v33 }
  0x30   : > { %342 = vst [vmem:[%s4042_s10 + $0x110] sm:$0xff] %v341_v34  ;;  %344 = vst [vmem:[%s4042_s10 + $0x118] sm:$0xff] %v343_v35  ;;  %v345_v36 = vld [vmem:[%s4037_s23 + $0x240] sm:$0xff]  ;;  %v347_v37 = vld [vmem:[%s4037_s23 + $0x248] sm:$0xff] }
  0x31   : > { %v349_v38 = vld [vmem:[%s4037_s23 + $0x260] sm:$0xff]  ;;  %346 = vst [vmem:[%s4042_s10 + $0x120] sm:$0xff] %v345_v36  ;;  %348 = vst [vmem:[%s4042_s10 + $0x128] sm:$0xff] %v347_v37  ;;  %v351_v39 = vld [vmem:[%s4037_s23 + $0x268] sm:$0xff] }
  0x32   : > { %350 = vst [vmem:[%s4042_s10 + $0x130] sm:$0xff] %v349_v38  ;;  %v353_v40 = vld [vmem:[%s4037_s23 + $0x280] sm:$0xff]  ;;  %v355_v41 = vld [vmem:[%s4037_s23 + $0x288] sm:$0xff]  ;;  %352 = vst [vmem:[%s4042_s10 + $0x138] sm:$0xff] %v351_v39 }
  0x33   : > { %354 = vst [vmem:[%s4042_s10 + $0x140] sm:$0xff] %v353_v40  ;;  %356 = vst [vmem:[%s4042_s10 + $0x148] sm:$0xff] %v355_v41  ;;  %v357_v42 = vld [vmem:[%s4037_s23 + $0x2a0] sm:$0xff]  ;;  %v359_v43 = vld [vmem:[%s4037_s23 + $0x2a8] sm:$0xff] }
  0x34   : > { %v361_v44 = vld [vmem:[%s4037_s23 + $0x2c0] sm:$0xff]  ;;  %358 = vst [vmem:[%s4042_s10 + $0x150] sm:$0xff] %v357_v42  ;;  %360 = vst [vmem:[%s4042_s10 + $0x158] sm:$0xff] %v359_v43  ;;  %v363_v45 = vld [vmem:[%s4037_s23 + $0x2c8] sm:$0xff] }
  0x35   : > { %362 = vst [vmem:[%s4042_s10 + $0x160] sm:$0xff] %v361_v44  ;;  %v365_v46 = vld [vmem:[%s4037_s23 + $0x2e0] sm:$0xff]  ;;  %v367_v47 = vld [vmem:[%s4037_s23 + $0x2e8] sm:$0xff]  ;;  %364 = vst [vmem:[%s4042_s10 + $0x168] sm:$0xff] %v363_v45 }
  0x36   : > { %366 = vst [vmem:[%s4042_s10 + $0x170] sm:$0xff] %v365_v46  ;;  %368 = vst [vmem:[%s4042_s10 + $0x178] sm:$0xff] %v367_v47  ;;  %v369_v48 = vld [vmem:[%s4037_s23 + $0x300] sm:$0xff]  ;;  %v371_v49 = vld [vmem:[%s4037_s23 + $0x308] sm:$0xff] }
  0x37   : > { %v373_v50 = vld [vmem:[%s4037_s23 + $0x320] sm:$0xff]  ;;  %370 = vst [vmem:[%s4042_s10 + $0x180] sm:$0xff] %v369_v48  ;;  %372 = vst [vmem:[%s4042_s10 + $0x188] sm:$0xff] %v371_v49  ;;  %v375_v51 = vld [vmem:[%s4037_s23 + $0x328] sm:$0xff] }
  0x38   : > { %374 = vst [vmem:[%s4042_s10 + $0x190] sm:$0xff] %v373_v50  ;;  %v377_v52 = vld [vmem:[%s4037_s23 + $0x340] sm:$0xff]  ;;  %v379_v53 = vld [vmem:[%s4037_s23 + $0x348] sm:$0xff]  ;;  %376 = vst [vmem:[%s4042_s10 + $0x198] sm:$0xff] %v375_v51 }
  0x39   : > { %378 = vst [vmem:[%s4042_s10 + $0x1a0] sm:$0xff] %v377_v52  ;;  %380 = vst [vmem:[%s4042_s10 + $0x1a8] sm:$0xff] %v379_v53  ;;  %v381_v54 = vld [vmem:[%s4037_s23 + $0x360] sm:$0xff]  ;;  %v383_v55 = vld [vmem:[%s4037_s23 + $0x368] sm:$0xff] }
  0x3a   : > { %v385_v56 = vld [vmem:[%s4037_s23 + $0x380] sm:$0xff]  ;;  %382 = vst [vmem:[%s4042_s10 + $0x1b0] sm:$0xff] %v381_v54  ;;  %384 = vst [vmem:[%s4042_s10 + $0x1b8] sm:$0xff] %v383_v55  ;;  %v387_v57 = vld [vmem:[%s4037_s23 + $0x388] sm:$0xff] }
  0x3b   : > { %386 = vst [vmem:[%s4042_s10 + $0x1c0] sm:$0xff] %v385_v56  ;;  %v389_v58 = vld [vmem:[%s4037_s23 + $0x3a0] sm:$0xff]  ;;  %v391_v59 = vld [vmem:[%s4037_s23 + $0x3a8] sm:$0xff]  ;;  %388 = vst [vmem:[%s4042_s10 + $0x1c8] sm:$0xff] %v387_v57 }
  0x3c   : > { %390 = vst [vmem:[%s4042_s10 + $0x1d0] sm:$0xff] %v389_v58  ;;  %392 = vst [vmem:[%s4042_s10 + $0x1d8] sm:$0xff] %v391_v59  ;;  %v393_v60 = vld [vmem:[%s4037_s23 + $0x3c0] sm:$0xff]  ;;  %v395_v61 = vld [vmem:[%s4037_s23 + $0x3c8] sm:$0xff] }
  0x3d   : > { %v397_v62 = vld [vmem:[%s4037_s23 + $0x3e0] sm:$0xff]  ;;  %394 = vst [vmem:[%s4042_s10 + $0x1e0] sm:$0xff] %v393_v60  ;;  %396 = vst [vmem:[%s4042_s10 + $0x1e8] sm:$0xff] %v395_v61  ;;  %v399_v63 = vld [vmem:[%s4037_s23 + $0x3e8] sm:$0xff] }
  0x3e   : > { %398 = vst [vmem:[%s4042_s10 + $0x1f0] sm:$0xff] %v397_v62  ;;  %400 = vst [vmem:[%s4042_s10 + $0x1f8] sm:$0xff] %v399_v63 }
  0x3f PF: > { %p2765_p7 = scmp.ge.s32.totalorder %s3933_s30, 1  ;;  %p432_p8 = scmp.lt.s32.totalorder %s3933_s30, 9 }
  0x41   : > { %p433_p9 = pnand %p2765_p7, %p432_p8 }
  0x42   : > { %s439_s11 = sand.u32 (!%p433_p9), 1, %s3909_s24   ;;  %s2767_s12 = sshll.u32 (!%p433_p9), %s3917_s26, 6 }
  0x43   : > { %436 = sbr.rel (%p433_p9) target bundleno = 858 (0x35a), region = 67  ;;  %s2766_s13 = sshll.u32 (!%p433_p9), %s439_s11, 9 }
  0x44   : > { %p488_p10 = scmp.lt.s32.totalorder (!%p433_p9), %s2767_s12, 127  ;;  %s2769_s15 = sshll.u32 (!%p433_p9), %s3921_s27, 5 }
  0x45   : > { %p494_p11 = scmp.lt.s32.totalorder (!%p433_p9), %s2769_s15, 127  ;;  %p2775_p12 = scmp.ne.s32.totalorder (!%p433_p9), %s3917_s26, 0 }
  0x4a   : > { %s4611_s12 = smov (!%p488_p10, %s2767_s12), 127  ;;  %s4613_s15 = smov (!%p494_p11, %s2769_s15), 127 }
  0x4b   : > { %s2768_s16 = sshll.u32 %s4611_s12, 2  ;;  %s2770_s20 = sshll.u32 %s4613_s15, 2  ;;  %v3935_v0 = vmov (!%p2775_p12), 0.0  }
  0x4c   : > { %s4177_s19 = scalar_lea.vmem %s4586_s1, %s2768_s16  ;;  %s2772_s21 = sshll.u32 %s4613_s15, 3  ;;  %516 = vst [vmem:[#allocation2] sm:$0xff] (!%p2775_p12), %v3935_v0  ;;  %517 = vst [vmem:[#allocation2 + $0x8] sm:$0xff] (!%p2775_p12), %v3935_v0 }
  0x4d   : > { %s4182_s10 = scalar_lea.vmem %s4587_s2, %s2770_s20  ;;  %s4187_s27 = scalar_lea.vmem %s4588_s3, %s2772_s21  ;;  %518 = vst [vmem:[#allocation2 + $0x10] sm:$0xff] (!%p2775_p12), %v3935_v0  ;;  %519 = vst [vmem:[#allocation2 + $0x18] sm:$0xff] (!%p2775_p12), %v3935_v0 }
  0x4e   : > { %s4192_s9 = scalar_lea.vmem %s4592_s7, %s2770_s20  ;;  %s4194_s16 = scalar_lea.vmem [#allocation3], %s2766_s13  ;;  %520 = vst [vmem:[#allocation2 + $0x20] sm:$0xff] (!%p2775_p12), %v3935_v0  ;;  %521 = vst [vmem:[#allocation2 + $0x28] sm:$0xff] (!%p2775_p12), %v3935_v0 }
  0x4f   : > { %515 = sbr.rel (%p2775_p12) target bundleno = 92 (0x5c), region = 75  ;;  %522 = vst [vmem:[#allocation2 + $0x30] sm:$0xff] (!%p2775_p12), %v3935_v0  ;;  %523 = vst [vmem:[#allocation2 + $0x38] sm:$0xff] (!%p2775_p12), %v3935_v0 }
  0x50   : > { %524 = vst [vmem:[#allocation2 + $0x40] sm:$0xff] (!%p2775_p12), %v3935_v0  ;;  %525 = vst [vmem:[#allocation2 + $0x48] sm:$0xff] (!%p2775_p12), %v3935_v0 }
  0x51   : > { %526 = vst [vmem:[#allocation2 + $0x50] sm:$0xff] (!%p2775_p12), %v3935_v0  ;;  %527 = vst [vmem:[#allocation2 + $0x58] sm:$0xff] (!%p2775_p12), %v3935_v0 }
  0x52   : > { %528 = vst [vmem:[#allocation2 + $0x60] sm:$0xff] (!%p2775_p12), %v3935_v0  ;;  %529 = vst [vmem:[#allocation2 + $0x68] sm:$0xff] (!%p2775_p12), %v3935_v0 }
  0x53   : > { %530 = vst [vmem:[#allocation2 + $0x70] sm:$0xff] (!%p2775_p12), %v3935_v0  ;;  %531 = vst [vmem:[#allocation2 + $0x78] sm:$0xff] (!%p2775_p12), %v3935_v0 }
  0x54   : > { %532 = vst [vmem:[#allocation2 + $0x80] sm:$0xff] (!%p2775_p12), %v3935_v0  ;;  %533 = vst [vmem:[#allocation2 + $0x88] sm:$0xff] (!%p2775_p12), %v3935_v0 }
  0x55   : > { %534 = vst [vmem:[#allocation2 + $0x90] sm:$0xff] (!%p2775_p12), %v3935_v0  ;;  %535 = vst [vmem:[#allocation2 + $0x98] sm:$0xff] (!%p2775_p12), %v3935_v0 }
  0x56   : > { %536 = vst [vmem:[#allocation2 + $0xa0] sm:$0xff] %v3935_v0  ;;  %537 = vst [vmem:[#allocation2 + $0xa8] sm:$0xff] %v3935_v0 }
  0x57   : > { %538 = vst [vmem:[#allocation2 + $0xb0] sm:$0xff] %v3935_v0  ;;  %539 = vst [vmem:[#allocation2 + $0xb8] sm:$0xff] %v3935_v0 }
  0x58   : > { %540 = vst [vmem:[#allocation2 + $0xc0] sm:$0xff] %v3935_v0  ;;  %541 = vst [vmem:[#allocation2 + $0xc8] sm:$0xff] %v3935_v0 }
  0x59   : > { %542 = vst [vmem:[#allocation2 + $0xd0] sm:$0xff] %v3935_v0  ;;  %543 = vst [vmem:[#allocation2 + $0xd8] sm:$0xff] %v3935_v0 }
  0x5a   : > { %544 = vst [vmem:[#allocation2 + $0xe0] sm:$0xff] %v3935_v0  ;;  %545 = vst [vmem:[#allocation2 + $0xe8] sm:$0xff] %v3935_v0 }
  0x5b   : > { %546 = vst [vmem:[#allocation2 + $0xf0] sm:$0xff] %v3935_v0  ;;  %547 = vst [vmem:[#allocation2 + $0xf8] sm:$0xff] %v3935_v0 }
  0x5c PF: > { %v3749_v1 = vld [vmem:[%s4177_s19 + $0x40] sm:$0xff]   ;;  %v3753_v5 = vld [vmem:[%s4177_s19 + $0x48] sm:$0xff]   ;;  %v3757_v9 = vld [vmem:[%s4177_s19 + $0x50] sm:$0xff]   ;;  %p2872_p13 = scmp.ne.s32.totalorder %s3917_s26, 1 }
  0x5d   : > { %v3750_v2 = vld [vmem:[%s4177_s19 + $0xc0] sm:$0xff]   ;;  %3115 = vmatprep.subr.bf16.mxu0 %v3749_v1  ;;  %v3754_v6 = vld [vmem:[%s4177_s19 + $0xc8] sm:$0xff]   ;;  %v3758_v10 = vld [vmem:[%s4177_s19 + $0xd0] sm:$0xff]  }
  0x5e   : > { %v3751_v3 = vld [vmem:[%s4177_s19] sm:$0xff]   ;;  %3227 = vmatprep.subr.bf16.mxu1 %v3750_v2  ;;  %v3755_v7 = vld [vmem:[%s4177_s19 + $0x8] sm:$0xff]   ;;  %v3759_v11 = vld [vmem:[%s4177_s19 + $0x10] sm:$0xff]  }
  0x5f   : > { %v3752_v4 = vld [vmem:[%s4177_s19 + $0x80] sm:$0xff]   ;;  %3116 = vmatpush3.bf16.msra.mxu0 %v3751_v3  ;;  %v3756_v8 = vld [vmem:[%s4177_s19 + $0x88] sm:$0xff]   ;;  %v3760_v12 = vld [vmem:[%s4177_s19 + $0x90] sm:$0xff]  }
  0x60   : > { %3228 = vmatpush3.bf16.msra.mxu1 %v3752_v4  ;;  %3117 = vmatprep.subr.bf16.mxu0 %v3753_v5  ;;  %v3761_v13 = vld [vmem:[%s4177_s19 + $0x58] sm:$0xff]   ;;  %v3765_v17 = vld [vmem:[%s4177_s19 + $0x60] sm:$0xff]   ;;  %v3769_v21 = vld [vmem:[%s4177_s19 + $0x68] sm:$0xff]  }
  0x61   : > { %3229 = vmatprep.subr.bf16.mxu1 %v3754_v6  ;;  %v3762_v14 = vld [vmem:[%s4177_s19 + $0xd8] sm:$0xff]   ;;  %v3766_v18 = vld [vmem:[%s4177_s19 + $0xe0] sm:$0xff]   ;;  %v3770_v22 = vld [vmem:[%s4177_s19 + $0xe8] sm:$0xff]  }
  0x62   : > { %v3763_v15 = vld [vmem:[%s4177_s19 + $0x18] sm:$0xff]   ;;  %v3767_v19 = vld [vmem:[%s4177_s19 + $0x20] sm:$0xff]   ;;  %v3771_v23 = vld [vmem:[%s4177_s19 + $0x28] sm:$0xff]  }
  0x63   : > { %3118 = vmatpush3.bf16.msra.mxu0 %v3755_v7  ;;  %v3764_v16 = vld [vmem:[%s4177_s19 + $0x98] sm:$0xff]   ;;  %v3768_v20 = vld [vmem:[%s4177_s19 + $0xa0] sm:$0xff]   ;;  %v3772_v24 = vld [vmem:[%s4177_s19 + $0xa8] sm:$0xff]  }
  0x64   : > { %3230 = vmatpush3.bf16.msra.mxu1 %v3756_v8  ;;  %3119 = vmatprep.subr.bf16.mxu0 %v3757_v9  ;;  %v3773_v25 = vld [vmem:[%s4177_s19 + $0x70] sm:$0xff]   ;;  %v3777_v29 = vld [vmem:[%s4177_s19 + $0x78] sm:$0xff]  }
  0x65   : > { %3231 = vmatprep.subr.bf16.mxu1 %v3758_v10  ;;  %v3774_v26 = vld [vmem:[%s4177_s19 + $0xf0] sm:$0xff]   ;;  %v3778_v30 = vld [vmem:[%s4177_s19 + $0xf8] sm:$0xff]  }
  0x66   : > { %v3775_v27 = vld [vmem:[%s4177_s19 + $0x30] sm:$0xff]   ;;  %v3779_v31 = vld [vmem:[%s4177_s19 + $0x38] sm:$0xff]  }
  0x67   : > { %3120 = vmatpush3.bf16.msra.mxu0 %v3759_v11  ;;  %v3776_v28 = vld [vmem:[%s4177_s19 + $0xb0] sm:$0xff]   ;;  %v3780_v32 = vld [vmem:[%s4177_s19 + $0xb8] sm:$0xff]  }
  0x68   : > { %3232 = vmatpush3.bf16.msra.mxu1 %v3760_v12  ;;  %3121 = vmatprep.subr.bf16.mxu0 %v3761_v13  ;;  %v3781_v33 = vld [vmem:[%s4194_s16] ss:$16 sps:$4 sm:$0xff]   ;;  %v3783_v34 = vld [vmem:[%s4194_s16 + $0x4] ss:$16 sps:$4 sm:$0xff]   ;;  %v3784_v35 = vld [vmem:[%s4194_s16 + $0x8] ss:$16 sps:$4 sm:$0xff]  }
  0x69   : > { %3233 = vmatprep.subr.bf16.mxu1 %v3762_v14  ;;  %v3786_v36 = vld [vmem:[%s4194_s16 + $0xc] ss:$16 sps:$4 sm:$0xff]   ;;  %1252 = vmatprep.mubr.bf16.mxu0 %v3783_v34  ;;  %v3787_v37 = vld [vmem:[%s4194_s16 + $0x24] ss:$16 sps:$4 sm:$0xff]   ;;  %v3791_v39 = vld [vmem:[%s4194_s16 + $0x20] ss:$16 sps:$4 sm:$0xff]  }
  0x6a   : > { %1413 = vmatprep.mubr.bf16.mxu1 %v3786_v36  ;;  %v3789_v38 = vld [vmem:[%s4194_s16 + $0x2c] ss:$16 sps:$4 sm:$0xff]   ;;  %v3792_v40 = vld [vmem:[%s4194_s16 + $0x28] ss:$16 sps:$4 sm:$0xff]   ;;  %v3793_v41 = vld [vmem:[%s4194_s16 + $0x44] ss:$16 sps:$4 sm:$0xff]  }
  0x6b   : > { %3122 = vmatpush3.bf16.msra.mxu0 %v3763_v15  ;;  %v3795_v42 = vld [vmem:[%s4194_s16 + $0x4c] ss:$16 sps:$4 sm:$0xff]   ;;  %v3797_v43 = vld [vmem:[%s4194_s16 + $0x40] ss:$16 sps:$4 sm:$0xff]   ;;  %v3798_v44 = vld [vmem:[%s4194_s16 + $0x48] ss:$16 sps:$4 sm:$0xff]  }
  0x6c   : > { %3234 = vmatpush3.bf16.msra.mxu1 %v3764_v16  ;;  %3123 = vmatprep.subr.bf16.mxu0 %v3765_v17  ;;  %v3799_v45 = vld [vmem:[%s4194_s16 + $0x64] ss:$16 sps:$4 sm:$0xff]   ;;  %v3801_v46 = vld [vmem:[%s4194_s16 + $0x6c] ss:$16 sps:$4 sm:$0xff]   ;;  %v3803_v47 = vld [vmem:[%s4194_s16 + $0x60] ss:$16 sps:$4 sm:$0xff]  }
  0x6d   : > { %3235 = vmatprep.subr.bf16.mxu1 %v3766_v18  ;;  %v3804_v48 = vld [vmem:[%s4194_s16 + $0x68] ss:$16 sps:$4 sm:$0xff]   ;;  %v3805_v49 = vld [vmem:[%s4194_s16 + $0x84] ss:$16 sps:$4 sm:$0xff]   ;;  %v3807_v50 = vld [vmem:[%s4194_s16 + $0x8c] ss:$16 sps:$4 sm:$0xff]  }
  0x6e   : > { %v3809_v51 = vld [vmem:[%s4194_s16 + $0x80] ss:$16 sps:$4 sm:$0xff]   ;;  %v3810_v52 = vld [vmem:[%s4194_s16 + $0x88] ss:$16 sps:$4 sm:$0xff]   ;;  %v3811_v53 = vld [vmem:[%s4194_s16 + $0xa4] ss:$16 sps:$4 sm:$0xff]  }
  0x6f   : > { %3124 = vmatpush3.bf16.msra.mxu0 %v3767_v19  ;;  %v3813_v54 = vld [vmem:[%s4194_s16 + $0xac] ss:$16 sps:$4 sm:$0xff]   ;;  %v3815_v55 = vld [vmem:[%s4194_s16 + $0xa0] ss:$16 sps:$4 sm:$0xff]   ;;  %v3816_v56 = vld [vmem:[%s4194_s16 + $0xa8] ss:$16 sps:$4 sm:$0xff]  }
  0x70   : > { %3236 = vmatpush3.bf16.msra.mxu1 %v3768_v20  ;;  %3125 = vmatprep.subr.bf16.mxu0 %v3769_v21  ;;  %v3817_v57 = vld [vmem:[%s4194_s16 + $0xc4] ss:$16 sps:$4 sm:$0xff]   ;;  %v3819_v58 = vld [vmem:[%s4194_s16 + $0xcc] ss:$16 sps:$4 sm:$0xff]   ;;  %v3821_v59 = vld [vmem:[%s4194_s16 + $0xc0] ss:$16 sps:$4 sm:$0xff]  }
  0x71   : > { %3237 = vmatprep.subr.bf16.mxu1 %v3770_v22  ;;  %v3822_v60 = vld [vmem:[%s4194_s16 + $0xc8] ss:$16 sps:$4 sm:$0xff]   ;;  %v3823_v61 = vld [vmem:[%s4194_s16 + $0xe4] ss:$16 sps:$4 sm:$0xff]   ;;  %v3825_v62 = vld [vmem:[%s4194_s16 + $0xec] ss:$16 sps:$4 sm:$0xff]  }
  0x72   : > { %v3827_v63 = vld [vmem:[%s4194_s16 + $0xe0] ss:$16 sps:$4 sm:$0xff]   ;;  %v3828_v0 = vld [vmem:[%s4194_s16 + $0xe8] ss:$16 sps:$4 sm:$0xff]   ;;  %v3829_v1 = vld [vmem:[%s4194_s16 + $0x104] ss:$16 sps:$4 sm:$0xff]  }
  0x73   : > { %3126 = vmatpush3.bf16.msra.mxu0 %v3771_v23  ;;  %v3831_v2 = vld [vmem:[%s4194_s16 + $0x10c] ss:$16 sps:$4 sm:$0xff]   ;;  %v3833_v3 = vld [vmem:[%s4194_s16 + $0x100] ss:$16 sps:$4 sm:$0xff]   ;;  %v3834_v4 = vld [vmem:[%s4194_s16 + $0x108] ss:$16 sps:$4 sm:$0xff]  }
  0x74   : > { %3238 = vmatpush3.bf16.msra.mxu1 %v3772_v24  ;;  %3127 = vmatprep.subr.bf16.mxu0 %v3773_v25  ;;  %v3835_v5 = vld [vmem:[%s4194_s16 + $0x124] ss:$16 sps:$4 sm:$0xff]   ;;  %v3837_v6 = vld [vmem:[%s4194_s16 + $0x12c] ss:$16 sps:$4 sm:$0xff]   ;;  %v3839_v7 = vld [vmem:[%s4194_s16 + $0x120] ss:$16 sps:$4 sm:$0xff]  }
  0x75   : > { %3239 = vmatprep.subr.bf16.mxu1 %v3774_v26  ;;  %v3840_v8 = vld [vmem:[%s4194_s16 + $0x128] ss:$16 sps:$4 sm:$0xff]   ;;  %v3841_v9 = vld [vmem:[%s4194_s16 + $0x144] ss:$16 sps:$4 sm:$0xff]   ;;  %v3843_v10 = vld [vmem:[%s4194_s16 + $0x14c] ss:$16 sps:$4 sm:$0xff]  }
  0x76   : > { %v3845_v11 = vld [vmem:[%s4194_s16 + $0x140] ss:$16 sps:$4 sm:$0xff]   ;;  %v3846_v12 = vld [vmem:[%s4194_s16 + $0x148] ss:$16 sps:$4 sm:$0xff]   ;;  %v3847_v13 = vld [vmem:[%s4194_s16 + $0x164] ss:$16 sps:$4 sm:$0xff]  }
  0x77   : > { %3128 = vmatpush3.bf16.msra.mxu0 %v3775_v27  ;;  %v3849_v14 = vld [vmem:[%s4194_s16 + $0x16c] ss:$16 sps:$4 sm:$0xff]   ;;  %v3851_v15 = vld [vmem:[%s4194_s16 + $0x160] ss:$16 sps:$4 sm:$0xff]   ;;  %v3852_v16 = vld [vmem:[%s4194_s16 + $0x168] ss:$16 sps:$4 sm:$0xff]  }
  0x78   : > { %3240 = vmatpush3.bf16.msra.mxu1 %v3776_v28  ;;  %3129 = vmatprep.subr.bf16.mxu0 %v3777_v29  ;;  %v3853_v17 = vld [vmem:[%s4194_s16 + $0x184] ss:$16 sps:$4 sm:$0xff]   ;;  %v3855_v18 = vld [vmem:[%s4194_s16 + $0x18c] ss:$16 sps:$4 sm:$0xff]   ;;  %v3857_v19 = vld [vmem:[%s4194_s16 + $0x180] ss:$16 sps:$4 sm:$0xff]  }
  0x79   : > { %3241 = vmatprep.subr.bf16.mxu1 %v3778_v30  ;;  %v3858_v20 = vld [vmem:[%s4194_s16 + $0x188] ss:$16 sps:$4 sm:$0xff]   ;;  %v3859_v21 = vld [vmem:[%s4194_s16 + $0x1a4] ss:$16 sps:$4 sm:$0xff]   ;;  %v3861_v22 = vld [vmem:[%s4194_s16 + $0x1ac] ss:$16 sps:$4 sm:$0xff]  }
  0x7a   : > { %v3863_v23 = vld [vmem:[%s4194_s16 + $0x1a0] ss:$16 sps:$4 sm:$0xff]   ;;  %v3864_v24 = vld [vmem:[%s4194_s16 + $0x1a8] ss:$16 sps:$4 sm:$0xff]   ;;  %v3865_v25 = vld [vmem:[%s4194_s16 + $0x1c4] ss:$16 sps:$4 sm:$0xff]  }
  0x7b   : > { %3130 = vmatpush3.bf16.msra.mxu0 %v3779_v31  ;;  %v3867_v26 = vld [vmem:[%s4194_s16 + $0x1cc] ss:$16 sps:$4 sm:$0xff]   ;;  %v3869_v27 = vld [vmem:[%s4194_s16 + $0x1c0] ss:$16 sps:$4 sm:$0xff]   ;;  %v3870_v28 = vld [vmem:[%s4194_s16 + $0x1c8] ss:$16 sps:$4 sm:$0xff]  }
  0x7c   : > { %3242 = vmatpush3.bf16.msra.mxu1 %v3780_v32  ;;  %v3871_v29 = vld [vmem:[%s4194_s16 + $0x1e4] ss:$16 sps:$4 sm:$0xff]   ;;  %v3873_v30 = vld [vmem:[%s4194_s16 + $0x1ec] ss:$16 sps:$4 sm:$0xff]   ;;  %v3875_v31 = vld [vmem:[%s4194_s16 + $0x1e0] ss:$16 sps:$4 sm:$0xff]  }
  0x7d   : > { %v3876_v32 = vld [vmem:[%s4194_s16 + $0x1e8] ss:$16 sps:$4 sm:$0xff]  }
  0x7e   : > { %1253 = vmatmul.mubr.bf16.vlgmr.msra.gmra.mrb[0].mxu0 %v3781_v33 }
  0x7f   : > { %1414 = vmatmul.mubr.bf16.vlgmr.msra.gmra.mrb[0].mxu1 %v3784_v35  ;;  %1260 = vmatprep.mubr.bf16.mxu0 %v3787_v37 }
  0x80   : > { %1421 = vmatprep.mubr.bf16.mxu1 %v3789_v38 }
  0x86   : > { %1261 = vmatmul.mubr.bf16.gmra.mrb[4].mxu0 %v3791_v39 }
  0x87   : > { %1422 = vmatmul.mubr.bf16.gmra.mrb[4].mxu1 %v3792_v40  ;;  %1268 = vmatprep.mubr.bf16.mxu0 %v3793_v41 }
  0x88   : > { %1429 = vmatprep.mubr.bf16.mxu1 %v3795_v42  ;;  %v548_v42 = vld [vmem:[#allocation2] sm:$0xff] }
  0x8e   : > { %1269 = vmatmul.mubr.bf16.gmra.mrb[8].mxu0 %v3797_v43 }
  0x8f   : > { %1430 = vmatmul.mubr.bf16.gmra.mrb[8].mxu1 %v3798_v44  ;;  %1276 = vmatprep.mubr.bf16.mxu0 %v3799_v45 }
  0x90   : > { %1437 = vmatprep.mubr.bf16.mxu1 %v3801_v46 }
  0x96   : > { %1277 = vmatmul.mubr.bf16.gmra.mrb[12].mxu0 %v3803_v47  ;;  %v549_v47 = vld [vmem:[#allocation2 + $0x8] sm:$0xff] }
  0x97   : > { %1438 = vmatmul.mubr.bf16.gmra.mrb[12].mxu1 %v3804_v48  ;;  %1284 = vmatprep.mubr.bf16.mxu0 %v3805_v49 }
  0x98   : > { %1445 = vmatprep.mubr.bf16.mxu1 %v3807_v50 }
  0x9e   : > { %1285 = vmatmul.mubr.bf16.gmra.mrb[16].mxu0 %v3809_v51 }
  0x9f   : > { %1446 = vmatmul.mubr.bf16.gmra.mrb[16].mxu1 %v3810_v52  ;;  %1292 = vmatprep.mubr.bf16.mxu0 %v3811_v53 }
  0xa0   : > { %1453 = vmatprep.mubr.bf16.mxu1 %v3813_v54 }
  0xa6   : > { %1293 = vmatmul.mubr.bf16.gmra.mrb[20].mxu0 %v3815_v55 }
  0xa7   : > { %1454 = vmatmul.mubr.bf16.gmra.mrb[20].mxu1 %v3816_v56  ;;  %1300 = vmatprep.mubr.bf16.mxu0 %v3817_v57 }
  0xa8   : > { %1461 = vmatprep.mubr.bf16.mxu1 %v3819_v58 }
  0xae   : > { %1301 = vmatmul.mubr.bf16.gmra.mrb[24].mxu0 %v3821_v59 }
  0xaf   : > { %1462 = vmatmul.mubr.bf16.gmra.mrb[24].mxu1 %v3822_v60  ;;  %1308 = vmatprep.mubr.bf16.mxu0 %v3823_v61  ;;  %v550_v60 = vld [vmem:[#allocation2 + $0x10] sm:$0xff] }
  0xb0   : > { %1469 = vmatprep.mubr.bf16.mxu1 %v3825_v62 }
  0xb6   : > { %1309 = vmatmul.mubr.bf16.gmra.mrb[28].mxu0 %v3827_v63 }
  0xb7   : > { %1470 = vmatmul.mubr.bf16.gmra.mrb[28].mxu1 %v3828_v0  ;;  %1316 = vmatprep.mubr.bf16.mxu0 %v3829_v1  ;;  %v551_v1 = vld [vmem:[#allocation2 + $0x18] sm:$0xff] }
  0xb8   : > { %1477 = vmatprep.mubr.bf16.mxu1 %v3831_v2 }
  0xbe   : > { %1317 = vmatmul.mubr.bf16.gmra.mrb[32].mxu0 %v3833_v3 }
  0xbf   : > { %1478 = vmatmul.mubr.bf16.gmra.mrb[32].mxu1 %v3834_v4  ;;  %1324 = vmatprep.mubr.bf16.mxu0 %v3835_v5 }
  0xc0   : > { %1485 = vmatprep.mubr.bf16.mxu1 %v3837_v6 }
  0xc6   : > { %1325 = vmatmul.mubr.bf16.gmra.mrb[36].mxu0 %v3839_v7 }
  0xc7   : > { %1486 = vmatmul.mubr.bf16.gmra.mrb[36].mxu1 %v3840_v8  ;;  %1332 = vmatprep.mubr.bf16.mxu0 %v3841_v9 }
  0xc8   : > { %1493 = vmatprep.mubr.bf16.mxu1 %v3843_v10 }
  0xce   : > { %1333 = vmatmul.mubr.bf16.gmra.mrb[40].mxu0 %v3845_v11 }
  0xcf   : > { %1494 = vmatmul.mubr.bf16.gmra.mrb[40].mxu1 %v3846_v12  ;;  %1340 = vmatprep.mubr.bf16.mxu0 %v3847_v13 }
  0xd0   : > { %1501 = vmatprep.mubr.bf16.mxu1 %v3849_v14  ;;  %v552_v14 = vld [vmem:[#allocation2 + $0x20] sm:$0xff] }
  0xd6   : > { %1341 = vmatmul.mubr.bf16.gmra.mrb[44].mxu0 %v3851_v15 }
  0xd7   : > { %1502 = vmatmul.mubr.bf16.gmra.mrb[44].mxu1 %v3852_v16  ;;  %1348 = vmatprep.mubr.bf16.mxu0 %v3853_v17 }
  0xd8   : > { %1509 = vmatprep.mubr.bf16.mxu1 %v3855_v18 }
  0xde   : > { %1349 = vmatmul.mubr.bf16.gmra.mrb[48].mxu0 %v3857_v19  ;;  %v553_v19 = vld [vmem:[#allocation2 + $0x28] sm:$0xff] }
  0xdf   : > { %1510 = vmatmul.mubr.bf16.gmra.mrb[48].mxu1 %v3858_v20  ;;  %1356 = vmatprep.mubr.bf16.mxu0 %v3859_v21 }
  0xe0   : > { %1517 = vmatprep.mubr.bf16.mxu1 %v3861_v22 }
  0xe6   : > { %1357 = vmatmul.mubr.bf16.gmra.mrb[52].mxu0 %v3863_v23 }
  0xe7   : > { %1518 = vmatmul.mubr.bf16.gmra.mrb[52].mxu1 %v3864_v24  ;;  %1364 = vmatprep.mubr.bf16.mxu0 %v3865_v25 }
  0xe8   : > { %1525 = vmatprep.mubr.bf16.mxu1 %v3867_v26 }
  0xee   : > { %1365 = vmatmul.mubr.bf16.gmra.mrb[56].mxu0 %v3869_v27 }
  0xef   : > { %1526 = vmatmul.mubr.bf16.gmra.mrb[56].mxu1 %v3870_v28  ;;  %1372 = vmatprep.mubr.bf16.mxu0 %v3871_v29 }
  0xf0   : > { %1533 = vmatprep.mubr.bf16.mxu1 %v3873_v30 }
  0xf6   : > { %1373 = vmatmul.mubr.bf16.gmra.mrb[60].mxu0 %v3875_v31 }
  0xf7   : > { %1534 = vmatmul.mubr.bf16.gmra.mrb[60].mxu1 %v3876_v32  ;;  %v554_v32 = vld [vmem:[#allocation2 + $0x30] sm:$0xff] }
 0x151   : > { %v3131_v33 = vpop.f32.mrb[0].mxu0 }
 0x152   : > { %v3243_v34 = vpop.f32.mrb[0].mxu1  ;;  %v3132_v35 = vpop.f32.mrb[1].mxu0 }
 0x153   : > { %v3133_v36 = vadd.f32 %v3132_v35, %v3131_v33  ;;  %v3244_v37 = vpop.f32.mrb[1].mxu1  ;;  %v3134_v38 = vpop.f32.mrb[2].mxu0 }
 0x154   : > { %v3245_v39 = vadd.f32 %v3244_v37, %v3243_v34  ;;  %v3246_v40 = vpop.f32.mrb[2].mxu1  ;;  %v3135_v41 = vpop.f32.mrb[3].mxu0  ;;  %v555_v37 = vld [vmem:[#allocation2 + $0x38] sm:$0xff] }
 0x155   : > { %v3136_v43 = vadd.f32 %v3135_v41, %v3134_v38  ;;  %v3247_v44 = vpop.f32.mrb[3].mxu1 }
 0x156   : > { %v1416_v45 = vadd.f32 %v3245_v39, %v3133_v36  ;;  %v3248_v46 = vadd.f32 %v3247_v44, %v3246_v40 }
 0x158   : > { %v1542_v48 = vadd.f32 %v1416_v45, %v548_v42  ;;  %v1419_v49 = vadd.f32 %v3248_v46, %v3136_v43 }
 0x159   : > { %v3137_v50 = vpop.f32.mrb[4].mxu0 }
 0x15a   : > { %1574 = vst [vmem:[#allocation2] sm:$0xff] %v1542_v48  ;;  %v1543_v51 = vadd.f32 %v1419_v49, %v549_v47  ;;  %v3249_v52 = vpop.f32.mrb[4].mxu1  ;;  %v3138_v53 = vpop.f32.mrb[5].mxu0 }
 0x15b   : > { %v3139_v54 = vadd.f32 %v3138_v53, %v3137_v50  ;;  %v3250_v55 = vpop.f32.mrb[5].mxu1  ;;  %v3140_v56 = vpop.f32.mrb[6].mxu0  ;;  %v556_v50 = vld [vmem:[#allocation2 + $0x40] sm:$0xff] }
 0x15c   : > { %1575 = vst [vmem:[#allocation2 + $0x8] sm:$0xff] %v1543_v51  ;;  %v3251_v57 = vadd.f32 %v3250_v55, %v3249_v52  ;;  %v3252_v58 = vpop.f32.mrb[6].mxu1  ;;  %v3141_v59 = vpop.f32.mrb[7].mxu0  ;;  %v557_v55 = vld [vmem:[#allocation2 + $0x48] sm:$0xff] }
 0x15d   : > { %v3142_v61 = vadd.f32 %v3141_v59, %v3140_v56  ;;  %v3253_v62 = vpop.f32.mrb[7].mxu1 }
 0x15e   : > { %v1424_v63 = vadd.f32 %v3251_v57, %v3139_v54  ;;  %v3254_v0 = vadd.f32 %v3253_v62, %v3252_v58 }
 0x160   : > { %v1544_v2 = vadd.f32 %v1424_v63, %v550_v60  ;;  %v1427_v3 = vadd.f32 %v3254_v0, %v3142_v61 }
 0x161   : > { %v3143_v4 = vpop.f32.mrb[8].mxu0 }
 0x162   : > { %1576 = vst [vmem:[#allocation2 + $0x10] sm:$0xff] %v1544_v2  ;;  %v1545_v5 = vadd.f32 %v1427_v3, %v551_v1  ;;  %v3255_v6 = vpop.f32.mrb[8].mxu1  ;;  %v3144_v7 = vpop.f32.mrb[9].mxu0 }
 0x163   : > { %v3145_v8 = vadd.f32 %v3144_v7, %v3143_v4  ;;  %v3256_v9 = vpop.f32.mrb[9].mxu1  ;;  %v3146_v10 = vpop.f32.mrb[10].mxu0  ;;  %v558_v4 = vld [vmem:[#allocation2 + $0x50] sm:$0xff] }
 0x164   : > { %1577 = vst [vmem:[#allocation2 + $0x18] sm:$0xff] %v1545_v5  ;;  %v3257_v11 = vadd.f32 %v3256_v9, %v3255_v6  ;;  %v3258_v12 = vpop.f32.mrb[10].mxu1  ;;  %v3147_v13 = vpop.f32.mrb[11].mxu0  ;;  %v559_v9 = vld [vmem:[#allocation2 + $0x58] sm:$0xff] }
 0x165   : > { %v3148_v15 = vadd.f32 %v3147_v13, %v3146_v10  ;;  %v3259_v16 = vpop.f32.mrb[11].mxu1 }
 0x166   : > { %v1432_v17 = vadd.f32 %v3257_v11, %v3145_v8  ;;  %v3260_v18 = vadd.f32 %v3259_v16, %v3258_v12 }
 0x168   : > { %v1546_v20 = vadd.f32 %v1432_v17, %v552_v14  ;;  %v1435_v21 = vadd.f32 %v3260_v18, %v3148_v15 }
 0x169   : > { %v3149_v22 = vpop.f32.mrb[12].mxu0 }
 0x16a   : > { %1578 = vst [vmem:[#allocation2 + $0x20] sm:$0xff] %v1546_v20  ;;  %v1547_v23 = vadd.f32 %v1435_v21, %v553_v19  ;;  %v3261_v24 = vpop.f32.mrb[12].mxu1  ;;  %v3150_v25 = vpop.f32.mrb[13].mxu0 }
 0x16b   : > { %v3151_v26 = vadd.f32 %v3150_v25, %v3149_v22  ;;  %v3262_v27 = vpop.f32.mrb[13].mxu1  ;;  %v3152_v28 = vpop.f32.mrb[14].mxu0  ;;  %v560_v22 = vld [vmem:[#allocation2 + $0x60] sm:$0xff] }
 0x16c   : > { %1579 = vst [vmem:[#allocation2 + $0x28] sm:$0xff] %v1547_v23  ;;  %v3263_v29 = vadd.f32 %v3262_v27, %v3261_v24  ;;  %v3264_v30 = vpop.f32.mrb[14].mxu1  ;;  %v3153_v31 = vpop.f32.mrb[15].mxu0  ;;  %v561_v27 = vld [vmem:[#allocation2 + $0x68] sm:$0xff] }
 0x16d   : > { %v3154_v33 = vadd.f32 %v3153_v31, %v3152_v28  ;;  %v3265_v34 = vpop.f32.mrb[15].mxu1 }
 0x16e   : > { %v1440_v35 = vadd.f32 %v3263_v29, %v3151_v26  ;;  %v3266_v36 = vadd.f32 %v3265_v34, %v3264_v30 }
 0x170   : > { %v1548_v38 = vadd.f32 %v1440_v35, %v554_v32  ;;  %v1443_v39 = vadd.f32 %v3266_v36, %v3154_v33 }
 0x171   : > { %v3155_v40 = vpop.f32.mrb[16].mxu0 }
 0x172   : > { %1580 = vst [vmem:[#allocation2 + $0x30] sm:$0xff] %v1548_v38  ;;  %v1549_v41 = vadd.f32 %v1443_v39, %v555_v37  ;;  %v3267_v42 = vpop.f32.mrb[16].mxu1  ;;  %v3156_v43 = vpop.f32.mrb[17].mxu0 }
 0x173   : > { %v3157_v44 = vadd.f32 %v3156_v43, %v3155_v40  ;;  %v3268_v45 = vpop.f32.mrb[17].mxu1  ;;  %v3158_v46 = vpop.f32.mrb[18].mxu0  ;;  %v562_v40 = vld [vmem:[#allocation2 + $0x70] sm:$0xff] }
 0x174   : > { %1581 = vst [vmem:[#allocation2 + $0x38] sm:$0xff] %v1549_v41  ;;  %v3269_v47 = vadd.f32 %v3268_v45, %v3267_v42  ;;  %v3270_v48 = vpop.f32.mrb[18].mxu1  ;;  %v3159_v49 = vpop.f32.mrb[19].mxu0  ;;  %v563_v45 = vld [vmem:[#allocation2 + $0x78] sm:$0xff] }
 0x175   : > { %v3160_v51 = vadd.f32 %v3159_v49, %v3158_v46  ;;  %v3271_v52 = vpop.f32.mrb[19].mxu1 }
 0x176   : > { %v1448_v53 = vadd.f32 %v3269_v47, %v3157_v44  ;;  %v3272_v54 = vadd.f32 %v3271_v52, %v3270_v48 }
 0x178   : > { %v1550_v56 = vadd.f32 %v1448_v53, %v556_v50  ;;  %v1451_v57 = vadd.f32 %v3272_v54, %v3160_v51 }
 0x179   : > { %v3161_v58 = vpop.f32.mrb[20].mxu0 }
 0x17a   : > { %1582 = vst [vmem:[#allocation2 + $0x40] sm:$0xff] %v1550_v56  ;;  %v1551_v59 = vadd.f32 %v1451_v57, %v557_v55  ;;  %v3273_v60 = vpop.f32.mrb[20].mxu1  ;;  %v3162_v61 = vpop.f32.mrb[21].mxu0 }
 0x17b   : > { %v3163_v62 = vadd.f32 %v3162_v61, %v3161_v58  ;;  %v3274_v63 = vpop.f32.mrb[21].mxu1  ;;  %v3164_v0 = vpop.f32.mrb[22].mxu0  ;;  %v564_v58 = vld [vmem:[#allocation2 + $0x80] sm:$0xff] }
 0x17c   : > { %1583 = vst [vmem:[#allocation2 + $0x48] sm:$0xff] %v1551_v59  ;;  %v3275_v1 = vadd.f32 %v3274_v63, %v3273_v60  ;;  %v3276_v2 = vpop.f32.mrb[22].mxu1  ;;  %v3165_v3 = vpop.f32.mrb[23].mxu0  ;;  %v565_v63 = vld [vmem:[#allocation2 + $0x88] sm:$0xff] }
 0x17d   : > { %v3166_v5 = vadd.f32 %v3165_v3, %v3164_v0  ;;  %v3277_v6 = vpop.f32.mrb[23].mxu1 }
 0x17e   : > { %v1456_v7 = vadd.f32 %v3275_v1, %v3163_v62  ;;  %v3278_v8 = vadd.f32 %v3277_v6, %v3276_v2 }
 0x180   : > { %v1552_v10 = vadd.f32 %v1456_v7, %v558_v4  ;;  %v1459_v11 = vadd.f32 %v3278_v8, %v3166_v5 }
 0x181   : > { %v3167_v12 = vpop.f32.mrb[24].mxu0 }
 0x182   : > { %1584 = vst [vmem:[#allocation2 + $0x50] sm:$0xff] %v1552_v10  ;;  %v1553_v13 = vadd.f32 %v1459_v11, %v559_v9  ;;  %v3279_v14 = vpop.f32.mrb[24].mxu1  ;;  %v3168_v15 = vpop.f32.mrb[25].mxu0 }
 0x183   : > { %v3169_v16 = vadd.f32 %v3168_v15, %v3167_v12  ;;  %v3280_v17 = vpop.f32.mrb[25].mxu1  ;;  %v3170_v18 = vpop.f32.mrb[26].mxu0  ;;  %v566_v12 = vld [vmem:[#allocation2 + $0x90] sm:$0xff] }
 0x184   : > { %1585 = vst [vmem:[#allocation2 + $0x58] sm:$0xff] %v1553_v13  ;;  %v3281_v19 = vadd.f32 %v3280_v17, %v3279_v14  ;;  %v3282_v20 = vpop.f32.mrb[26].mxu1  ;;  %v3171_v21 = vpop.f32.mrb[27].mxu0  ;;  %v567_v17 = vld [vmem:[#allocation2 + $0x98] sm:$0xff] }
 0x185   : > { %v3172_v23 = vadd.f32 %v3171_v21, %v3170_v18  ;;  %v3283_v24 = vpop.f32.mrb[27].mxu1 }
 0x186   : > { %v1464_v25 = vadd.f32 %v3281_v19, %v3169_v16  ;;  %v3284_v26 = vadd.f32 %v3283_v24, %v3282_v20 }
 0x188   : > { %v1554_v28 = vadd.f32 %v1464_v25, %v560_v22  ;;  %v1467_v29 = vadd.f32 %v3284_v26, %v3172_v23 }
 0x189   : > { %v3173_v30 = vpop.f32.mrb[28].mxu0 }
 0x18a   : > { %1586 = vst [vmem:[#allocation2 + $0x60] sm:$0xff] %v1554_v28  ;;  %v1555_v31 = vadd.f32 %v1467_v29, %v561_v27  ;;  %v3285_v32 = vpop.f32.mrb[28].mxu1  ;;  %v3174_v33 = vpop.f32.mrb[29].mxu0 }
 0x18b   : > { %v3175_v34 = vadd.f32 %v3174_v33, %v3173_v30  ;;  %v3286_v35 = vpop.f32.mrb[29].mxu1  ;;  %v3176_v36 = vpop.f32.mrb[30].mxu0  ;;  %v568_v30 = vld [vmem:[#allocation2 + $0xa0] sm:$0xff] }
 0x18c   : > { %1587 = vst [vmem:[#allocation2 + $0x68] sm:$0xff] %v1555_v31  ;;  %v3287_v37 = vadd.f32 %v3286_v35, %v3285_v32  ;;  %v3288_v38 = vpop.f32.mrb[30].mxu1  ;;  %v3177_v39 = vpop.f32.mrb[31].mxu0  ;;  %v569_v35 = vld [vmem:[#allocation2 + $0xa8] sm:$0xff] }
 0x18d   : > { %v3178_v41 = vadd.f32 %v3177_v39, %v3176_v36  ;;  %v3289_v42 = vpop.f32.mrb[31].mxu1 }
 0x18e   : > { %v1472_v43 = vadd.f32 %v3287_v37, %v3175_v34  ;;  %v3290_v44 = vadd.f32 %v3289_v42, %v3288_v38 }
 0x190   : > { %v1556_v46 = vadd.f32 %v1472_v43, %v562_v40  ;;  %v1475_v47 = vadd.f32 %v3290_v44, %v3178_v41 }
 0x191   : > { %v3179_v48 = vpop.f32.mrb[32].mxu0 }
 0x192   : > { %1588 = vst [vmem:[#allocation2 + $0x70] sm:$0xff] %v1556_v46  ;;  %v1557_v49 = vadd.f32 %v1475_v47, %v563_v45  ;;  %v3291_v50 = vpop.f32.mrb[32].mxu1  ;;  %v3180_v51 = vpop.f32.mrb[33].mxu0 }
 0x193   : > { %v3181_v52 = vadd.f32 %v3180_v51, %v3179_v48  ;;  %v3292_v53 = vpop.f32.mrb[33].mxu1  ;;  %v3182_v54 = vpop.f32.mrb[34].mxu0  ;;  %v570_v48 = vld [vmem:[#allocation2 + $0xb0] sm:$0xff] }
 0x194   : > { %1589 = vst [vmem:[#allocation2 + $0x78] sm:$0xff] %v1557_v49  ;;  %v3293_v55 = vadd.f32 %v3292_v53, %v3291_v50  ;;  %v3294_v56 = vpop.f32.mrb[34].mxu1  ;;  %v3183_v57 = vpop.f32.mrb[35].mxu0  ;;  %v571_v53 = vld [vmem:[#allocation2 + $0xb8] sm:$0xff] }
 0x195   : > { %v3184_v59 = vadd.f32 %v3183_v57, %v3182_v54  ;;  %v3295_v60 = vpop.f32.mrb[35].mxu1 }
 0x196   : > { %v1480_v61 = vadd.f32 %v3293_v55, %v3181_v52  ;;  %v3296_v62 = vadd.f32 %v3295_v60, %v3294_v56 }
 0x198   : > { %v1558_v0 = vadd.f32 %v1480_v61, %v564_v58  ;;  %v1483_v1 = vadd.f32 %v3296_v62, %v3184_v59 }
 0x199   : > { %v3185_v2 = vpop.f32.mrb[36].mxu0 }
 0x19a   : > { %1590 = vst [vmem:[#allocation2 + $0x80] sm:$0xff] %v1558_v0  ;;  %v1559_v3 = vadd.f32 %v1483_v1, %v565_v63  ;;  %v3297_v4 = vpop.f32.mrb[36].mxu1  ;;  %v3186_v5 = vpop.f32.mrb[37].mxu0 }
 0x19b   : > { %v3187_v6 = vadd.f32 %v3186_v5, %v3185_v2  ;;  %v3298_v7 = vpop.f32.mrb[37].mxu1  ;;  %v3188_v8 = vpop.f32.mrb[38].mxu0  ;;  %v572_v2 = vld [vmem:[#allocation2 + $0xc0] sm:$0xff] }
 0x19c   : > { %1591 = vst [vmem:[#allocation2 + $0x88] sm:$0xff] %v1559_v3  ;;  %v3299_v9 = vadd.f32 %v3298_v7, %v3297_v4  ;;  %v3300_v10 = vpop.f32.mrb[38].mxu1  ;;  %v3189_v11 = vpop.f32.mrb[39].mxu0  ;;  %v573_v7 = vld [vmem:[#allocation2 + $0xc8] sm:$0xff] }
 0x19d   : > { %v3190_v13 = vadd.f32 %v3189_v11, %v3188_v8  ;;  %v3301_v14 = vpop.f32.mrb[39].mxu1 }
 0x19e   : > { %v1488_v15 = vadd.f32 %v3299_v9, %v3187_v6  ;;  %v3302_v16 = vadd.f32 %v3301_v14, %v3300_v10 }
 0x1a0   : > { %v1560_v18 = vadd.f32 %v1488_v15, %v566_v12  ;;  %v1491_v19 = vadd.f32 %v3302_v16, %v3190_v13 }
 0x1a1   : > { %v3191_v20 = vpop.f32.mrb[40].mxu0 }
 0x1a2   : > { %1592 = vst [vmem:[#allocation2 + $0x90] sm:$0xff] %v1560_v18  ;;  %v1561_v21 = vadd.f32 %v1491_v19, %v567_v17  ;;  %v3303_v22 = vpop.f32.mrb[40].mxu1  ;;  %v3192_v23 = vpop.f32.mrb[41].mxu0 }
 0x1a3   : > { %v3193_v24 = vadd.f32 %v3192_v23, %v3191_v20  ;;  %v3304_v25 = vpop.f32.mrb[41].mxu1  ;;  %v3194_v26 = vpop.f32.mrb[42].mxu0  ;;  %v574_v20 = vld [vmem:[#allocation2 + $0xd0] sm:$0xff] }
 0x1a4   : > { %1593 = vst [vmem:[#allocation2 + $0x98] sm:$0xff] %v1561_v21  ;;  %v3305_v27 = vadd.f32 %v3304_v25, %v3303_v22  ;;  %v3306_v28 = vpop.f32.mrb[42].mxu1  ;;  %v3195_v29 = vpop.f32.mrb[43].mxu0  ;;  %v575_v25 = vld [vmem:[#allocation2 + $0xd8] sm:$0xff] }
 0x1a5   : > { %v3196_v31 = vadd.f32 %v3195_v29, %v3194_v26  ;;  %v3307_v32 = vpop.f32.mrb[43].mxu1 }
 0x1a6   : > { %v1496_v33 = vadd.f32 %v3305_v27, %v3193_v24  ;;  %v3308_v34 = vadd.f32 %v3307_v32, %v3306_v28 }
 0x1a8   : > { %v1562_v36 = vadd.f32 %v1496_v33, %v568_v30  ;;  %v1499_v37 = vadd.f32 %v3308_v34, %v3196_v31 }
 0x1a9   : > { %v3197_v38 = vpop.f32.mrb[44].mxu0 }
 0x1aa   : > { %1594 = vst [vmem:[#allocation2 + $0xa0] sm:$0xff] %v1562_v36  ;;  %v1563_v39 = vadd.f32 %v1499_v37, %v569_v35  ;;  %v3309_v40 = vpop.f32.mrb[44].mxu1  ;;  %v3198_v41 = vpop.f32.mrb[45].mxu0 }
 0x1ab   : > { %v3199_v42 = vadd.f32 %v3198_v41, %v3197_v38  ;;  %v3310_v43 = vpop.f32.mrb[45].mxu1  ;;  %v3200_v44 = vpop.f32.mrb[46].mxu0  ;;  %v576_v38 = vld [vmem:[#allocation2 + $0xe0] sm:$0xff] }
 0x1ac   : > { %1595 = vst [vmem:[#allocation2 + $0xa8] sm:$0xff] %v1563_v39  ;;  %v3311_v45 = vadd.f32 %v3310_v43, %v3309_v40  ;;  %v3312_v46 = vpop.f32.mrb[46].mxu1  ;;  %v3201_v47 = vpop.f32.mrb[47].mxu0  ;;  %v577_v43 = vld [vmem:[#allocation2 + $0xe8] sm:$0xff] }
 0x1ad   : > { %v3202_v49 = vadd.f32 %v3201_v47, %v3200_v44  ;;  %v3313_v50 = vpop.f32.mrb[47].mxu1 }
 0x1ae   : > { %v1504_v51 = vadd.f32 %v3311_v45, %v3199_v42  ;;  %v3314_v52 = vadd.f32 %v3313_v50, %v3312_v46 }
 0x1b0   : > { %v1564_v54 = vadd.f32 %v1504_v51, %v570_v48  ;;  %v1507_v55 = vadd.f32 %v3314_v52, %v3202_v49 }
 0x1b1   : > { %v3203_v56 = vpop.f32.mrb[48].mxu0 }
 0x1b2   : > { %1596 = vst [vmem:[#allocation2 + $0xb0] sm:$0xff] %v1564_v54  ;;  %v1565_v57 = vadd.f32 %v1507_v55, %v571_v53  ;;  %v3315_v58 = vpop.f32.mrb[48].mxu1  ;;  %v3204_v59 = vpop.f32.mrb[49].mxu0 }
 0x1b3   : > { %v3205_v60 = vadd.f32 %v3204_v59, %v3203_v56  ;;  %v3316_v61 = vpop.f32.mrb[49].mxu1  ;;  %v3206_v62 = vpop.f32.mrb[50].mxu0  ;;  %v578_v56 = vld [vmem:[#allocation2 + $0xf0] sm:$0xff] }
 0x1b4   : > { %1597 = vst [vmem:[#allocation2 + $0xb8] sm:$0xff] %v1565_v57  ;;  %v3317_v63 = vadd.f32 %v3316_v61, %v3315_v58  ;;  %v3318_v0 = vpop.f32.mrb[50].mxu1  ;;  %v3207_v1 = vpop.f32.mrb[51].mxu0  ;;  %v579_v61 = vld [vmem:[#allocation2 + $0xf8] sm:$0xff] }
 0x1b5   : > { %v3208_v3 = vadd.f32 %v3207_v1, %v3206_v62  ;;  %v3319_v4 = vpop.f32.mrb[51].mxu1  ;;  %v1644_v1 = vld [vmem:[%s4187_s27 + $0x10] sm:$0xff] (!%p2872_p13) }
 0x1b6   : > { %v1512_v5 = vadd.f32 %v3317_v63, %v3205_v60  ;;  %v3320_v6 = vadd.f32 %v3319_v4, %v3318_v0  ;;  %v1645_v4 = vld [vmem:[%s4187_s27 + $0x18] sm:$0xff] (!%p2872_p13) }
 0x1b8   : > { %v1566_v8 = vadd.f32 %v1512_v5, %v572_v2  ;;  %v1515_v9 = vadd.f32 %v3320_v6, %v3208_v3  ;;  %v1642_v2 = vld [vmem:[%s4187_s27] sm:$0xff] (!%p2872_p13)  ;;  %v3936_v3 = vmov (!%p2872_p13), 0   ;;  %v1643_v5 = vld [vmem:[%s4187_s27 + $0x8] sm:$0xff] (!%p2872_p13) }
 0x1b9   : > { %v3209_v10 = vpop.f32.mrb[52].mxu0  ;;  %3878 = vset.pattern.permute.xlu1 (!%p2872_p13), %v3936_v3  ;;  %3877 = vset.pattern.permute.xlu0 (!%p2872_p13), %v3936_v3  ;;  %v1647_v6 = vld [vmem:[%s4187_s27 + $0x28] sm:$0xff] (!%p2872_p13)  ;;  %v1881_v3 = vld [vmem:[%s4589_s4 + $0x78] sm:$0xff] (!%p2872_p13) }
 0x1ba   : > { %1598 = vst [vmem:[#allocation2 + $0xc0] sm:$0xff] %v1566_v8  ;;  %v1567_v11 = vadd.f32 %v1515_v9, %v573_v7  ;;  %v3321_v12 = vpop.f32.mrb[52].mxu1  ;;  %v3210_v13 = vpop.f32.mrb[53].mxu0  ;;  %1686 = vperm.xlu1 (!%p2872_p13), %3878, %v1644_v1   ;;  %1676 = vperm.xlu0 (!%p2872_p13), %3877, %v1642_v2   ;;  %v1646_v7 = vld [vmem:[%s4187_s27 + $0x20] sm:$0xff] (!%p2872_p13)  ;;  %v1649_v8 = vld [vmem:[%s4187_s27 + $0x38] sm:$0xff] (!%p2872_p13)  ;;  %v1648_v9 = vld [vmem:[%s4187_s27 + $0x30] sm:$0xff] (!%p2872_p13) }
 0x1bb   : > { %v3211_v14 = vadd.f32 %v3210_v13, %v3209_v10  ;;  %v3322_v15 = vpop.f32.mrb[53].mxu1  ;;  %v3212_v16 = vpop.f32.mrb[54].mxu0  ;;  %v1946_v10 = vld [vmem:[%s4590_s5] sm:$0xff] (!%p2872_p13)  ;;  %v1867_v13 = vld [vmem:[%s4589_s4 + $0x8] sm:$0xff] (!%p2872_p13)  ;;  %v1961_v1 = vld [vmem:[%s4590_s5 + $0x78] sm:$0xff] (!%p2872_p13) }
 0x1bc   : > { %1599 = vst [vmem:[#allocation2 + $0xc8] sm:$0xff] %v1567_v11  ;;  %v3323_v17 = vadd.f32 %v3322_v15, %v3321_v12  ;;  %v3324_v18 = vpop.f32.mrb[54].mxu1  ;;  %v3213_v19 = vpop.f32.mrb[55].mxu0  ;;  %v1947_v11 = vld [vmem:[%s4590_s5 + $0x8] sm:$0xff] (!%p2872_p13)  ;;  %v1866_v12 = vld [vmem:[%s4589_s4] sm:$0xff] (!%p2872_p13)  ;;  %v1880_v2 = vld [vmem:[%s4589_s4 + $0x70] sm:$0xff] (!%p2872_p13) }
 0x1bd   : > { %v3214_v21 = vadd.f32 %v3213_v19, %v3212_v16  ;;  %v3325_v22 = vpop.f32.mrb[55].mxu1  ;;  %v3627_v15 = vpack.c.bf16 (!%p2872_p13), %v1867_v13, %v1866_v12  ;;  %v1948_v16 = vld [vmem:[%s4590_s5 + $0x10] sm:$0xff] (!%p2872_p13) }
 0x1be   : > { %v1520_v23 = vadd.f32 %v3323_v17, %v3211_v14  ;;  %v3326_v24 = vadd.f32 %v3325_v22, %v3324_v18  ;;  %1691 = vperm.xlu1 (!%p2872_p13), %3878, %v1645_v4   ;;  %1681 = vperm.xlu0 (!%p2872_p13), %3877, %v1643_v5   ;;  %v3595_v14 = vpack.c.bf16 (!%p2872_p13), %v1947_v11, %v1946_v10  ;;  %v1949_v17 = vld [vmem:[%s4590_s5 + $0x18] sm:$0xff] (!%p2872_p13)  ;;  %v1868_v18 = vld [vmem:[%s4589_s4 + $0x10] sm:$0xff] (!%p2872_p13)  ;;  %v3085_v10 = vld [vmem:[%s4182_s10 + $0x8] sm:$0xff] (!%p2872_p13)  }
 0x1bf   : > { %v3599_v19 = vpack.c.bf16 (!%p2872_p13), %v1949_v17, %v1948_v16  ;;  %3628 = vmatprep.subr.bf16.mxu0 (!%p2872_p13), %v3627_v15  ;;  %v1661_v4 = vld [vmem:[%s4187_s27 + $0x98] sm:$0xff] (!%p2872_p13)  ;;  %v1660_v5 = vld [vmem:[%s4187_s27 + $0x90] sm:$0xff] (!%p2872_p13)  ;;  %v1667_v16 = vld [vmem:[%s4187_s27 + $0xc8] sm:$0xff] (!%p2872_p13) }
 0x1c0   : > { %v1568_v26 = vadd.f32 %v1520_v23, %v574_v20  ;;  %v1523_v27 = vadd.f32 %v3326_v24, %v3214_v21  ;;  %v1869_v20 = vld [vmem:[%s4589_s4 + $0x18] sm:$0xff] (!%p2872_p13)  ;;  %v1950_v21 = vld [vmem:[%s4590_s5 + $0x20] sm:$0xff] (!%p2872_p13)  ;;  %v1951_v23 = vld [vmem:[%s4590_s5 + $0x28] sm:$0xff] (!%p2872_p13)  ;;  %3596 = vmatprep.subr.bf16.mxu1 (!%p2872_p13), %v3595_v14  ;;  %3630 = vmatpush3.bf16.msra.mxu0 (!%p2872_p13), %v3627_v15 }
 0x1c1   : > { %v3215_v28 = vpop.f32.mrb[56].mxu0  ;;  %v3631_v22 = vpack.c.bf16 (!%p2872_p13), %v1869_v20, %v1868_v18  ;;  %v1870_v24 = vld [vmem:[%s4589_s4 + $0x20] sm:$0xff] (!%p2872_p13)  ;;  %3598 = vmatpush3.bf16.msra.mxu1 (!%p2872_p13), %v3595_v14  ;;  %v1665_v11 = vld [vmem:[%s4187_s27 + $0xb8] sm:$0xff] (!%p2872_p13)  ;;  %v1664_v12 = vld [vmem:[%s4187_s27 + $0xb0] sm:$0xff] (!%p2872_p13)  ;;  %v2947_v14 = vunpack.c.l.bf16 (!%p2872_p13), %v3085_v10  ;;  %v2948_v18 = vunpack.c.h.bf16 (!%p2872_p13), %v3085_v10 }
 0x1c2   : > { %1600 = vst [vmem:[#allocation2 + $0xd0] sm:$0xff] %v1568_v26  ;;  %v1569_v29 = vadd.f32 %v1523_v27, %v575_v25  ;;  %v3327_v30 = vpop.f32.mrb[56].mxu1  ;;  %v3216_v31 = vpop.f32.mrb[57].mxu0  ;;  %1701 = vperm.xlu1 (!%p2872_p13), %3878, %v1647_v6   ;;  %1696 = vperm.xlu0 (!%p2872_p13), %3877, %v1646_v7   ;;  %v1871_v25 = vld [vmem:[%s4589_s4 + $0x28] sm:$0xff] (!%p2872_p13)  ;;  %v1650_v27 = vld [vmem:[%s4187_s27 + $0x40] sm:$0xff] (!%p2872_p13)  ;;  %v3655_v7 = vpack.c.bf16 (!%p2872_p13), %v1881_v3, %v1880_v2  ;;  %v3086_v15 = vld [vmem:[%s4182_s10 + $0x10] sm:$0xff] (!%p2872_p13)  }
 0x1c3   : > { %v3217_v32 = vadd.f32 %v3216_v31, %v3215_v28  ;;  %v3328_v33 = vpop.f32.mrb[57].mxu1  ;;  %v3218_v34 = vpop.f32.mrb[58].mxu0  ;;  %v1651_v26 = vld [vmem:[%s4187_s27 + $0x48] sm:$0xff] (!%p2872_p13)  ;;  %3600 = vmatprep.subr.bf16.mxu1 (!%p2872_p13), %v3599_v19  ;;  %3632 = vmatprep.subr.bf16.mxu0 (!%p2872_p13), %v3631_v22  ;;  %v3603_v28 = vpack.c.bf16 (!%p2872_p13), %v1951_v23, %v1950_v21  ;;  %v1953_v31 = vld [vmem:[%s4590_s5 + $0x38] sm:$0xff] (!%p2872_p13)  ;;  %v1666_v17 = vld [vmem:[%s4187_s27 + $0xc0] sm:$0xff] (!%p2872_p13)  ;;  %v2952_v23 = vunpack.c.h.bf16 (!%p2872_p13), %v3086_v15 }
 0x1c4   : > { %1601 = vst [vmem:[#allocation2 + $0xd8] sm:$0xff] %v1569_v29  ;;  %v3329_v35 = vadd.f32 %v3328_v33, %v3327_v30  ;;  %v3330_v36 = vpop.f32.mrb[58].mxu1  ;;  %v3219_v37 = vpop.f32.mrb[59].mxu0  ;;  %v3635_v29 = vpack.c.bf16 (!%p2872_p13), %v1871_v25, %v1870_v24  ;;  %v1952_v30 = vld [vmem:[%s4590_s5 + $0x30] sm:$0xff] (!%p2872_p13)  ;;  %v1873_v33 = vld [vmem:[%s4589_s4 + $0x38] sm:$0xff] (!%p2872_p13)  ;;  %3634 = vmatpush3.bf16.msra.mxu0 (!%p2872_p13), %v3631_v22  ;;  %v3088_v25 = vld [vmem:[%s4182_s10 + $0x20] sm:$0xff] (!%p2872_p13)  }
 0x1c5   : > { %v3220_v39 = vadd.f32 %v3219_v37, %v3218_v34  ;;  %v3331_v40 = vpop.f32.mrb[59].mxu1  ;;  %v1653_v34 = vld [vmem:[%s4187_s27 + $0x58] sm:$0xff] (!%p2872_p13)  ;;  %3602 = vmatpush3.bf16.msra.mxu1 (!%p2872_p13), %v3599_v19  ;;  %v2951_v19 = vunpack.c.l.bf16 (!%p2872_p13), %v3086_v15  ;;  %v1668_v22 = vld [vmem:[%s4187_s27 + $0xd0] sm:$0xff] (!%p2872_p13)  ;;  %v1610_v2 = vld [vmem:[#allocation2] sm:$0xff] (!%p2872_p13) }
 0x1c6   : > { %v1528_v41 = vadd.f32 %v3329_v35, %v3217_v32  ;;  %v3332_v42 = vadd.f32 %v3331_v40, %v3330_v36  ;;  %1711 = vperm.xlu1 (!%p2872_p13), %3878, %v1649_v8   ;;  %1706 = vperm.xlu0 (!%p2872_p13), %3877, %v1648_v9   ;;  %v1872_v32 = vld [vmem:[%s4589_s4 + $0x30] sm:$0xff] (!%p2872_p13)  ;;  %v3607_v36 = vpack.c.bf16 (!%p2872_p13), %v1953_v31, %v1952_v30  ;;  %v1874_v40 = vld [vmem:[%s4589_s4 + $0x40] sm:$0xff] (!%p2872_p13)  ;;  %v1663_v8 = vld [vmem:[%s4187_s27 + $0xa8] sm:$0xff] (!%p2872_p13) }
 0x1c7   : > { %v1652_v35 = vld [vmem:[%s4187_s27 + $0x50] sm:$0xff] (!%p2872_p13)  ;;  %3604 = vmatprep.subr.bf16.mxu1 (!%p2872_p13), %v3603_v28  ;;  %3636 = vmatprep.subr.bf16.mxu0 (!%p2872_p13), %v3635_v29  ;;  %v3639_v37 = vpack.c.bf16 (!%p2872_p13), %v1873_v33, %v1872_v32  ;;  %v1662_v9 = vld [vmem:[%s4187_s27 + $0xa0] sm:$0xff] (!%p2872_p13)  ;;  %v3087_v20 = vld [vmem:[%s4182_s10 + $0x18] sm:$0xff] (!%p2872_p13)   ;;  %v2960_v33 = vunpack.c.h.bf16 (!%p2872_p13), %v3088_v25 }
 0x1c8   : > { %v1570_v44 = vadd.f32 %v1528_v41, %v576_v38  ;;  %v1531_v45 = vadd.f32 %v3332_v42, %v3220_v39  ;;  %v1954_v38 = vld [vmem:[%s4590_s5 + $0x40] sm:$0xff] (!%p2872_p13)  ;;  %v1955_v39 = vld [vmem:[%s4590_s5 + $0x48] sm:$0xff] (!%p2872_p13)  ;;  %3638 = vmatpush3.bf16.msra.mxu0 (!%p2872_p13), %v3635_v29  ;;  %v1669_v21 = vld [vmem:[%s4187_s27 + $0xd8] sm:$0xff] (!%p2872_p13)  ;;  %v2955_v24 = vunpack.c.l.bf16 (!%p2872_p13), %v3087_v20  ;;  %v2959_v29 = vunpack.c.l.bf16 (!%p2872_p13), %v3088_v25 }
 0x1c9   : > { %v3221_v46 = vpop.f32.mrb[60].mxu0  ;;  %v1875_v41 = vld [vmem:[%s4589_s4 + $0x48] sm:$0xff] (!%p2872_p13)  ;;  %v4367_v42 = vld [vmem:[%s4182_s10] sm:$0xff] (!%p2872_p13)   ;;  %3606 = vmatpush3.bf16.msra.mxu1 (!%p2872_p13), %v3603_v28  ;;  %3640 = vmatprep.subr.bf16.mxu0 (!%p2872_p13), %v3639_v37  ;;  %v2956_v28 = vunpack.c.h.bf16 (!%p2872_p13), %v3087_v20  ;;  %v1673_v31 = vld [vmem:[%s4187_s27 + $0xf8] sm:$0xff] (!%p2872_p13) }
 0x1ca   : > { %1602 = vst [vmem:[#allocation2 + $0xe0] sm:$0xff] %v1570_v44  ;;  %v1571_v47 = vadd.f32 %v1531_v45, %v577_v43  ;;  %v3333_v48 = vpop.f32.mrb[60].mxu1  ;;  %v3222_v49 = vpop.f32.mrb[61].mxu0  ;;  %1721 = vperm.xlu1 (!%p2872_p13), %3878, %v1651_v26   ;;  %1716 = vperm.xlu0 (!%p2872_p13), %3877, %v1650_v27   ;;  %v1655_v43 = vld [vmem:[%s4187_s27 + $0x68] sm:$0xff] (!%p2872_p13)  ;;  %v1654_v44 = vld [vmem:[%s4187_s27 + $0x60] sm:$0xff] (!%p2872_p13)  ;;  %v2943_v45 = vunpack.c.l.bf16 (!%p2872_p13), %v4367_v42  ;;  %v2944_v13 = vunpack.c.h.bf16 (!%p2872_p13), %v4367_v42  ;;  %v1672_v32 = vld [vmem:[%s4187_s27 + $0xf0] sm:$0xff] (!%p2872_p13) }
 0x1cb   : > { %v3223_v50 = vadd.f32 %v3222_v49, %v3221_v46  ;;  %v3334_v51 = vpop.f32.mrb[61].mxu1  ;;  %v3224_v52 = vpop.f32.mrb[62].mxu0  ;;  %3608 = vmatprep.subr.bf16.mxu1 (!%p2872_p13), %v3607_v36  ;;  %v3611_v46 = vpack.c.bf16 (!%p2872_p13), %v1955_v39, %v1954_v38  ;;  %v1957_v49 = vld [vmem:[%s4590_s5 + $0x58] sm:$0xff] (!%p2872_p13)  ;;  %v1671_v26 = vld [vmem:[%s4187_s27 + $0xe8] sm:$0xff] (!%p2872_p13)  ;;  %v1670_v27 = vld [vmem:[%s4187_s27 + $0xe0] sm:$0xff] (!%p2872_p13) }
 0x1cc   : > { %1603 = vst [vmem:[#allocation2 + $0xe8] sm:$0xff] %v1571_v47  ;;  %v3335_v53 = vadd.f32 %v3334_v51, %v3333_v48  ;;  %v3336_v54 = vpop.f32.mrb[62].mxu1  ;;  %v3225_v55 = vpop.f32.mrb[63].mxu0  ;;  %v3643_v47 = vpack.c.bf16 (!%p2872_p13), %v1875_v41, %v1874_v40  ;;  %v1956_v48 = vld [vmem:[%s4590_s5 + $0x50] sm:$0xff] (!%p2872_p13)  ;;  %v1877_v51 = vld [vmem:[%s4589_s4 + $0x58] sm:$0xff] (!%p2872_p13)  ;;  %3467 = vmatprep.mubr.f32.mxu1 (!%p2872_p13), %v2943_v45  ;;  %3642 = vmatpush3.bf16.msra.mxu0 (!%p2872_p13), %v3639_v37  ;;  %v3089_v30 = vld [vmem:[%s4182_s10 + $0x28] sm:$0xff] (!%p2872_p13)  }
 0x1cd   : > { %v3226_v57 = vadd.f32 %v3225_v55, %v3224_v52  ;;  %v3337_v58 = vpop.f32.mrb[63].mxu1  ;;  %v1657_v52 = vld [vmem:[%s4187_s27 + $0x78] sm:$0xff] (!%p2872_p13)  ;;  %3610 = vmatpush3.bf16.msra.mxu1 (!%p2872_p13), %v3607_v36  ;;  %v2964_v36 = vunpack.c.h.bf16 (!%p2872_p13), %v3089_v30  ;;  %v3092_v41 = vld [vmem:[%s4182_s10 + $0x40] sm:$0xff] (!%p2872_p13)  }
 0x1ce   : > { %v1536_v59 = vadd.f32 %v3335_v53, %v3223_v50  ;;  %v3338_v60 = vadd.f32 %v3337_v58, %v3336_v54  ;;  %1609 = sbr.rel (%p2872_p13) target bundleno = 858 (0x35a), region = 79  ;;  %1731 = vperm.xlu1 (!%p2872_p13), %3878, %v1653_v34   ;;  %1726 = vperm.xlu0 (!%p2872_p13), %3877, %v1652_v35   ;;  %v1876_v50 = vld [vmem:[%s4589_s4 + $0x50] sm:$0xff] (!%p2872_p13)  ;;  %v3615_v54 = vpack.c.bf16 (!%p2872_p13), %v1957_v49, %v1956_v48  ;;  %v1878_v58 = vld [vmem:[%s4589_s4 + $0x60] sm:$0xff] (!%p2872_p13)  ;;  %v2963_v34 = vunpack.c.l.bf16 (!%p2872_p13), %v3089_v30  ;;  %v3091_v38 = vld [vmem:[%s4182_s10 + $0x38] sm:$0xff] (!%p2872_p13)  }
 0x1cf   : > { %v1656_v53 = vld [vmem:[%s4187_s27 + $0x70] sm:$0xff] (!%p2872_p13)  ;;  %3612 = vmatprep.subr.bf16.mxu1 (!%p2872_p13), %v3611_v46  ;;  %3644 = vmatprep.subr.bf16.mxu0 (!%p2872_p13), %v3643_v47  ;;  %v3647_v55 = vpack.c.bf16 (!%p2872_p13), %v1877_v51, %v1876_v50  ;;  %v2971_v40 = vunpack.c.l.bf16 (!%p2872_p13), %v3091_v38  ;;  %v2972_v42 = vunpack.c.h.bf16 (!%p2872_p13), %v3091_v38  ;;  %v2976_v45 = vunpack.c.h.bf16 (!%p2872_p13), %v3092_v41  ;;  %v3095_v50 = vld [vmem:[%s4182_s10 + $0x58] sm:$0xff] (!%p2872_p13)   ;;  %v1618_v25 = vld [vmem:[#allocation2 + $0x40] sm:$0xff] (!%p2872_p13) }
 0x1d0   : > { %v1572_v62 = vadd.f32 %v1536_v59, %v578_v56  ;;  %v1539_v63 = vadd.f32 %v3338_v60, %v3226_v57  ;;  %v1958_v56 = vld [vmem:[%s4590_s5 + $0x60] sm:$0xff] (!%p2872_p13)  ;;  %v1959_v57 = vld [vmem:[%s4590_s5 + $0x68] sm:$0xff] (!%p2872_p13)  ;;  %3646 = vmatpush3.bf16.msra.mxu0 (!%p2872_p13), %v3643_v47  ;;  %v3090_v35 = vld [vmem:[%s4182_s10 + $0x30] sm:$0xff] (!%p2872_p13)  }
 0x1d1   : > { %v1879_v59 = vld [vmem:[%s4589_s4 + $0x68] sm:$0xff] (!%p2872_p13)  ;;  %3614 = vmatpush3.bf16.msra.mxu1 (!%p2872_p13), %v3611_v46  ;;  %3648 = vmatprep.subr.bf16.mxu0 (!%p2872_p13), %v3647_v55  ;;  %v2967_v37 = vunpack.c.l.bf16 (!%p2872_p13), %v3090_v35  ;;  %v2968_v39 = vunpack.c.h.bf16 (!%p2872_p13), %v3090_v35  ;;  %v3094_v47 = vld [vmem:[%s4182_s10 + $0x50] sm:$0xff] (!%p2872_p13)  }
 0x1d2   : > { %1604 = vst [vmem:[#allocation2 + $0xf0] sm:$0xff] %v1572_v62  ;;  %v1573_v0 = vadd.f32 %v1539_v63, %v579_v61  ;;  %1741 = vperm.xlu1 (!%p2872_p13), %3878, %v1655_v43   ;;  %1736 = vperm.xlu0 (!%p2872_p13), %3877, %v1654_v44   ;;  %v1659_v60 = vld [vmem:[%s4187_s27 + $0x88] sm:$0xff] (!%p2872_p13)  ;;  %v1658_v61 = vld [vmem:[%s4187_s27 + $0x80] sm:$0xff] (!%p2872_p13)  ;;  %v3619_v62 = vpack.c.bf16 (!%p2872_p13), %v1959_v57, %v1958_v56  ;;  %v2975_v43 = vunpack.c.l.bf16 (!%p2872_p13), %v3092_v41  ;;  %v2983_v49 = vunpack.c.l.bf16 (!%p2872_p13), %v3094_v47 }
 0x1d3   : > { %3616 = vmatprep.subr.bf16.mxu1 (!%p2872_p13), %v3615_v54  ;;  %v3651_v63 = vpack.c.bf16 (!%p2872_p13), %v1879_v59, %v1878_v58  ;;  %v3093_v44 = vld [vmem:[%s4182_s10 + $0x48] sm:$0xff] (!%p2872_p13)   ;;  %v2984_v51 = vunpack.c.h.bf16 (!%p2872_p13), %v3094_v47  ;;  %v3098_v59 = vld [vmem:[%s4182_s10 + $0x70] sm:$0xff] (!%p2872_p13)  }
 0x1d4   : > { %1605 = vst [vmem:[#allocation2 + $0xf8] sm:$0xff] %v1573_v0  ;;  %v1960_v0 = vld [vmem:[%s4590_s5 + $0x70] sm:$0xff] (!%p2872_p13)  ;;  %3650 = vmatpush3.bf16.msra.mxu0 (!%p2872_p13), %v3647_v55  ;;  %v2979_v46 = vunpack.c.l.bf16 (!%p2872_p13), %v3093_v44  ;;  %v2980_v48 = vunpack.c.h.bf16 (!%p2872_p13), %v3093_v44  ;;  %v3097_v56 = vld [vmem:[%s4182_s10 + $0x68] sm:$0xff] (!%p2872_p13)  }
 0x1d5   : > { %3618 = vmatpush3.bf16.msra.mxu1 %v3615_v54  ;;  %3652 = vmatprep.subr.bf16.mxu0 %v3651_v63  ;;  %v3623_v6 = vpack.c.bf16 %v1961_v1, %v1960_v0  ;;  %v2988_v54 = vunpack.c.h.bf16 %v3095_v50  ;;  %v2995_v58 = vunpack.c.l.bf16 %v3097_v56  ;;  %v1619_v30 = vld [vmem:[#allocation2 + $0x48] sm:$0xff] }
 0x1d6   : > { %1751 = vperm.xlu1 %3878, %v1657_v52   ;;  %1746 = vperm.xlu0 %3877, %v1656_v53   ;;  %v2987_v52 = vunpack.c.l.bf16 %v3095_v50  ;;  %v3096_v53 = vld [vmem:[%s4182_s10 + $0x60] sm:$0xff]  }
 0x1d7   : > { %3620 = vmatprep.subr.bf16.mxu1 %v3619_v62  ;;  %v2991_v55 = vunpack.c.l.bf16 %v3096_v53  ;;  %v2992_v57 = vunpack.c.h.bf16 %v3096_v53 }
 0x1d8   : > { %3654 = vmatpush3.bf16.msra.mxu0 %v3651_v63  ;;  %v3000_v63 = vunpack.c.h.bf16 %v3098_v59 }
 0x1d9   : > { %3622 = vmatpush3.bf16.msra.mxu1 %v3619_v62  ;;  %3656 = vmatprep.subr.bf16.mxu0 %v3655_v7  ;;  %v3099_v62 = vld [vmem:[%s4182_s10 + $0x78] sm:$0xff]  }
 0x1da   : > { %1761 = vperm.xlu1 %3878, %v1659_v60   ;;  %1756 = vperm.xlu0 %3877, %v1658_v61   ;;  %v2996_v60 = vunpack.c.h.bf16 %v3097_v56  ;;  %v2999_v61 = vunpack.c.l.bf16 %v3098_v59  ;;  %v3003_v0 = vunpack.c.l.bf16 %v3099_v62  ;;  %v3004_v1 = vunpack.c.h.bf16 %v3099_v62 }
 0x1db   : > { %3624 = vmatprep.subr.bf16.mxu1 %v3623_v6 }
 0x1dc   : > { %3658 = vmatpush3.bf16.msra.mxu0 %v3655_v7  ;;  %v1611_v7 = vld [vmem:[#allocation2 + $0x8] sm:$0xff] }
 0x1dd   : > { %3626 = vmatpush3.bf16.msra.mxu1 %v3623_v6 }
 0x1de   : > { %1771 = vperm.xlu1 %3878, %v1661_v4   ;;  %1766 = vperm.xlu0 %3877, %v1660_v5   ;;  %v1612_v5 = vld [vmem:[#allocation2 + $0x10] sm:$0xff] }
 0x1e0   : > { %3468 = vmatmul.mubr.f32.vlgmr.msra.gmra.mrb[0].mxu1 %v2944_v13  ;;  %v1614_v13 = vld [vmem:[#allocation2 + $0x20] sm:$0xff] }
 0x1e1   : > { %3470 = vmatprep.mubr.f32.mxu1 %v2947_v14 }
 0x1e2   : > { %1781 = vperm.xlu1 %3878, %v1663_v8   ;;  %1776 = vperm.xlu0 %3877, %v1662_v9  }
 0x1e4   : > { %3471 = vmatmul.mubr.f32.gmra.mrb[2].mxu1 %v2948_v18  ;;  %v1615_v18 = vld [vmem:[#allocation2 + $0x28] sm:$0xff] }
 0x1e5   : > { %3473 = vmatprep.mubr.f32.mxu1 %v2951_v19  ;;  %v1616_v19 = vld [vmem:[#allocation2 + $0x30] sm:$0xff] }
 0x1e6   : > { %1791 = vperm.xlu1 %3878, %v1665_v11   ;;  %1786 = vperm.xlu0 %3877, %v1664_v12   ;;  %v1613_v12 = vld [vmem:[#allocation2 + $0x18] sm:$0xff] }
 0x1e8   : > { %3474 = vmatmul.mubr.f32.gmra.mrb[4].mxu1 %v2952_v23 }
 0x1e9   : > { %3476 = vmatprep.mubr.f32.mxu1 %v2955_v24  ;;  %v1617_v24 = vld [vmem:[#allocation2 + $0x38] sm:$0xff] }
 0x1ea   : > { %1801 = vperm.xlu1 %3878, %v1667_v16   ;;  %1796 = vperm.xlu0 %3877, %v1666_v17  }
 0x1ec   : > { %3477 = vmatmul.mubr.f32.gmra.mrb[6].mxu1 %v2956_v28 }
 0x1ed   : > { %3479 = vmatprep.mubr.f32.mxu1 %v2959_v29 }
 0x1ee   : > { %1811 = vperm.xlu1 %3878, %v1669_v21   ;;  %1806 = vperm.xlu0 %3877, %v1668_v22  }
 0x1f0   : > { %3480 = vmatmul.mubr.f32.gmra.mrb[8].mxu1 %v2960_v33 }
 0x1f1   : > { %3482 = vmatprep.mubr.f32.mxu1 %v2963_v34 }
 0x1f2   : > { %1821 = vperm.xlu1 %3878, %v1671_v26   ;;  %1816 = vperm.xlu0 %3877, %v1670_v27  }
 0x1f4   : > { %3483 = vmatmul.mubr.f32.gmra.mrb[10].mxu1 %v2964_v36  ;;  %v1621_v36 = vld [vmem:[#allocation2 + $0x58] sm:$0xff] }
 0x1f5   : > { %3485 = vmatprep.mubr.f32.mxu1 %v2967_v37  ;;  %v1622_v37 = vld [vmem:[#allocation2 + $0x60] sm:$0xff] }
 0x1f6   : > { %1831 = vperm.xlu1 %3878, %v1673_v31   ;;  %1826 = vperm.xlu0 %3877, %v1672_v32   ;;  %v1620_v31 = vld [vmem:[#allocation2 + $0x50] sm:$0xff] }
 0x1f8   : > { %3486 = vmatmul.mubr.f32.gmra.mrb[12].mxu1 %v2968_v39 }
 0x1f9   : > { %3488 = vmatprep.mubr.f32.mxu1 %v2971_v40 }
 0x1fc   : > { %3489 = vmatmul.mubr.f32.gmra.mrb[14].mxu1 %v2972_v42  ;;  %v1623_v42 = vld [vmem:[#allocation2 + $0x68] sm:$0xff] }
 0x1fd   : > { %3491 = vmatprep.mubr.f32.mxu1 %v2975_v43  ;;  %v1624_v43 = vld [vmem:[#allocation2 + $0x70] sm:$0xff] }
 0x200   : > { %3492 = vmatmul.mubr.f32.gmra.mrb[16].mxu1 %v2976_v45 }
 0x201   : > { %3494 = vmatprep.mubr.f32.mxu1 %v2979_v46 }
 0x204   : > { %3495 = vmatmul.mubr.f32.gmra.mrb[18].mxu1 %v2980_v48  ;;  %v1625_v48 = vld [vmem:[#allocation2 + $0x78] sm:$0xff] }
 0x205   : > { %3497 = vmatprep.mubr.f32.mxu1 %v2983_v49  ;;  %v1626_v49 = vld [vmem:[#allocation2 + $0x80] sm:$0xff] }
 0x208   : > { %3498 = vmatmul.mubr.f32.gmra.mrb[20].mxu1 %v2984_v51 }
 0x209   : > { %3500 = vmatprep.mubr.f32.mxu1 %v2987_v52 }
 0x20c   : > { %3501 = vmatmul.mubr.f32.gmra.mrb[22].mxu1 %v2988_v54  ;;  %v1627_v54 = vld [vmem:[#allocation2 + $0x88] sm:$0xff] }
 0x20d   : > { %3503 = vmatprep.mubr.f32.mxu1 %v2991_v55  ;;  %v1628_v55 = vld [vmem:[#allocation2 + $0x90] sm:$0xff] }
 0x210   : > { %3504 = vmatmul.mubr.f32.gmra.mrb[24].mxu1 %v2992_v57 }
 0x211   : > { %3506 = vmatprep.mubr.f32.mxu1 %v2995_v58 }
 0x214   : > { %3507 = vmatmul.mubr.f32.gmra.mrb[26].mxu1 %v2996_v60  ;;  %v1629_v60 = vld [vmem:[#allocation2 + $0x98] sm:$0xff] }
 0x215   : > { %3509 = vmatprep.mubr.f32.mxu1 %v2999_v61  ;;  %v1630_v61 = vld [vmem:[#allocation2 + $0xa0] sm:$0xff] }
 0x218   : > { %3510 = vmatmul.mubr.f32.gmra.mrb[28].mxu1 %v3000_v63 }
 0x219   : > { %3512 = vmatprep.mubr.f32.mxu1 %v3003_v0 }
 0x21c   : > { %3513 = vmatmul.mubr.f32.gmra.mrb[30].mxu1 %v3004_v1 }
 0x239   : > { %v1687_v3 = vpop.permute.xlu1 %1686  ;;  %v1677_v4 = vpop.permute.xlu0 %1676 }
 0x23a   : > { %v1834_v6 = vmul.f32 %v1677_v4, %v1610_v2  ;;  %v1836_v8 = vmul.f32 %v1687_v3, %v1612_v5  ;;  %v1631_v2 = vld [vmem:[#allocation2 + $0xa8] sm:$0xff]  ;;  %v1632_v3 = vld [vmem:[#allocation2 + $0xb0] sm:$0xff] }
 0x23c   : > { %3547 = vmatprep.mubr.f32.mxu0 %v1834_v6 }
 0x23d   : > { %v1692_v9 = vpop.permute.xlu1 %1691  ;;  %v1682_v10 = vpop.permute.xlu0 %1681 }
 0x23e   : > { %v1835_v11 = vmul.f32 %v1682_v10, %v1611_v7  ;;  %v1837_v16 = vmul.f32 %v1692_v9, %v1613_v12  ;;  %v1634_v9 = vld [vmem:[#allocation2 + $0xc0] sm:$0xff] }
 0x240   : > { %3548 = vmatmul.mubr.f32.vlgmr.msra.gmra.mrb[0].mxu0 %v1835_v11 }
 0x241   : > { %v1702_v14 = vpop.permute.xlu1 %1701  ;;  %v1697_v15 = vpop.permute.xlu0 %1696  ;;  %3550 = vmatprep.mubr.f32.mxu0 %v1836_v8  ;;  %v1633_v8 = vld [vmem:[#allocation2 + $0xb8] sm:$0xff] }
 0x242   : > { %v1838_v17 = vmul.f32 %v1697_v15, %v1614_v13  ;;  %v1839_v22 = vmul.f32 %v1702_v14, %v1615_v18  ;;  %v1635_v14 = vld [vmem:[#allocation2 + $0xc8] sm:$0xff]  ;;  %v1636_v15 = vld [vmem:[#allocation2 + $0xd0] sm:$0xff] }
 0x244   : > { %3551 = vmatmul.mubr.f32.gmra.mrb[2].mxu0 %v1837_v16 }
 0x245   : > { %v1712_v20 = vpop.permute.xlu1 %1711  ;;  %v1707_v21 = vpop.permute.xlu0 %1706  ;;  %3553 = vmatprep.mubr.f32.mxu0 %v1838_v17 }
 0x246   : > { %v1840_v23 = vmul.f32 %v1707_v21, %v1616_v19  ;;  %v1841_v28 = vmul.f32 %v1712_v20, %v1617_v24  ;;  %v1637_v20 = vld [vmem:[#allocation2 + $0xd8] sm:$0xff]  ;;  %v1638_v21 = vld [vmem:[#allocation2 + $0xe0] sm:$0xff] }
 0x248   : > { %3554 = vmatmul.mubr.f32.gmra.mrb[4].mxu0 %v1839_v22 }
 0x249   : > { %v1722_v26 = vpop.permute.xlu1 %1721  ;;  %v1717_v27 = vpop.permute.xlu0 %1716  ;;  %3556 = vmatprep.mubr.f32.mxu0 %v1840_v23 }
 0x24a   : > { %v1842_v29 = vmul.f32 %v1717_v27, %v1618_v25  ;;  %v1843_v34 = vmul.f32 %v1722_v26, %v1619_v30  ;;  %v1639_v26 = vld [vmem:[#allocation2 + $0xe8] sm:$0xff]  ;;  %v1640_v27 = vld [vmem:[#allocation2 + $0xf0] sm:$0xff] }
 0x24c   : > { %3557 = vmatmul.mubr.f32.gmra.mrb[6].mxu0 %v1841_v28 }
 0x24d   : > { %v1732_v32 = vpop.permute.xlu1 %1731  ;;  %v1727_v33 = vpop.permute.xlu0 %1726  ;;  %3559 = vmatprep.mubr.f32.mxu0 %v1842_v29 }
 0x24e   : > { %v1844_v35 = vmul.f32 %v1727_v33, %v1620_v31  ;;  %v1845_v40 = vmul.f32 %v1732_v32, %v1621_v36  ;;  %v1641_v32 = vld [vmem:[#allocation2 + $0xf8] sm:$0xff] }
 0x250   : > { %3560 = vmatmul.mubr.f32.gmra.mrb[8].mxu0 %v1843_v34 }
 0x251   : > { %v1742_v38 = vpop.permute.xlu1 %1741  ;;  %v1737_v39 = vpop.permute.xlu0 %1736  ;;  %3562 = vmatprep.mubr.f32.mxu0 %v1844_v35 }
 0x252   : > { %v1846_v41 = vmul.f32 %v1737_v39, %v1622_v37  ;;  %v1847_v46 = vmul.f32 %v1742_v38, %v1623_v42 }
 0x254   : > { %3563 = vmatmul.mubr.f32.gmra.mrb[10].mxu0 %v1845_v40 }
 0x255   : > { %v1752_v44 = vpop.permute.xlu1 %1751  ;;  %v1747_v45 = vpop.permute.xlu0 %1746  ;;  %3565 = vmatprep.mubr.f32.mxu0 %v1846_v41 }
 0x256   : > { %v1848_v47 = vmul.f32 %v1747_v45, %v1624_v43  ;;  %v1849_v52 = vmul.f32 %v1752_v44, %v1625_v48 }
 0x258   : > { %3566 = vmatmul.mubr.f32.gmra.mrb[12].mxu0 %v1847_v46 }
 0x259   : > { %v1762_v50 = vpop.permute.xlu1 %1761  ;;  %v1757_v51 = vpop.permute.xlu0 %1756  ;;  %3568 = vmatprep.mubr.f32.mxu0 %v1848_v47 }
 0x25a   : > { %v1850_v53 = vmul.f32 %v1757_v51, %v1626_v49  ;;  %v1851_v58 = vmul.f32 %v1762_v50, %v1627_v54 }
 0x25c   : > { %3569 = vmatmul.mubr.f32.gmra.mrb[14].mxu0 %v1849_v52 }
 0x25d   : > { %v1772_v56 = vpop.permute.xlu1 %1771  ;;  %v1767_v57 = vpop.permute.xlu0 %1766  ;;  %3571 = vmatprep.mubr.f32.mxu0 %v1850_v53 }
 0x25e   : > { %v1852_v59 = vmul.f32 %v1767_v57, %v1628_v55  ;;  %v1853_v0 = vmul.f32 %v1772_v56, %v1629_v60 }
 0x260   : > { %3572 = vmatmul.mubr.f32.gmra.mrb[16].mxu0 %v1851_v58 }
 0x261   : > { %v1782_v62 = vpop.permute.xlu1 %1781  ;;  %v1777_v63 = vpop.permute.xlu0 %1776  ;;  %3574 = vmatprep.mubr.f32.mxu0 %v1852_v59 }
 0x262   : > { %v1854_v1 = vmul.f32 %v1777_v63, %v1630_v61  ;;  %v1855_v6 = vmul.f32 %v1782_v62, %v1631_v2 }
 0x264   : > { %3575 = vmatmul.mubr.f32.gmra.mrb[18].mxu0 %v1853_v0 }
 0x265   : > { %v1792_v4 = vpop.permute.xlu1 %1791  ;;  %v1787_v5 = vpop.permute.xlu0 %1786  ;;  %3577 = vmatprep.mubr.f32.mxu0 %v1854_v1 }
 0x266   : > { %v1856_v7 = vmul.f32 %v1787_v5, %v1632_v3  ;;  %v1857_v12 = vmul.f32 %v1792_v4, %v1633_v8  ;;  %v4491_v3 = vld [vmem:[%s4591_s6] ss:$0 sm:$0xff] }
 0x268   : > { %3578 = vmatmul.mubr.f32.gmra.mrb[20].mxu0 %v1855_v6 }
 0x269   : > { %v1802_v10 = vpop.permute.xlu1 %1801  ;;  %v1797_v11 = vpop.permute.xlu0 %1796  ;;  %3580 = vmatprep.mubr.f32.mxu0 %v1856_v7 }
 0x26a   : > { %v1858_v13 = vmul.f32 %v1797_v11, %v1634_v9  ;;  %v1859_v18 = vmul.f32 %v1802_v10, %v1635_v14 }
 0x26c   : > { %3581 = vmatmul.mubr.f32.gmra.mrb[22].mxu0 %v1857_v12 }
 0x26d   : > { %v1812_v16 = vpop.permute.xlu1 %1811  ;;  %v1807_v17 = vpop.permute.xlu0 %1806  ;;  %3583 = vmatprep.mubr.f32.mxu0 %v1858_v13 }
 0x26e   : > { %v1860_v19 = vmul.f32 %v1807_v17, %v1636_v15  ;;  %v1861_v24 = vmul.f32 %v1812_v16, %v1637_v20 }
 0x270   : > { %3584 = vmatmul.mubr.f32.gmra.mrb[24].mxu0 %v1859_v18 }
 0x271   : > { %v1822_v22 = vpop.permute.xlu1 %1821  ;;  %v1817_v23 = vpop.permute.xlu0 %1816  ;;  %3586 = vmatprep.mubr.f32.mxu0 %v1860_v19 }
 0x272   : > { %v1862_v25 = vmul.f32 %v1817_v23, %v1638_v21  ;;  %v1863_v29 = vmul.f32 %v1822_v22, %v1639_v26 }
 0x274   : > { %3587 = vmatmul.mubr.f32.gmra.mrb[26].mxu0 %v1861_v24 }
 0x275   : > { %v1827_v28 = vpop.permute.xlu0 %1826  ;;  %3589 = vmatprep.mubr.f32.mxu0 %v1862_v25  ;;  %v1832_v31 = vpop.permute.xlu1 %1831 }
 0x276   : > { %v1864_v30 = vmul.f32 %v1827_v28, %v1640_v27  ;;  %v1865_v33 = vmul.f32 %v1832_v31, %v1641_v32 }
 0x278   : > { %3590 = vmatmul.mubr.f32.gmra.mrb[28].mxu0 %v1863_v29 }
 0x279   : > { %3592 = vmatprep.mubr.f32.mxu0 %v1864_v30 }
 0x27c   : > { %3593 = vmatmul.mubr.f32.gmra.mrb[30].mxu0 %v1865_v33 }
 0x2b3   : > { %v3469_v34 = vpop.f32.mrb[0].mxu1 }
 0x2b4   : > { %v2028_v35 = vpop.f32.mrb[1].mxu1 }
 0x2b7   : > { %v3472_v36 = vpop.f32.mrb[2].mxu1 }
 0x2b8   : > { %v2038_v37 = vpop.f32.mrb[3].mxu1 }
 0x2bb   : > { %v3475_v38 = vpop.f32.mrb[4].mxu1 }
 0x2bc   : > { %v2048_v39 = vpop.f32.mrb[5].mxu1 }
 0x2bf   : > { %v3478_v40 = vpop.f32.mrb[6].mxu1 }
 0x2c0   : > { %v2058_v41 = vpop.f32.mrb[7].mxu1 }
 0x2c3   : > { %v3481_v42 = vpop.f32.mrb[8].mxu1 }
 0x2c4   : > { %v4442_v43 = vpop.f32.mrb[9].mxu1 }
 0x2c7   : > { %v4444_v44 = vpop.f32.mrb[10].mxu1 }
 0x2c8   : > { %v4446_v45 = vpop.f32.mrb[11].mxu1 }
 0x2cb   : > { %v4448_v46 = vpop.f32.mrb[12].mxu1 }
 0x2cc   : > { %v4450_v47 = vpop.f32.mrb[13].mxu1 }
 0x2cf   : > { %v4452_v48 = vpop.f32.mrb[14].mxu1 }
 0x2d0   : > { %v4454_v49 = vpop.f32.mrb[15].mxu1 }
 0x2d3   : > { %v4456_v50 = vpop.f32.mrb[16].mxu1 }
 0x2d4   : > { %v4458_v51 = vpop.f32.mrb[17].mxu1 }
 0x2d7   : > { %v4460_v52 = vpop.f32.mrb[18].mxu1 }
 0x2d8   : > { %v4462_v53 = vpop.f32.mrb[19].mxu1 }
 0x2db   : > { %v4464_v54 = vpop.f32.mrb[20].mxu1 }
 0x2dc   : > { %v4466_v55 = vpop.f32.mrb[21].mxu1 }
 0x2df   : > { %v4468_v56 = vpop.f32.mrb[22].mxu1 }
 0x2e0   : > { %v4470_v57 = vpop.f32.mrb[23].mxu1 }
 0x2e3   : > { %v4472_v58 = vpop.f32.mrb[24].mxu1 }
 0x2e4   : > { %v4474_v59 = vpop.f32.mrb[25].mxu1 }
 0x2e7   : > { %v4476_v60 = vpop.f32.mrb[26].mxu1 }
 0x2e8   : > { %v4478_v61 = vpop.f32.mrb[27].mxu1 }
 0x2eb   : > { %v4480_v62 = vpop.f32.mrb[28].mxu1 }
 0x2ec   : > { %v4482_v63 = vpop.f32.mrb[29].mxu1 }
 0x2ef   : > { %v4484_v0 = vpop.f32.mrb[30].mxu1 }
 0x2f0   : > { %v4486_v1 = vpop.f32.mrb[31].mxu1 }
 0x313   : > { %v3549_v2 = vpop.f32.mrb[0].mxu0 }
 0x314   : > { %v2259_v4 = vadd.f32 %v3549_v2, %v3469_v34  ;;  %v2253_v5 = vpop.f32.mrb[1].mxu0 }
 0x315   : > { %v2254_v6 = vadd.f32 %v2253_v5, %v2028_v35 }
 0x316   : > { %v2420_v7 = vadd.f32 %v4491_v3, %v2259_v4 }
 0x317   : > { %v2419_v8 = vadd.f32 %v4491_v3, %v2254_v6  ;;  %v3552_v9 = vpop.f32.mrb[2].mxu0 }
 0x318   : > { %v2452_v10 = vmax.f32 %v2420_v7, 0.0  ;;  %v2269_v11 = vadd.f32 %v3552_v9, %v3472_v36  ;;  %v2263_v12 = vpop.f32.mrb[3].mxu0 }
 0x319   : > { %v2451_v13 = vmax.f32 %v2419_v8, 0.0  ;;  %v2264_v14 = vadd.f32 %v2263_v12, %v2038_v37 }
 0x31a   : > { %v2422_v15 = vadd.f32 %v4491_v3, %v2269_v11 }
 0x31b   : > { %v3008_v16 = vpack.c.bf16 %v2452_v10, %v2451_v13  ;;  %v2421_v17 = vadd.f32 %v4491_v3, %v2264_v14  ;;  %v3555_v18 = vpop.f32.mrb[4].mxu0 }
 0x31c   : > { %v2454_v19 = vmax.f32 %v2422_v15, 0.0  ;;  %v2279_v20 = vadd.f32 %v3555_v18, %v3475_v38  ;;  %v2273_v21 = vpop.f32.mrb[5].mxu0 }
 0x31d   : > { %3009 = vst [vmem:[%s4192_s9] sm:$0xff] %v3008_v16   ;;  %v2453_v22 = vmax.f32 %v2421_v17, 0.0  ;;  %v2274_v23 = vadd.f32 %v2273_v21, %v2048_v39 }
 0x31e   : > { %v2424_v24 = vadd.f32 %v4491_v3, %v2279_v20 }
 0x31f   : > { %v3013_v25 = vpack.c.bf16 %v2454_v19, %v2453_v22  ;;  %v2423_v26 = vadd.f32 %v4491_v3, %v2274_v23  ;;  %v3558_v27 = vpop.f32.mrb[6].mxu0 }
 0x320   : > { %v2456_v28 = vmax.f32 %v2424_v24, 0.0  ;;  %v2289_v29 = vadd.f32 %v3558_v27, %v3478_v40  ;;  %v2283_v30 = vpop.f32.mrb[7].mxu0 }
 0x321   : > { %3100 = vst [vmem:[%s4192_s9 + $0x8] sm:$0xff] %v3013_v25   ;;  %v2455_v31 = vmax.f32 %v2423_v26, 0.0  ;;  %v2284_v32 = vadd.f32 %v2283_v30, %v2058_v41 }
 0x322   : > { %v2426_v33 = vadd.f32 %v4491_v3, %v2289_v29 }
 0x323   : > { %v3018_v34 = vpack.c.bf16 %v2456_v28, %v2455_v31  ;;  %v2425_v35 = vadd.f32 %v4491_v3, %v2284_v32  ;;  %v3561_v36 = vpop.f32.mrb[8].mxu0 }
 0x324   : > { %v2458_v37 = vmax.f32 %v2426_v33, 0.0  ;;  %v2299_v38 = vadd.f32 %v3561_v36, %v3481_v42  ;;  %v2293_v39 = vpop.f32.mrb[9].mxu0 }
 0x325   : > { %3101 = vst [vmem:[%s4192_s9 + $0x10] sm:$0xff] %v3018_v34   ;;  %v2457_v2 = vmax.f32 %v2425_v35, 0.0  ;;  %v2294_v4 = vadd.f32 %v2293_v39, %v4442_v43 }
 0x326   : > { %v2428_v40 = vadd.f32 %v4491_v3, %v2299_v38 }
 0x327   : > { %v3023_v5 = vpack.c.bf16 %v2458_v37, %v2457_v2  ;;  %v2427_v41 = vadd.f32 %v4491_v3, %v2294_v4  ;;  %v3564_v6 = vpop.f32.mrb[10].mxu0 }
 0x328   : > { %v2460_v7 = vmax.f32 %v2428_v40, 0.0  ;;  %v2309_v8 = vadd.f32 %v3564_v6, %v4444_v44  ;;  %v2303_v9 = vpop.f32.mrb[11].mxu0 }
 0x329   : > { %3102 = vst [vmem:[%s4192_s9 + $0x18] sm:$0xff] %v3023_v5   ;;  %v2459_v10 = vmax.f32 %v2427_v41, 0.0  ;;  %v2304_v42 = vadd.f32 %v2303_v9, %v4446_v45 }
 0x32a   : > { %v2430_v11 = vadd.f32 %v4491_v3, %v2309_v8 }
 0x32b   : > { %v3028_v12 = vpack.c.bf16 %v2460_v7, %v2459_v10  ;;  %v2429_v43 = vadd.f32 %v4491_v3, %v2304_v42  ;;  %v3567_v13 = vpop.f32.mrb[12].mxu0 }
 0x32c   : > { %v2462_v14 = vmax.f32 %v2430_v11, 0.0  ;;  %v2319_v15 = vadd.f32 %v3567_v13, %v4448_v46  ;;  %v2313_v16 = vpop.f32.mrb[13].mxu0 }
 0x32d   : > { %3103 = vst [vmem:[%s4192_s9 + $0x20] sm:$0xff] %v3028_v12   ;;  %v2461_v17 = vmax.f32 %v2429_v43, 0.0  ;;  %v2314_v44 = vadd.f32 %v2313_v16, %v4450_v47 }
 0x32e   : > { %v2432_v18 = vadd.f32 %v4491_v3, %v2319_v15 }
 0x32f   : > { %v3033_v19 = vpack.c.bf16 %v2462_v14, %v2461_v17  ;;  %v2431_v45 = vadd.f32 %v4491_v3, %v2314_v44  ;;  %v3570_v20 = vpop.f32.mrb[14].mxu0 }
 0x330   : > { %v2464_v21 = vmax.f32 %v2432_v18, 0.0  ;;  %v2329_v22 = vadd.f32 %v3570_v20, %v4452_v48  ;;  %v2323_v23 = vpop.f32.mrb[15].mxu0 }
 0x331   : > { %3104 = vst [vmem:[%s4192_s9 + $0x28] sm:$0xff] %v3033_v19   ;;  %v2463_v24 = vmax.f32 %v2431_v45, 0.0  ;;  %v2324_v46 = vadd.f32 %v2323_v23, %v4454_v49 }
 0x332   : > { %v2434_v25 = vadd.f32 %v4491_v3, %v2329_v22 }
 0x333   : > { %v3038_v26 = vpack.c.bf16 %v2464_v21, %v2463_v24  ;;  %v2433_v47 = vadd.f32 %v4491_v3, %v2324_v46  ;;  %v3573_v27 = vpop.f32.mrb[16].mxu0 }
 0x334   : > { %v2466_v28 = vmax.f32 %v2434_v25, 0.0  ;;  %v2339_v29 = vadd.f32 %v3573_v27, %v4456_v50  ;;  %v2333_v30 = vpop.f32.mrb[17].mxu0 }
 0x335   : > { %3105 = vst [vmem:[%s4192_s9 + $0x30] sm:$0xff] %v3038_v26   ;;  %v2465_v31 = vmax.f32 %v2433_v47, 0.0  ;;  %v2334_v48 = vadd.f32 %v2333_v30, %v4458_v51 }
 0x336   : > { %v2436_v32 = vadd.f32 %v4491_v3, %v2339_v29 }
 0x337   : > { %v3043_v33 = vpack.c.bf16 %v2466_v28, %v2465_v31  ;;  %v2435_v49 = vadd.f32 %v4491_v3, %v2334_v48  ;;  %v3576_v34 = vpop.f32.mrb[18].mxu0 }
 0x338   : > { %v2468_v35 = vmax.f32 %v2436_v32, 0.0  ;;  %v2349_v36 = vadd.f32 %v3576_v34, %v4460_v52  ;;  %v2343_v37 = vpop.f32.mrb[19].mxu0 }
 0x339   : > { %3106 = vst [vmem:[%s4192_s9 + $0x38] sm:$0xff] %v3043_v33   ;;  %v2467_v38 = vmax.f32 %v2435_v49, 0.0  ;;  %v2344_v50 = vadd.f32 %v2343_v37, %v4462_v53 }
 0x33a   : > { %v2438_v39 = vadd.f32 %v4491_v3, %v2349_v36 }
 0x33b   : > { %v3048_v2 = vpack.c.bf16 %v2468_v35, %v2467_v38  ;;  %v2437_v51 = vadd.f32 %v4491_v3, %v2344_v50  ;;  %v3579_v4 = vpop.f32.mrb[20].mxu0 }
 0x33c   : > { %v2470_v40 = vmax.f32 %v2438_v39, 0.0  ;;  %v2359_v5 = vadd.f32 %v3579_v4, %v4464_v54  ;;  %v2353_v41 = vpop.f32.mrb[21].mxu0 }
 0x33d   : > { %3107 = vst [vmem:[%s4192_s9 + $0x40] sm:$0xff] %v3048_v2   ;;  %v2469_v6 = vmax.f32 %v2437_v51, 0.0  ;;  %v2354_v52 = vadd.f32 %v2353_v41, %v4466_v55 }
 0x33e   : > { %v2440_v7 = vadd.f32 %v4491_v3, %v2359_v5 }
 0x33f   : > { %v3053_v8 = vpack.c.bf16 %v2470_v40, %v2469_v6  ;;  %v2439_v53 = vadd.f32 %v4491_v3, %v2354_v52  ;;  %v3582_v9 = vpop.f32.mrb[22].mxu0 }
 0x340   : > { %v2472_v10 = vmax.f32 %v2440_v7, 0.0  ;;  %v2369_v42 = vadd.f32 %v3582_v9, %v4468_v56  ;;  %v2363_v11 = vpop.f32.mrb[23].mxu0 }
 0x341   : > { %3108 = vst [vmem:[%s4192_s9 + $0x48] sm:$0xff] %v3053_v8   ;;  %v2471_v12 = vmax.f32 %v2439_v53, 0.0  ;;  %v2364_v54 = vadd.f32 %v2363_v11, %v4470_v57 }
 0x342   : > { %v2442_v43 = vadd.f32 %v4491_v3, %v2369_v42 }
 0x343   : > { %v3058_v13 = vpack.c.bf16 %v2472_v10, %v2471_v12  ;;  %v2441_v55 = vadd.f32 %v4491_v3, %v2364_v54  ;;  %v3585_v14 = vpop.f32.mrb[24].mxu0 }
 0x344   : > { %v2474_v15 = vmax.f32 %v2442_v43, 0.0  ;;  %v2379_v16 = vadd.f32 %v3585_v14, %v4472_v58  ;;  %v2373_v17 = vpop.f32.mrb[25].mxu0 }
 0x345   : > { %3109 = vst [vmem:[%s4192_s9 + $0x50] sm:$0xff] %v3058_v13   ;;  %v2473_v44 = vmax.f32 %v2441_v55, 0.0  ;;  %v2374_v56 = vadd.f32 %v2373_v17, %v4474_v59 }
 0x346   : > { %v2444_v18 = vadd.f32 %v4491_v3, %v2379_v16 }
 0x347   : > { %v3063_v19 = vpack.c.bf16 %v2474_v15, %v2473_v44  ;;  %v2443_v57 = vadd.f32 %v4491_v3, %v2374_v56  ;;  %v3588_v45 = vpop.f32.mrb[26].mxu0 }
 0x348   : > { %v2476_v20 = vmax.f32 %v2444_v18, 0.0  ;;  %v2389_v21 = vadd.f32 %v3588_v45, %v4476_v60  ;;  %v2383_v22 = vpop.f32.mrb[27].mxu0 }
 0x349   : > { %3110 = vst [vmem:[%s4192_s9 + $0x58] sm:$0xff] %v3063_v19   ;;  %v2475_v23 = vmax.f32 %v2443_v57, 0.0  ;;  %v2384_v58 = vadd.f32 %v2383_v22, %v4478_v61 }
 0x34a   : > { %v2446_v24 = vadd.f32 %v4491_v3, %v2389_v21 }
 0x34b   : > { %v3068_v46 = vpack.c.bf16 %v2476_v20, %v2475_v23  ;;  %v2445_v59 = vadd.f32 %v4491_v3, %v2384_v58  ;;  %v3591_v25 = vpop.f32.mrb[28].mxu0 }
 0x34c   : > { %v2478_v26 = vmax.f32 %v2446_v24, 0.0  ;;  %v2399_v47 = vadd.f32 %v3591_v25, %v4480_v62  ;;  %v2393_v27 = vpop.f32.mrb[29].mxu0 }
 0x34d   : > { %3111 = vst [vmem:[%s4192_s9 + $0x60] sm:$0xff] %v3068_v46   ;;  %v2477_v28 = vmax.f32 %v2445_v59, 0.0  ;;  %v2394_v60 = vadd.f32 %v2393_v27, %v4482_v63 }
 0x34e   : > { %v2448_v29 = vadd.f32 %v4491_v3, %v2399_v47 }
 0x34f   : > { %v3073_v30 = vpack.c.bf16 %v2478_v26, %v2477_v28  ;;  %v2447_v61 = vadd.f32 %v4491_v3, %v2394_v60  ;;  %v3594_v31 = vpop.f32.mrb[30].mxu0 }
 0x350   : > { %v2480_v48 = vmax.f32 %v2448_v29, 0.0  ;;  %v2409_v32 = vadd.f32 %v3594_v31, %v4484_v0  ;;  %v2403_v33 = vpop.f32.mrb[31].mxu0 }
 0x351   : > { %3112 = vst [vmem:[%s4192_s9 + $0x68] sm:$0xff] %v3073_v30   ;;  %v2479_v49 = vmax.f32 %v2447_v61, 0.0  ;;  %v2404_v62 = vadd.f32 %v2403_v33, %v4486_v1 }
 0x352   : > { %v2450_v34 = vadd.f32 %v4491_v3, %v2409_v32 }
 0x353   : > { %v3078_v35 = vpack.c.bf16 %v2480_v48, %v2479_v49  ;;  %v2449_v63 = vadd.f32 %v4491_v3, %v2404_v62 }
 0x354   : > { %v2482_v36 = vmax.f32 %v2450_v34, 0.0 }
 0x355   : > { %3113 = vst [vmem:[%s4192_s9 + $0x70] sm:$0xff] %v3078_v35   ;;  %v2481_v37 = vmax.f32 %v2449_v63, 0.0 }
 0x357   : > { %v3083_v38 = vpack.c.bf16 %v2482_v36, %v2481_v37 }
 0x359   : > { %3114 = vst [vmem:[%s4192_s9 + $0x78] sm:$0xff] %v3083_v38  }
 0x35a PF: > { %s17_s30 = sadd.s32 1, %s3933_s30   ;;  %s4597_s17 = sld [smem:[#allocation4_spill]] }
 0x35b   : > { %p14_p0 = scmp.ge.s32.totalorder %s17_s30, 10   ;;  %s4598_s24 = smov %s3913_s25 }
 0x35c   : > { %s4599_s25 = smov %s4028_s14  ;;  %s4600_s26 = smov %s3925_s28 }
 0x35d   : > { %s4601_s27 = smov %s3929_s29  ;;  %s4602_s28 = smov %s4605_s8 }
 0x35e   :  { %16 = sbr.rel (!%p14_p0) target bundleno = 6 (0x6), region = 123 }
 0x360   : > { %s4603_s29 = smov %s4597_s17 }

// kernel: graphsage_forward.3
= control target key start
LH: loop header
LB: loop body
LE: loop exit
PB: predicated region body
PF: predicated region fallthrough
CT: control target
= control target key end

     0   :  { %s4279_s0 = inlined_call_operand.vmem [shape: bf16[1024,1024], index: 0, kind: input, shape index: {}]   ;;  %s4280_s1 = inlined_call_operand.vmem [shape: bf16[1024,128], index: 1, kind: input, shape index: {}, may-alias: {1,2}]   ;;  %s4281_s2 = inlined_call_operand.vmem [shape: bf16[1024,128], index: 2, kind: input, shape index: {}, may-alias: {1,2}]   ;;  %s4282_s3 = inlined_call_operand.vmem [shape: f32[1024,1], index: 3, kind: input, shape index: {}]   ;;  %s4283_s4 = inlined_call_operand.vmem [shape: f32[128,128], index: 4, kind: input, shape index: {}]   ;;  %s4284_s5 = inlined_call_operand.vmem [shape: f32[128,128], index: 5, kind: input, shape index: {}]   ;;  %s4285_s6 = inlined_call_operand.vmem [shape: f32[1,128], index: 6, kind: input, shape index: {}]   ;;  %s4286_s7 = inlined_call_operand.vmem [shape: f32[1024,128], index: 7, kind: output, shape index: {}]  }
   0x1   :  { %4288 = sst [smem:[#allocation5_spill]] %s4279_s0 }
   0x2   :  { %s3658_s24 = smov 0   ;;  %s3660_s25 = smov 0  }
   0x3   :  { %s3662_s26 = smov 0   ;;  %s3664_s27 = smov 0  }
   0x4   :  { %s3666_s28 = smov 0   ;;  %s3668_s29 = smov 0  }
   0x5   :  { %s3670_s30 = smov 0  }
   0x6 LB: > { %s26_s8 = sadd.s32 1, %s3606_s28  ;;  %s29_s9 = sadd.s32 1, %s3610_s29  ;;  %s3614_s30 = sphi %s3670_s30, %s17_s30   ;;  %s3610_s29 = sphi %s3668_s29, %s4297_s29   ;;  %s3606_s28 = sphi %s3666_s28, %s4296_s28   ;;  %s3602_s27 = sphi %s3664_s27, %s4295_s27   ;;  %s3598_s26 = sphi %s3662_s26, %s4294_s26   ;;  %s3594_s25 = sphi %s3660_s25, %s4293_s25   ;;  %s3590_s24 = sphi %s3658_s24, %s4292_s24  }
   0x7   : > { %p27_p0 = scmp.ge.s32.totalorder %s26_s8, 2  ;;  %p45_p1 = scmp.ne.s32.totalorder %s3594_s25, %s3590_s24 }
   0x8   : > { %p46_p2 = scmp.eq.s32.totalorder %s3614_s30, 0  ;;  %s38_s13 = sadd.s32 1, %s3594_s25 }
   0x9   : > { %s4299_s8 = smov (%p27_p0, %s26_s8), 0  ;;  %s4301_s9 = smov (!%p27_p0, %s29_s9), %s3610_s29 }
   0xa   : > { %p47_p3 = por %p46_p2, %p45_p1  ;;  %p31_p4 = scmp.ge.s32.totalorder %s4301_s9, 4 }
   0xb   : > { %s34_s10 = ssub.s32 %s3606_s28, %s4299_s8  ;;  %p2599_p6 = scmp.ge.s32.totalorder %s3614_s30, 8 }
   0xc   : > { %s4303_s9 = smov (%p31_p4, %s4301_s9), 0 }
   0xd   : > { %4289 = sst [smem:[#allocation4_spill]] %s4303_s9  ;;  %s33_s11 = ssub.s32 %s3610_s29, %s4303_s9 }
   0xe   : > { %s35_s12 = sor.u32 %s34_s10, %s33_s11  ;;  %247 = sbr.rel (%p2599_p6) target bundleno = 63 (0x3f), region = 28 }
   0xf   : > { %p36_p5 = scmp.eq.s32.totalorder %s35_s12, 0 }
  0x11   : > { %s3709_s14 = scalar_select %p36_p5, %s3594_s25, %s38_s13  }
  0x15   : > { %250 = sbr.rel (!%p47_p3) target bundleno = 63 (0x3f), region = 32  ;;  %s252_s15 = sand.u32 (%p47_p3), 1, %s3594_s25  }
  0x16   : > { %s2602_s16 = sshll.u32 (%p47_p3), %s3606_s28, 2  ;;  %s2600_s17 = sshll.u32 (%p47_p3), %s252_s15, 9 }
  0x17   : > { %s2716_s18 = sshll.u32 (%p47_p3), %s3610_s29, 8  ;;  %s4290_s0 = sld [smem:[#allocation5_spill]] (%p47_p3) }
  0x18   : > { %s258_s19 = sadd.s32 (%p47_p3), %s2716_s18, %s2602_s16  ;;  %s3723_s10 = scalar_lea.vmem (%p47_p3), [#allocation3], %s2600_s17 }
  0x19   : > { %s2604_s20 = sshll.u32 (%p47_p3), %s258_s19, 2 }
  0x1d   : > { %s3718_s23 = scalar_lea.vmem %s4290_s0, %s2604_s20 }
  0x1e   : > { %v273_v0 = vld [vmem:[%s3718_s23] sm:$0xff]  ;;  %v275_v1 = vld [vmem:[%s3718_s23 + $0x8] sm:$0xff] }
  0x1f   : > { %v277_v2 = vld [vmem:[%s3718_s23 + $0x20] sm:$0xff]  ;;  %274 = vst [vmem:[%s3723_s10] sm:$0xff] %v273_v0  ;;  %276 = vst [vmem:[%s3723_s10 + $0x8] sm:$0xff] %v275_v1  ;;  %v279_v3 = vld [vmem:[%s3718_s23 + $0x28] sm:$0xff] }
  0x20   : > { %278 = vst [vmem:[%s3723_s10 + $0x10] sm:$0xff] %v277_v2  ;;  %v281_v4 = vld [vmem:[%s3718_s23 + $0x40] sm:$0xff]  ;;  %v283_v5 = vld [vmem:[%s3718_s23 + $0x48] sm:$0xff]  ;;  %280 = vst [vmem:[%s3723_s10 + $0x18] sm:$0xff] %v279_v3 }
  0x21   : > { %282 = vst [vmem:[%s3723_s10 + $0x20] sm:$0xff] %v281_v4  ;;  %284 = vst [vmem:[%s3723_s10 + $0x28] sm:$0xff] %v283_v5  ;;  %v285_v6 = vld [vmem:[%s3718_s23 + $0x60] sm:$0xff]  ;;  %v287_v7 = vld [vmem:[%s3718_s23 + $0x68] sm:$0xff] }
  0x22   : > { %v289_v8 = vld [vmem:[%s3718_s23 + $0x80] sm:$0xff]  ;;  %286 = vst [vmem:[%s3723_s10 + $0x30] sm:$0xff] %v285_v6  ;;  %288 = vst [vmem:[%s3723_s10 + $0x38] sm:$0xff] %v287_v7  ;;  %v291_v9 = vld [vmem:[%s3718_s23 + $0x88] sm:$0xff] }
  0x23   : > { %290 = vst [vmem:[%s3723_s10 + $0x40] sm:$0xff] %v289_v8  ;;  %v293_v10 = vld [vmem:[%s3718_s23 + $0xa0] sm:$0xff]  ;;  %v295_v11 = vld [vmem:[%s3718_s23 + $0xa8] sm:$0xff]  ;;  %292 = vst [vmem:[%s3723_s10 + $0x48] sm:$0xff] %v291_v9 }
  0x24   : > { %294 = vst [vmem:[%s3723_s10 + $0x50] sm:$0xff] %v293_v10  ;;  %296 = vst [vmem:[%s3723_s10 + $0x58] sm:$0xff] %v295_v11  ;;  %v297_v12 = vld [vmem:[%s3718_s23 + $0xc0] sm:$0xff]  ;;  %v299_v13 = vld [vmem:[%s3718_s23 + $0xc8] sm:$0xff] }
  0x25   : > { %v301_v14 = vld [vmem:[%s3718_s23 + $0xe0] sm:$0xff]  ;;  %298 = vst [vmem:[%s3723_s10 + $0x60] sm:$0xff] %v297_v12  ;;  %300 = vst [vmem:[%s3723_s10 + $0x68] sm:$0xff] %v299_v13  ;;  %v303_v15 = vld [vmem:[%s3718_s23 + $0xe8] sm:$0xff] }
  0x26   : > { %302 = vst [vmem:[%s3723_s10 + $0x70] sm:$0xff] %v301_v14  ;;  %v305_v16 = vld [vmem:[%s3718_s23 + $0x100] sm:$0xff]  ;;  %v307_v17 = vld [vmem:[%s3718_s23 + $0x108] sm:$0xff]  ;;  %304 = vst [vmem:[%s3723_s10 + $0x78] sm:$0xff] %v303_v15 }
  0x27   : > { %306 = vst [vmem:[%s3723_s10 + $0x80] sm:$0xff] %v305_v16  ;;  %308 = vst [vmem:[%s3723_s10 + $0x88] sm:$0xff] %v307_v17  ;;  %v309_v18 = vld [vmem:[%s3718_s23 + $0x120] sm:$0xff]  ;;  %v311_v19 = vld [vmem:[%s3718_s23 + $0x128] sm:$0xff] }
  0x28   : > { %v313_v20 = vld [vmem:[%s3718_s23 + $0x140] sm:$0xff]  ;;  %310 = vst [vmem:[%s3723_s10 + $0x90] sm:$0xff] %v309_v18  ;;  %312 = vst [vmem:[%s3723_s10 + $0x98] sm:$0xff] %v311_v19  ;;  %v315_v21 = vld [vmem:[%s3718_s23 + $0x148] sm:$0xff] }
  0x29   : > { %314 = vst [vmem:[%s3723_s10 + $0xa0] sm:$0xff] %v313_v20  ;;  %v317_v22 = vld [vmem:[%s3718_s23 + $0x160] sm:$0xff]  ;;  %v319_v23 = vld [vmem:[%s3718_s23 + $0x168] sm:$0xff]  ;;  %316 = vst [vmem:[%s3723_s10 + $0xa8] sm:$0xff] %v315_v21 }
  0x2a   : > { %318 = vst [vmem:[%s3723_s10 + $0xb0] sm:$0xff] %v317_v22  ;;  %320 = vst [vmem:[%s3723_s10 + $0xb8] sm:$0xff] %v319_v23  ;;  %v321_v24 = vld [vmem:[%s3718_s23 + $0x180] sm:$0xff]  ;;  %v323_v25 = vld [vmem:[%s3718_s23 + $0x188] sm:$0xff] }
  0x2b   : > { %v325_v26 = vld [vmem:[%s3718_s23 + $0x1a0] sm:$0xff]  ;;  %322 = vst [vmem:[%s3723_s10 + $0xc0] sm:$0xff] %v321_v24  ;;  %324 = vst [vmem:[%s3723_s10 + $0xc8] sm:$0xff] %v323_v25  ;;  %v327_v27 = vld [vmem:[%s3718_s23 + $0x1a8] sm:$0xff] }
  0x2c   : > { %326 = vst [vmem:[%s3723_s10 + $0xd0] sm:$0xff] %v325_v26  ;;  %v329_v28 = vld [vmem:[%s3718_s23 + $0x1c0] sm:$0xff]  ;;  %v331_v29 = vld [vmem:[%s3718_s23 + $0x1c8] sm:$0xff]  ;;  %328 = vst [vmem:[%s3723_s10 + $0xd8] sm:$0xff] %v327_v27 }
  0x2d   : > { %330 = vst [vmem:[%s3723_s10 + $0xe0] sm:$0xff] %v329_v28  ;;  %332 = vst [vmem:[%s3723_s10 + $0xe8] sm:$0xff] %v331_v29  ;;  %v333_v30 = vld [vmem:[%s3718_s23 + $0x1e0] sm:$0xff]  ;;  %v335_v31 = vld [vmem:[%s3718_s23 + $0x1e8] sm:$0xff] }
  0x2e   : > { %v337_v32 = vld [vmem:[%s3718_s23 + $0x200] sm:$0xff]  ;;  %334 = vst [vmem:[%s3723_s10 + $0xf0] sm:$0xff] %v333_v30  ;;  %336 = vst [vmem:[%s3723_s10 + $0xf8] sm:$0xff] %v335_v31  ;;  %v339_v33 = vld [vmem:[%s3718_s23 + $0x208] sm:$0xff] }
  0x2f   : > { %338 = vst [vmem:[%s3723_s10 + $0x100] sm:$0xff] %v337_v32  ;;  %v341_v34 = vld [vmem:[%s3718_s23 + $0x220] sm:$0xff]  ;;  %v343_v35 = vld [vmem:[%s3718_s23 + $0x228] sm:$0xff]  ;;  %340 = vst [vmem:[%s3723_s10 + $0x108] sm:$0xff] %v339_v33 }
  0x30   : > { %342 = vst [vmem:[%s3723_s10 + $0x110] sm:$0xff] %v341_v34  ;;  %344 = vst [vmem:[%s3723_s10 + $0x118] sm:$0xff] %v343_v35  ;;  %v345_v36 = vld [vmem:[%s3718_s23 + $0x240] sm:$0xff]  ;;  %v347_v37 = vld [vmem:[%s3718_s23 + $0x248] sm:$0xff] }
  0x31   : > { %v349_v38 = vld [vmem:[%s3718_s23 + $0x260] sm:$0xff]  ;;  %346 = vst [vmem:[%s3723_s10 + $0x120] sm:$0xff] %v345_v36  ;;  %348 = vst [vmem:[%s3723_s10 + $0x128] sm:$0xff] %v347_v37  ;;  %v351_v39 = vld [vmem:[%s3718_s23 + $0x268] sm:$0xff] }
  0x32   : > { %350 = vst [vmem:[%s3723_s10 + $0x130] sm:$0xff] %v349_v38  ;;  %v353_v40 = vld [vmem:[%s3718_s23 + $0x280] sm:$0xff]  ;;  %v355_v41 = vld [vmem:[%s3718_s23 + $0x288] sm:$0xff]  ;;  %352 = vst [vmem:[%s3723_s10 + $0x138] sm:$0xff] %v351_v39 }
  0x33   : > { %354 = vst [vmem:[%s3723_s10 + $0x140] sm:$0xff] %v353_v40  ;;  %356 = vst [vmem:[%s3723_s10 + $0x148] sm:$0xff] %v355_v41  ;;  %v357_v42 = vld [vmem:[%s3718_s23 + $0x2a0] sm:$0xff]  ;;  %v359_v43 = vld [vmem:[%s3718_s23 + $0x2a8] sm:$0xff] }
  0x34   : > { %v361_v44 = vld [vmem:[%s3718_s23 + $0x2c0] sm:$0xff]  ;;  %358 = vst [vmem:[%s3723_s10 + $0x150] sm:$0xff] %v357_v42  ;;  %360 = vst [vmem:[%s3723_s10 + $0x158] sm:$0xff] %v359_v43  ;;  %v363_v45 = vld [vmem:[%s3718_s23 + $0x2c8] sm:$0xff] }
  0x35   : > { %362 = vst [vmem:[%s3723_s10 + $0x160] sm:$0xff] %v361_v44  ;;  %v365_v46 = vld [vmem:[%s3718_s23 + $0x2e0] sm:$0xff]  ;;  %v367_v47 = vld [vmem:[%s3718_s23 + $0x2e8] sm:$0xff]  ;;  %364 = vst [vmem:[%s3723_s10 + $0x168] sm:$0xff] %v363_v45 }
  0x36   : > { %366 = vst [vmem:[%s3723_s10 + $0x170] sm:$0xff] %v365_v46  ;;  %368 = vst [vmem:[%s3723_s10 + $0x178] sm:$0xff] %v367_v47  ;;  %v369_v48 = vld [vmem:[%s3718_s23 + $0x300] sm:$0xff]  ;;  %v371_v49 = vld [vmem:[%s3718_s23 + $0x308] sm:$0xff] }
  0x37   : > { %v373_v50 = vld [vmem:[%s3718_s23 + $0x320] sm:$0xff]  ;;  %370 = vst [vmem:[%s3723_s10 + $0x180] sm:$0xff] %v369_v48  ;;  %372 = vst [vmem:[%s3723_s10 + $0x188] sm:$0xff] %v371_v49  ;;  %v375_v51 = vld [vmem:[%s3718_s23 + $0x328] sm:$0xff] }
  0x38   : > { %374 = vst [vmem:[%s3723_s10 + $0x190] sm:$0xff] %v373_v50  ;;  %v377_v52 = vld [vmem:[%s3718_s23 + $0x340] sm:$0xff]  ;;  %v379_v53 = vld [vmem:[%s3718_s23 + $0x348] sm:$0xff]  ;;  %376 = vst [vmem:[%s3723_s10 + $0x198] sm:$0xff] %v375_v51 }
  0x39   : > { %378 = vst [vmem:[%s3723_s10 + $0x1a0] sm:$0xff] %v377_v52  ;;  %380 = vst [vmem:[%s3723_s10 + $0x1a8] sm:$0xff] %v379_v53  ;;  %v381_v54 = vld [vmem:[%s3718_s23 + $0x360] sm:$0xff]  ;;  %v383_v55 = vld [vmem:[%s3718_s23 + $0x368] sm:$0xff] }
  0x3a   : > { %v385_v56 = vld [vmem:[%s3718_s23 + $0x380] sm:$0xff]  ;;  %382 = vst [vmem:[%s3723_s10 + $0x1b0] sm:$0xff] %v381_v54  ;;  %384 = vst [vmem:[%s3723_s10 + $0x1b8] sm:$0xff] %v383_v55  ;;  %v387_v57 = vld [vmem:[%s3718_s23 + $0x388] sm:$0xff] }
  0x3b   : > { %386 = vst [vmem:[%s3723_s10 + $0x1c0] sm:$0xff] %v385_v56  ;;  %v389_v58 = vld [vmem:[%s3718_s23 + $0x3a0] sm:$0xff]  ;;  %v391_v59 = vld [vmem:[%s3718_s23 + $0x3a8] sm:$0xff]  ;;  %388 = vst [vmem:[%s3723_s10 + $0x1c8] sm:$0xff] %v387_v57 }
  0x3c   : > { %390 = vst [vmem:[%s3723_s10 + $0x1d0] sm:$0xff] %v389_v58  ;;  %392 = vst [vmem:[%s3723_s10 + $0x1d8] sm:$0xff] %v391_v59  ;;  %v393_v60 = vld [vmem:[%s3718_s23 + $0x3c0] sm:$0xff]  ;;  %v395_v61 = vld [vmem:[%s3718_s23 + $0x3c8] sm:$0xff] }
  0x3d   : > { %v397_v62 = vld [vmem:[%s3718_s23 + $0x3e0] sm:$0xff]  ;;  %394 = vst [vmem:[%s3723_s10 + $0x1e0] sm:$0xff] %v393_v60  ;;  %396 = vst [vmem:[%s3723_s10 + $0x1e8] sm:$0xff] %v395_v61  ;;  %v399_v63 = vld [vmem:[%s3718_s23 + $0x3e8] sm:$0xff] }
  0x3e   : > { %398 = vst [vmem:[%s3723_s10 + $0x1f0] sm:$0xff] %v397_v62  ;;  %400 = vst [vmem:[%s3723_s10 + $0x1f8] sm:$0xff] %v399_v63 }
  0x3f PF: > { %p2605_p7 = scmp.ge.s32.totalorder %s3614_s30, 1  ;;  %p432_p8 = scmp.lt.s32.totalorder %s3614_s30, 9 }
  0x41   : > { %p433_p9 = pnand %p2605_p7, %p432_p8 }
  0x42   : > { %s439_s11 = sand.u32 (!%p433_p9), 1, %s3590_s24   ;;  %s2607_s12 = sshll.u32 (!%p433_p9), %s3598_s26, 6 }
  0x43   : > { %436 = sbr.rel (%p433_p9) target bundleno = 854 (0x356), region = 67  ;;  %s2606_s13 = sshll.u32 (!%p433_p9), %s439_s11, 9 }
  0x44   : > { %p488_p10 = scmp.lt.s32.totalorder (!%p433_p9), %s2607_s12, 127  ;;  %s2609_s15 = sshll.u32 (!%p433_p9), %s3602_s27, 5 }
  0x45   : > { %p494_p11 = scmp.lt.s32.totalorder (!%p433_p9), %s2609_s15, 127  ;;  %p2615_p12 = scmp.ne.s32.totalorder (!%p433_p9), %s3598_s26, 0 }
  0x4a   : > { %s4305_s12 = smov (!%p488_p10, %s2607_s12), 127  ;;  %s4307_s15 = smov (!%p494_p11, %s2609_s15), 127 }
  0x4b   : > { %s2608_s16 = sshll.u32 %s4305_s12, 2  ;;  %s2610_s20 = sshll.u32 %s4307_s15, 2  ;;  %v3616_v0 = vmov (!%p2615_p12), 0.0  }
  0x4c   : > { %s3858_s19 = scalar_lea.vmem %s4280_s1, %s2608_s16  ;;  %s2612_s21 = sshll.u32 %s4307_s15, 3  ;;  %516 = vst [vmem:[#allocation2] sm:$0xff] (!%p2615_p12), %v3616_v0  ;;  %517 = vst [vmem:[#allocation2 + $0x8] sm:$0xff] (!%p2615_p12), %v3616_v0 }
  0x4d   : > { %s3863_s10 = scalar_lea.vmem %s4281_s2, %s2610_s20  ;;  %s3868_s27 = scalar_lea.vmem %s4282_s3, %s2612_s21  ;;  %518 = vst [vmem:[#allocation2 + $0x10] sm:$0xff] (!%p2615_p12), %v3616_v0  ;;  %519 = vst [vmem:[#allocation2 + $0x18] sm:$0xff] (!%p2615_p12), %v3616_v0 }
  0x4e   : > { %s3873_s9 = scalar_lea.vmem %s4286_s7, %s2612_s21  ;;  %s3875_s16 = scalar_lea.vmem [#allocation3], %s2606_s13  ;;  %520 = vst [vmem:[#allocation2 + $0x20] sm:$0xff] (!%p2615_p12), %v3616_v0  ;;  %521 = vst [vmem:[#allocation2 + $0x28] sm:$0xff] (!%p2615_p12), %v3616_v0 }
  0x4f   : > { %515 = sbr.rel (%p2615_p12) target bundleno = 92 (0x5c), region = 75  ;;  %522 = vst [vmem:[#allocation2 + $0x30] sm:$0xff] (!%p2615_p12), %v3616_v0  ;;  %523 = vst [vmem:[#allocation2 + $0x38] sm:$0xff] (!%p2615_p12), %v3616_v0 }
  0x50   : > { %524 = vst [vmem:[#allocation2 + $0x40] sm:$0xff] (!%p2615_p12), %v3616_v0  ;;  %525 = vst [vmem:[#allocation2 + $0x48] sm:$0xff] (!%p2615_p12), %v3616_v0 }
  0x51   : > { %526 = vst [vmem:[#allocation2 + $0x50] sm:$0xff] (!%p2615_p12), %v3616_v0  ;;  %527 = vst [vmem:[#allocation2 + $0x58] sm:$0xff] (!%p2615_p12), %v3616_v0 }
  0x52   : > { %528 = vst [vmem:[#allocation2 + $0x60] sm:$0xff] (!%p2615_p12), %v3616_v0  ;;  %529 = vst [vmem:[#allocation2 + $0x68] sm:$0xff] (!%p2615_p12), %v3616_v0 }
  0x53   : > { %530 = vst [vmem:[#allocation2 + $0x70] sm:$0xff] (!%p2615_p12), %v3616_v0  ;;  %531 = vst [vmem:[#allocation2 + $0x78] sm:$0xff] (!%p2615_p12), %v3616_v0 }
  0x54   : > { %532 = vst [vmem:[#allocation2 + $0x80] sm:$0xff] (!%p2615_p12), %v3616_v0  ;;  %533 = vst [vmem:[#allocation2 + $0x88] sm:$0xff] (!%p2615_p12), %v3616_v0 }
  0x55   : > { %534 = vst [vmem:[#allocation2 + $0x90] sm:$0xff] (!%p2615_p12), %v3616_v0  ;;  %535 = vst [vmem:[#allocation2 + $0x98] sm:$0xff] (!%p2615_p12), %v3616_v0 }
  0x56   : > { %536 = vst [vmem:[#allocation2 + $0xa0] sm:$0xff] %v3616_v0  ;;  %537 = vst [vmem:[#allocation2 + $0xa8] sm:$0xff] %v3616_v0 }
  0x57   : > { %538 = vst [vmem:[#allocation2 + $0xb0] sm:$0xff] %v3616_v0  ;;  %539 = vst [vmem:[#allocation2 + $0xb8] sm:$0xff] %v3616_v0 }
  0x58   : > { %540 = vst [vmem:[#allocation2 + $0xc0] sm:$0xff] %v3616_v0  ;;  %541 = vst [vmem:[#allocation2 + $0xc8] sm:$0xff] %v3616_v0 }
  0x59   : > { %542 = vst [vmem:[#allocation2 + $0xd0] sm:$0xff] %v3616_v0  ;;  %543 = vst [vmem:[#allocation2 + $0xd8] sm:$0xff] %v3616_v0 }
  0x5a   : > { %544 = vst [vmem:[#allocation2 + $0xe0] sm:$0xff] %v3616_v0  ;;  %545 = vst [vmem:[#allocation2 + $0xe8] sm:$0xff] %v3616_v0 }
  0x5b   : > { %546 = vst [vmem:[#allocation2 + $0xf0] sm:$0xff] %v3616_v0  ;;  %547 = vst [vmem:[#allocation2 + $0xf8] sm:$0xff] %v3616_v0 }
  0x5c PF: > { %v3430_v1 = vld [vmem:[%s3858_s19 + $0x40] sm:$0xff]   ;;  %v3434_v5 = vld [vmem:[%s3858_s19 + $0x48] sm:$0xff]   ;;  %v3438_v9 = vld [vmem:[%s3858_s19 + $0x50] sm:$0xff]   ;;  %p2712_p13 = scmp.ne.s32.totalorder %s3598_s26, 1 }
  0x5d   : > { %v3431_v2 = vld [vmem:[%s3858_s19 + $0xc0] sm:$0xff]   ;;  %2796 = vmatprep.subr.bf16.mxu0 %v3430_v1  ;;  %v3435_v6 = vld [vmem:[%s3858_s19 + $0xc8] sm:$0xff]   ;;  %v3439_v10 = vld [vmem:[%s3858_s19 + $0xd0] sm:$0xff]  }
  0x5e   : > { %v3432_v3 = vld [vmem:[%s3858_s19] sm:$0xff]   ;;  %2908 = vmatprep.subr.bf16.mxu1 %v3431_v2  ;;  %v3436_v7 = vld [vmem:[%s3858_s19 + $0x8] sm:$0xff]   ;;  %v3440_v11 = vld [vmem:[%s3858_s19 + $0x10] sm:$0xff]  }
  0x5f   : > { %v3433_v4 = vld [vmem:[%s3858_s19 + $0x80] sm:$0xff]   ;;  %2797 = vmatpush3.bf16.msra.mxu0 %v3432_v3  ;;  %v3437_v8 = vld [vmem:[%s3858_s19 + $0x88] sm:$0xff]   ;;  %v3441_v12 = vld [vmem:[%s3858_s19 + $0x90] sm:$0xff]  }
  0x60   : > { %2909 = vmatpush3.bf16.msra.mxu1 %v3433_v4  ;;  %2798 = vmatprep.subr.bf16.mxu0 %v3434_v5  ;;  %v3442_v13 = vld [vmem:[%s3858_s19 + $0x58] sm:$0xff]   ;;  %v3446_v17 = vld [vmem:[%s3858_s19 + $0x60] sm:$0xff]   ;;  %v3450_v21 = vld [vmem:[%s3858_s19 + $0x68] sm:$0xff]  }
  0x61   : > { %2910 = vmatprep.subr.bf16.mxu1 %v3435_v6  ;;  %v3443_v14 = vld [vmem:[%s3858_s19 + $0xd8] sm:$0xff]   ;;  %v3447_v18 = vld [vmem:[%s3858_s19 + $0xe0] sm:$0xff]   ;;  %v3451_v22 = vld [vmem:[%s3858_s19 + $0xe8] sm:$0xff]  }
  0x62   : > { %v3444_v15 = vld [vmem:[%s3858_s19 + $0x18] sm:$0xff]   ;;  %v3448_v19 = vld [vmem:[%s3858_s19 + $0x20] sm:$0xff]   ;;  %v3452_v23 = vld [vmem:[%s3858_s19 + $0x28] sm:$0xff]  }
  0x63   : > { %2799 = vmatpush3.bf16.msra.mxu0 %v3436_v7  ;;  %v3445_v16 = vld [vmem:[%s3858_s19 + $0x98] sm:$0xff]   ;;  %v3449_v20 = vld [vmem:[%s3858_s19 + $0xa0] sm:$0xff]   ;;  %v3453_v24 = vld [vmem:[%s3858_s19 + $0xa8] sm:$0xff]  }
  0x64   : > { %2911 = vmatpush3.bf16.msra.mxu1 %v3437_v8  ;;  %2800 = vmatprep.subr.bf16.mxu0 %v3438_v9  ;;  %v3454_v25 = vld [vmem:[%s3858_s19 + $0x70] sm:$0xff]   ;;  %v3458_v29 = vld [vmem:[%s3858_s19 + $0x78] sm:$0xff]  }
  0x65   : > { %2912 = vmatprep.subr.bf16.mxu1 %v3439_v10  ;;  %v3455_v26 = vld [vmem:[%s3858_s19 + $0xf0] sm:$0xff]   ;;  %v3459_v30 = vld [vmem:[%s3858_s19 + $0xf8] sm:$0xff]  }
  0x66   : > { %v3456_v27 = vld [vmem:[%s3858_s19 + $0x30] sm:$0xff]   ;;  %v3460_v31 = vld [vmem:[%s3858_s19 + $0x38] sm:$0xff]  }
  0x67   : > { %2801 = vmatpush3.bf16.msra.mxu0 %v3440_v11  ;;  %v3457_v28 = vld [vmem:[%s3858_s19 + $0xb0] sm:$0xff]   ;;  %v3461_v32 = vld [vmem:[%s3858_s19 + $0xb8] sm:$0xff]  }
  0x68   : > { %2913 = vmatpush3.bf16.msra.mxu1 %v3441_v12  ;;  %2802 = vmatprep.subr.bf16.mxu0 %v3442_v13  ;;  %v3462_v33 = vld [vmem:[%s3875_s16] ss:$16 sps:$4 sm:$0xff]   ;;  %v3464_v34 = vld [vmem:[%s3875_s16 + $0x4] ss:$16 sps:$4 sm:$0xff]   ;;  %v3465_v35 = vld [vmem:[%s3875_s16 + $0x8] ss:$16 sps:$4 sm:$0xff]  }
  0x69   : > { %2914 = vmatprep.subr.bf16.mxu1 %v3443_v14  ;;  %v3467_v36 = vld [vmem:[%s3875_s16 + $0xc] ss:$16 sps:$4 sm:$0xff]   ;;  %1252 = vmatprep.mubr.bf16.mxu0 %v3464_v34  ;;  %v3468_v37 = vld [vmem:[%s3875_s16 + $0x24] ss:$16 sps:$4 sm:$0xff]   ;;  %v3472_v39 = vld [vmem:[%s3875_s16 + $0x20] ss:$16 sps:$4 sm:$0xff]  }
  0x6a   : > { %1413 = vmatprep.mubr.bf16.mxu1 %v3467_v36  ;;  %v3470_v38 = vld [vmem:[%s3875_s16 + $0x2c] ss:$16 sps:$4 sm:$0xff]   ;;  %v3473_v40 = vld [vmem:[%s3875_s16 + $0x28] ss:$16 sps:$4 sm:$0xff]   ;;  %v3474_v41 = vld [vmem:[%s3875_s16 + $0x44] ss:$16 sps:$4 sm:$0xff]  }
  0x6b   : > { %2803 = vmatpush3.bf16.msra.mxu0 %v3444_v15  ;;  %v3476_v42 = vld [vmem:[%s3875_s16 + $0x4c] ss:$16 sps:$4 sm:$0xff]   ;;  %v3478_v43 = vld [vmem:[%s3875_s16 + $0x40] ss:$16 sps:$4 sm:$0xff]   ;;  %v3479_v44 = vld [vmem:[%s3875_s16 + $0x48] ss:$16 sps:$4 sm:$0xff]  }
  0x6c   : > { %2915 = vmatpush3.bf16.msra.mxu1 %v3445_v16  ;;  %2804 = vmatprep.subr.bf16.mxu0 %v3446_v17  ;;  %v3480_v45 = vld [vmem:[%s3875_s16 + $0x64] ss:$16 sps:$4 sm:$0xff]   ;;  %v3482_v46 = vld [vmem:[%s3875_s16 + $0x6c] ss:$16 sps:$4 sm:$0xff]   ;;  %v3484_v47 = vld [vmem:[%s3875_s16 + $0x60] ss:$16 sps:$4 sm:$0xff]  }
  0x6d   : > { %2916 = vmatprep.subr.bf16.mxu1 %v3447_v18  ;;  %v3485_v48 = vld [vmem:[%s3875_s16 + $0x68] ss:$16 sps:$4 sm:$0xff]   ;;  %v3486_v49 = vld [vmem:[%s3875_s16 + $0x84] ss:$16 sps:$4 sm:$0xff]   ;;  %v3488_v50 = vld [vmem:[%s3875_s16 + $0x8c] ss:$16 sps:$4 sm:$0xff]  }
  0x6e   : > { %v3490_v51 = vld [vmem:[%s3875_s16 + $0x80] ss:$16 sps:$4 sm:$0xff]   ;;  %v3491_v52 = vld [vmem:[%s3875_s16 + $0x88] ss:$16 sps:$4 sm:$0xff]   ;;  %v3492_v53 = vld [vmem:[%s3875_s16 + $0xa4] ss:$16 sps:$4 sm:$0xff]  }
  0x6f   : > { %2805 = vmatpush3.bf16.msra.mxu0 %v3448_v19  ;;  %v3494_v54 = vld [vmem:[%s3875_s16 + $0xac] ss:$16 sps:$4 sm:$0xff]   ;;  %v3496_v55 = vld [vmem:[%s3875_s16 + $0xa0] ss:$16 sps:$4 sm:$0xff]   ;;  %v3497_v56 = vld [vmem:[%s3875_s16 + $0xa8] ss:$16 sps:$4 sm:$0xff]  }
  0x70   : > { %2917 = vmatpush3.bf16.msra.mxu1 %v3449_v20  ;;  %2806 = vmatprep.subr.bf16.mxu0 %v3450_v21  ;;  %v3498_v57 = vld [vmem:[%s3875_s16 + $0xc4] ss:$16 sps:$4 sm:$0xff]   ;;  %v3500_v58 = vld [vmem:[%s3875_s16 + $0xcc] ss:$16 sps:$4 sm:$0xff]   ;;  %v3502_v59 = vld [vmem:[%s3875_s16 + $0xc0] ss:$16 sps:$4 sm:$0xff]  }
  0x71   : > { %2918 = vmatprep.subr.bf16.mxu1 %v3451_v22  ;;  %v3503_v60 = vld [vmem:[%s3875_s16 + $0xc8] ss:$16 sps:$4 sm:$0xff]   ;;  %v3504_v61 = vld [vmem:[%s3875_s16 + $0xe4] ss:$16 sps:$4 sm:$0xff]   ;;  %v3506_v62 = vld [vmem:[%s3875_s16 + $0xec] ss:$16 sps:$4 sm:$0xff]  }
  0x72   : > { %v3508_v63 = vld [vmem:[%s3875_s16 + $0xe0] ss:$16 sps:$4 sm:$0xff]   ;;  %v3509_v0 = vld [vmem:[%s3875_s16 + $0xe8] ss:$16 sps:$4 sm:$0xff]   ;;  %v3510_v1 = vld [vmem:[%s3875_s16 + $0x104] ss:$16 sps:$4 sm:$0xff]  }
  0x73   : > { %2807 = vmatpush3.bf16.msra.mxu0 %v3452_v23  ;;  %v3512_v2 = vld [vmem:[%s3875_s16 + $0x10c] ss:$16 sps:$4 sm:$0xff]   ;;  %v3514_v3 = vld [vmem:[%s3875_s16 + $0x100] ss:$16 sps:$4 sm:$0xff]   ;;  %v3515_v4 = vld [vmem:[%s3875_s16 + $0x108] ss:$16 sps:$4 sm:$0xff]  }
  0x74   : > { %2919 = vmatpush3.bf16.msra.mxu1 %v3453_v24  ;;  %2808 = vmatprep.subr.bf16.mxu0 %v3454_v25  ;;  %v3516_v5 = vld [vmem:[%s3875_s16 + $0x124] ss:$16 sps:$4 sm:$0xff]   ;;  %v3518_v6 = vld [vmem:[%s3875_s16 + $0x12c] ss:$16 sps:$4 sm:$0xff]   ;;  %v3520_v7 = vld [vmem:[%s3875_s16 + $0x120] ss:$16 sps:$4 sm:$0xff]  }
  0x75   : > { %2920 = vmatprep.subr.bf16.mxu1 %v3455_v26  ;;  %v3521_v8 = vld [vmem:[%s3875_s16 + $0x128] ss:$16 sps:$4 sm:$0xff]   ;;  %v3522_v9 = vld [vmem:[%s3875_s16 + $0x144] ss:$16 sps:$4 sm:$0xff]   ;;  %v3524_v10 = vld [vmem:[%s3875_s16 + $0x14c] ss:$16 sps:$4 sm:$0xff]  }
  0x76   : > { %v3526_v11 = vld [vmem:[%s3875_s16 + $0x140] ss:$16 sps:$4 sm:$0xff]   ;;  %v3527_v12 = vld [vmem:[%s3875_s16 + $0x148] ss:$16 sps:$4 sm:$0xff]   ;;  %v3528_v13 = vld [vmem:[%s3875_s16 + $0x164] ss:$16 sps:$4 sm:$0xff]  }
  0x77   : > { %2809 = vmatpush3.bf16.msra.mxu0 %v3456_v27  ;;  %v3530_v14 = vld [vmem:[%s3875_s16 + $0x16c] ss:$16 sps:$4 sm:$0xff]   ;;  %v3532_v15 = vld [vmem:[%s3875_s16 + $0x160] ss:$16 sps:$4 sm:$0xff]   ;;  %v3533_v16 = vld [vmem:[%s3875_s16 + $0x168] ss:$16 sps:$4 sm:$0xff]  }
  0x78   : > { %2921 = vmatpush3.bf16.msra.mxu1 %v3457_v28  ;;  %2810 = vmatprep.subr.bf16.mxu0 %v3458_v29  ;;  %v3534_v17 = vld [vmem:[%s3875_s16 + $0x184] ss:$16 sps:$4 sm:$0xff]   ;;  %v3536_v18 = vld [vmem:[%s3875_s16 + $0x18c] ss:$16 sps:$4 sm:$0xff]   ;;  %v3538_v19 = vld [vmem:[%s3875_s16 + $0x180] ss:$16 sps:$4 sm:$0xff]  }
  0x79   : > { %2922 = vmatprep.subr.bf16.mxu1 %v3459_v30  ;;  %v3539_v20 = vld [vmem:[%s3875_s16 + $0x188] ss:$16 sps:$4 sm:$0xff]   ;;  %v3540_v21 = vld [vmem:[%s3875_s16 + $0x1a4] ss:$16 sps:$4 sm:$0xff]   ;;  %v3542_v22 = vld [vmem:[%s3875_s16 + $0x1ac] ss:$16 sps:$4 sm:$0xff]  }
  0x7a   : > { %v3544_v23 = vld [vmem:[%s3875_s16 + $0x1a0] ss:$16 sps:$4 sm:$0xff]   ;;  %v3545_v24 = vld [vmem:[%s3875_s16 + $0x1a8] ss:$16 sps:$4 sm:$0xff]   ;;  %v3546_v25 = vld [vmem:[%s3875_s16 + $0x1c4] ss:$16 sps:$4 sm:$0xff]  }
  0x7b   : > { %2811 = vmatpush3.bf16.msra.mxu0 %v3460_v31  ;;  %v3548_v26 = vld [vmem:[%s3875_s16 + $0x1cc] ss:$16 sps:$4 sm:$0xff]   ;;  %v3550_v27 = vld [vmem:[%s3875_s16 + $0x1c0] ss:$16 sps:$4 sm:$0xff]   ;;  %v3551_v28 = vld [vmem:[%s3875_s16 + $0x1c8] ss:$16 sps:$4 sm:$0xff]  }
  0x7c   : > { %2923 = vmatpush3.bf16.msra.mxu1 %v3461_v32  ;;  %v3552_v29 = vld [vmem:[%s3875_s16 + $0x1e4] ss:$16 sps:$4 sm:$0xff]   ;;  %v3554_v30 = vld [vmem:[%s3875_s16 + $0x1ec] ss:$16 sps:$4 sm:$0xff]   ;;  %v3556_v31 = vld [vmem:[%s3875_s16 + $0x1e0] ss:$16 sps:$4 sm:$0xff]  }
  0x7d   : > { %v3557_v32 = vld [vmem:[%s3875_s16 + $0x1e8] ss:$16 sps:$4 sm:$0xff]  }
  0x7e   : > { %1253 = vmatmul.mubr.bf16.vlgmr.msra.gmra.mrb[0].mxu0 %v3462_v33 }
  0x7f   : > { %1414 = vmatmul.mubr.bf16.vlgmr.msra.gmra.mrb[0].mxu1 %v3465_v35  ;;  %1260 = vmatprep.mubr.bf16.mxu0 %v3468_v37 }
  0x80   : > { %1421 = vmatprep.mubr.bf16.mxu1 %v3470_v38 }
  0x86   : > { %1261 = vmatmul.mubr.bf16.gmra.mrb[4].mxu0 %v3472_v39 }
  0x87   : > { %1422 = vmatmul.mubr.bf16.gmra.mrb[4].mxu1 %v3473_v40  ;;  %1268 = vmatprep.mubr.bf16.mxu0 %v3474_v41 }
  0x88   : > { %1429 = vmatprep.mubr.bf16.mxu1 %v3476_v42  ;;  %v548_v42 = vld [vmem:[#allocation2] sm:$0xff] }
  0x8e   : > { %1269 = vmatmul.mubr.bf16.gmra.mrb[8].mxu0 %v3478_v43 }
  0x8f   : > { %1430 = vmatmul.mubr.bf16.gmra.mrb[8].mxu1 %v3479_v44  ;;  %1276 = vmatprep.mubr.bf16.mxu0 %v3480_v45 }
  0x90   : > { %1437 = vmatprep.mubr.bf16.mxu1 %v3482_v46 }
  0x96   : > { %1277 = vmatmul.mubr.bf16.gmra.mrb[12].mxu0 %v3484_v47  ;;  %v549_v47 = vld [vmem:[#allocation2 + $0x8] sm:$0xff] }
  0x97   : > { %1438 = vmatmul.mubr.bf16.gmra.mrb[12].mxu1 %v3485_v48  ;;  %1284 = vmatprep.mubr.bf16.mxu0 %v3486_v49 }
  0x98   : > { %1445 = vmatprep.mubr.bf16.mxu1 %v3488_v50 }
  0x9e   : > { %1285 = vmatmul.mubr.bf16.gmra.mrb[16].mxu0 %v3490_v51 }
  0x9f   : > { %1446 = vmatmul.mubr.bf16.gmra.mrb[16].mxu1 %v3491_v52  ;;  %1292 = vmatprep.mubr.bf16.mxu0 %v3492_v53 }
  0xa0   : > { %1453 = vmatprep.mubr.bf16.mxu1 %v3494_v54 }
  0xa6   : > { %1293 = vmatmul.mubr.bf16.gmra.mrb[20].mxu0 %v3496_v55 }
  0xa7   : > { %1454 = vmatmul.mubr.bf16.gmra.mrb[20].mxu1 %v3497_v56  ;;  %1300 = vmatprep.mubr.bf16.mxu0 %v3498_v57 }
  0xa8   : > { %1461 = vmatprep.mubr.bf16.mxu1 %v3500_v58 }
  0xae   : > { %1301 = vmatmul.mubr.bf16.gmra.mrb[24].mxu0 %v3502_v59 }
  0xaf   : > { %1462 = vmatmul.mubr.bf16.gmra.mrb[24].mxu1 %v3503_v60  ;;  %1308 = vmatprep.mubr.bf16.mxu0 %v3504_v61  ;;  %v550_v60 = vld [vmem:[#allocation2 + $0x10] sm:$0xff] }
  0xb0   : > { %1469 = vmatprep.mubr.bf16.mxu1 %v3506_v62 }
  0xb6   : > { %1309 = vmatmul.mubr.bf16.gmra.mrb[28].mxu0 %v3508_v63 }
  0xb7   : > { %1470 = vmatmul.mubr.bf16.gmra.mrb[28].mxu1 %v3509_v0  ;;  %1316 = vmatprep.mubr.bf16.mxu0 %v3510_v1  ;;  %v551_v1 = vld [vmem:[#allocation2 + $0x18] sm:$0xff] }
  0xb8   : > { %1477 = vmatprep.mubr.bf16.mxu1 %v3512_v2 }
  0xbe   : > { %1317 = vmatmul.mubr.bf16.gmra.mrb[32].mxu0 %v3514_v3 }
  0xbf   : > { %1478 = vmatmul.mubr.bf16.gmra.mrb[32].mxu1 %v3515_v4  ;;  %1324 = vmatprep.mubr.bf16.mxu0 %v3516_v5 }
  0xc0   : > { %1485 = vmatprep.mubr.bf16.mxu1 %v3518_v6 }
  0xc6   : > { %1325 = vmatmul.mubr.bf16.gmra.mrb[36].mxu0 %v3520_v7 }
  0xc7   : > { %1486 = vmatmul.mubr.bf16.gmra.mrb[36].mxu1 %v3521_v8  ;;  %1332 = vmatprep.mubr.bf16.mxu0 %v3522_v9 }
  0xc8   : > { %1493 = vmatprep.mubr.bf16.mxu1 %v3524_v10 }
  0xce   : > { %1333 = vmatmul.mubr.bf16.gmra.mrb[40].mxu0 %v3526_v11 }
  0xcf   : > { %1494 = vmatmul.mubr.bf16.gmra.mrb[40].mxu1 %v3527_v12  ;;  %1340 = vmatprep.mubr.bf16.mxu0 %v3528_v13 }
  0xd0   : > { %1501 = vmatprep.mubr.bf16.mxu1 %v3530_v14  ;;  %v552_v14 = vld [vmem:[#allocation2 + $0x20] sm:$0xff] }
  0xd6   : > { %1341 = vmatmul.mubr.bf16.gmra.mrb[44].mxu0 %v3532_v15 }
  0xd7   : > { %1502 = vmatmul.mubr.bf16.gmra.mrb[44].mxu1 %v3533_v16  ;;  %1348 = vmatprep.mubr.bf16.mxu0 %v3534_v17 }
  0xd8   : > { %1509 = vmatprep.mubr.bf16.mxu1 %v3536_v18 }
  0xde   : > { %1349 = vmatmul.mubr.bf16.gmra.mrb[48].mxu0 %v3538_v19  ;;  %v553_v19 = vld [vmem:[#allocation2 + $0x28] sm:$0xff] }
  0xdf   : > { %1510 = vmatmul.mubr.bf16.gmra.mrb[48].mxu1 %v3539_v20  ;;  %1356 = vmatprep.mubr.bf16.mxu0 %v3540_v21 }
  0xe0   : > { %1517 = vmatprep.mubr.bf16.mxu1 %v3542_v22 }
  0xe6   : > { %1357 = vmatmul.mubr.bf16.gmra.mrb[52].mxu0 %v3544_v23 }
  0xe7   : > { %1518 = vmatmul.mubr.bf16.gmra.mrb[52].mxu1 %v3545_v24  ;;  %1364 = vmatprep.mubr.bf16.mxu0 %v3546_v25 }
  0xe8   : > { %1525 = vmatprep.mubr.bf16.mxu1 %v3548_v26 }
  0xee   : > { %1365 = vmatmul.mubr.bf16.gmra.mrb[56].mxu0 %v3550_v27 }
  0xef   : > { %1526 = vmatmul.mubr.bf16.gmra.mrb[56].mxu1 %v3551_v28  ;;  %1372 = vmatprep.mubr.bf16.mxu0 %v3552_v29 }
  0xf0   : > { %1533 = vmatprep.mubr.bf16.mxu1 %v3554_v30 }
  0xf6   : > { %1373 = vmatmul.mubr.bf16.gmra.mrb[60].mxu0 %v3556_v31 }
  0xf7   : > { %1534 = vmatmul.mubr.bf16.gmra.mrb[60].mxu1 %v3557_v32  ;;  %v554_v32 = vld [vmem:[#allocation2 + $0x30] sm:$0xff] }
 0x151   : > { %v2812_v33 = vpop.f32.mrb[0].mxu0 }
 0x152   : > { %v2924_v34 = vpop.f32.mrb[0].mxu1  ;;  %v2813_v35 = vpop.f32.mrb[1].mxu0 }
 0x153   : > { %v2814_v36 = vadd.f32 %v2813_v35, %v2812_v33  ;;  %v2925_v37 = vpop.f32.mrb[1].mxu1  ;;  %v2815_v38 = vpop.f32.mrb[2].mxu0 }
 0x154   : > { %v2926_v39 = vadd.f32 %v2925_v37, %v2924_v34  ;;  %v2927_v40 = vpop.f32.mrb[2].mxu1  ;;  %v2816_v41 = vpop.f32.mrb[3].mxu0  ;;  %v555_v37 = vld [vmem:[#allocation2 + $0x38] sm:$0xff] }
 0x155   : > { %v2817_v43 = vadd.f32 %v2816_v41, %v2815_v38  ;;  %v2928_v44 = vpop.f32.mrb[3].mxu1 }
 0x156   : > { %v1416_v45 = vadd.f32 %v2926_v39, %v2814_v36  ;;  %v2929_v46 = vadd.f32 %v2928_v44, %v2927_v40 }
 0x158   : > { %v1542_v48 = vadd.f32 %v1416_v45, %v548_v42  ;;  %v1419_v49 = vadd.f32 %v2929_v46, %v2817_v43 }
 0x159   : > { %v2818_v50 = vpop.f32.mrb[4].mxu0 }
 0x15a   : > { %1574 = vst [vmem:[#allocation2] sm:$0xff] %v1542_v48  ;;  %v1543_v51 = vadd.f32 %v1419_v49, %v549_v47  ;;  %v2930_v52 = vpop.f32.mrb[4].mxu1  ;;  %v2819_v53 = vpop.f32.mrb[5].mxu0 }
 0x15b   : > { %v2820_v54 = vadd.f32 %v2819_v53, %v2818_v50  ;;  %v2931_v55 = vpop.f32.mrb[5].mxu1  ;;  %v2821_v56 = vpop.f32.mrb[6].mxu0  ;;  %v556_v50 = vld [vmem:[#allocation2 + $0x40] sm:$0xff] }
 0x15c   : > { %1575 = vst [vmem:[#allocation2 + $0x8] sm:$0xff] %v1543_v51  ;;  %v2932_v57 = vadd.f32 %v2931_v55, %v2930_v52  ;;  %v2933_v58 = vpop.f32.mrb[6].mxu1  ;;  %v2822_v59 = vpop.f32.mrb[7].mxu0  ;;  %v557_v55 = vld [vmem:[#allocation2 + $0x48] sm:$0xff] }
 0x15d   : > { %v2823_v61 = vadd.f32 %v2822_v59, %v2821_v56  ;;  %v2934_v62 = vpop.f32.mrb[7].mxu1 }
 0x15e   : > { %v1424_v63 = vadd.f32 %v2932_v57, %v2820_v54  ;;  %v2935_v0 = vadd.f32 %v2934_v62, %v2933_v58 }
 0x160   : > { %v1544_v2 = vadd.f32 %v1424_v63, %v550_v60  ;;  %v1427_v3 = vadd.f32 %v2935_v0, %v2823_v61 }
 0x161   : > { %v2824_v4 = vpop.f32.mrb[8].mxu0 }
 0x162   : > { %1576 = vst [vmem:[#allocation2 + $0x10] sm:$0xff] %v1544_v2  ;;  %v1545_v5 = vadd.f32 %v1427_v3, %v551_v1  ;;  %v2936_v6 = vpop.f32.mrb[8].mxu1  ;;  %v2825_v7 = vpop.f32.mrb[9].mxu0 }
 0x163   : > { %v2826_v8 = vadd.f32 %v2825_v7, %v2824_v4  ;;  %v2937_v9 = vpop.f32.mrb[9].mxu1  ;;  %v2827_v10 = vpop.f32.mrb[10].mxu0  ;;  %v558_v4 = vld [vmem:[#allocation2 + $0x50] sm:$0xff] }
 0x164   : > { %1577 = vst [vmem:[#allocation2 + $0x18] sm:$0xff] %v1545_v5  ;;  %v2938_v11 = vadd.f32 %v2937_v9, %v2936_v6  ;;  %v2939_v12 = vpop.f32.mrb[10].mxu1  ;;  %v2828_v13 = vpop.f32.mrb[11].mxu0  ;;  %v559_v9 = vld [vmem:[#allocation2 + $0x58] sm:$0xff] }
 0x165   : > { %v2829_v15 = vadd.f32 %v2828_v13, %v2827_v10  ;;  %v2940_v16 = vpop.f32.mrb[11].mxu1 }
 0x166   : > { %v1432_v17 = vadd.f32 %v2938_v11, %v2826_v8  ;;  %v2941_v18 = vadd.f32 %v2940_v16, %v2939_v12 }
 0x168   : > { %v1546_v20 = vadd.f32 %v1432_v17, %v552_v14  ;;  %v1435_v21 = vadd.f32 %v2941_v18, %v2829_v15 }
 0x169   : > { %v2830_v22 = vpop.f32.mrb[12].mxu0 }
 0x16a   : > { %1578 = vst [vmem:[#allocation2 + $0x20] sm:$0xff] %v1546_v20  ;;  %v1547_v23 = vadd.f32 %v1435_v21, %v553_v19  ;;  %v2942_v24 = vpop.f32.mrb[12].mxu1  ;;  %v2831_v25 = vpop.f32.mrb[13].mxu0 }
 0x16b   : > { %v2832_v26 = vadd.f32 %v2831_v25, %v2830_v22  ;;  %v2943_v27 = vpop.f32.mrb[13].mxu1  ;;  %v2833_v28 = vpop.f32.mrb[14].mxu0  ;;  %v560_v22 = vld [vmem:[#allocation2 + $0x60] sm:$0xff] }
 0x16c   : > { %1579 = vst [vmem:[#allocation2 + $0x28] sm:$0xff] %v1547_v23  ;;  %v2944_v29 = vadd.f32 %v2943_v27, %v2942_v24  ;;  %v2945_v30 = vpop.f32.mrb[14].mxu1  ;;  %v2834_v31 = vpop.f32.mrb[15].mxu0  ;;  %v561_v27 = vld [vmem:[#allocation2 + $0x68] sm:$0xff] }
 0x16d   : > { %v2835_v33 = vadd.f32 %v2834_v31, %v2833_v28  ;;  %v2946_v34 = vpop.f32.mrb[15].mxu1 }
 0x16e   : > { %v1440_v35 = vadd.f32 %v2944_v29, %v2832_v26  ;;  %v2947_v36 = vadd.f32 %v2946_v34, %v2945_v30 }
 0x170   : > { %v1548_v38 = vadd.f32 %v1440_v35, %v554_v32  ;;  %v1443_v39 = vadd.f32 %v2947_v36, %v2835_v33 }
 0x171   : > { %v2836_v40 = vpop.f32.mrb[16].mxu0 }
 0x172   : > { %1580 = vst [vmem:[#allocation2 + $0x30] sm:$0xff] %v1548_v38  ;;  %v1549_v41 = vadd.f32 %v1443_v39, %v555_v37  ;;  %v2948_v42 = vpop.f32.mrb[16].mxu1  ;;  %v2837_v43 = vpop.f32.mrb[17].mxu0 }
 0x173   : > { %v2838_v44 = vadd.f32 %v2837_v43, %v2836_v40  ;;  %v2949_v45 = vpop.f32.mrb[17].mxu1  ;;  %v2839_v46 = vpop.f32.mrb[18].mxu0  ;;  %v562_v40 = vld [vmem:[#allocation2 + $0x70] sm:$0xff] }
 0x174   : > { %1581 = vst [vmem:[#allocation2 + $0x38] sm:$0xff] %v1549_v41  ;;  %v2950_v47 = vadd.f32 %v2949_v45, %v2948_v42  ;;  %v2951_v48 = vpop.f32.mrb[18].mxu1  ;;  %v2840_v49 = vpop.f32.mrb[19].mxu0  ;;  %v563_v45 = vld [vmem:[#allocation2 + $0x78] sm:$0xff] }
 0x175   : > { %v2841_v51 = vadd.f32 %v2840_v49, %v2839_v46  ;;  %v2952_v52 = vpop.f32.mrb[19].mxu1 }
 0x176   : > { %v1448_v53 = vadd.f32 %v2950_v47, %v2838_v44  ;;  %v2953_v54 = vadd.f32 %v2952_v52, %v2951_v48 }
 0x178   : > { %v1550_v56 = vadd.f32 %v1448_v53, %v556_v50  ;;  %v1451_v57 = vadd.f32 %v2953_v54, %v2841_v51 }
 0x179   : > { %v2842_v58 = vpop.f32.mrb[20].mxu0 }
 0x17a   : > { %1582 = vst [vmem:[#allocation2 + $0x40] sm:$0xff] %v1550_v56  ;;  %v1551_v59 = vadd.f32 %v1451_v57, %v557_v55  ;;  %v2954_v60 = vpop.f32.mrb[20].mxu1  ;;  %v2843_v61 = vpop.f32.mrb[21].mxu0 }
 0x17b   : > { %v2844_v62 = vadd.f32 %v2843_v61, %v2842_v58  ;;  %v2955_v63 = vpop.f32.mrb[21].mxu1  ;;  %v2845_v0 = vpop.f32.mrb[22].mxu0  ;;  %v564_v58 = vld [vmem:[#allocation2 + $0x80] sm:$0xff] }
 0x17c   : > { %1583 = vst [vmem:[#allocation2 + $0x48] sm:$0xff] %v1551_v59  ;;  %v2956_v1 = vadd.f32 %v2955_v63, %v2954_v60  ;;  %v2957_v2 = vpop.f32.mrb[22].mxu1  ;;  %v2846_v3 = vpop.f32.mrb[23].mxu0  ;;  %v565_v63 = vld [vmem:[#allocation2 + $0x88] sm:$0xff] }
 0x17d   : > { %v2847_v5 = vadd.f32 %v2846_v3, %v2845_v0  ;;  %v2958_v6 = vpop.f32.mrb[23].mxu1 }
 0x17e   : > { %v1456_v7 = vadd.f32 %v2956_v1, %v2844_v62  ;;  %v2959_v8 = vadd.f32 %v2958_v6, %v2957_v2 }
 0x180   : > { %v1552_v10 = vadd.f32 %v1456_v7, %v558_v4  ;;  %v1459_v11 = vadd.f32 %v2959_v8, %v2847_v5 }
 0x181   : > { %v2848_v12 = vpop.f32.mrb[24].mxu0 }
 0x182   : > { %1584 = vst [vmem:[#allocation2 + $0x50] sm:$0xff] %v1552_v10  ;;  %v1553_v13 = vadd.f32 %v1459_v11, %v559_v9  ;;  %v2960_v14 = vpop.f32.mrb[24].mxu1  ;;  %v2849_v15 = vpop.f32.mrb[25].mxu0 }
 0x183   : > { %v2850_v16 = vadd.f32 %v2849_v15, %v2848_v12  ;;  %v2961_v17 = vpop.f32.mrb[25].mxu1  ;;  %v2851_v18 = vpop.f32.mrb[26].mxu0  ;;  %v566_v12 = vld [vmem:[#allocation2 + $0x90] sm:$0xff] }
 0x184   : > { %1585 = vst [vmem:[#allocation2 + $0x58] sm:$0xff] %v1553_v13  ;;  %v2962_v19 = vadd.f32 %v2961_v17, %v2960_v14  ;;  %v2963_v20 = vpop.f32.mrb[26].mxu1  ;;  %v2852_v21 = vpop.f32.mrb[27].mxu0  ;;  %v567_v17 = vld [vmem:[#allocation2 + $0x98] sm:$0xff] }
 0x185   : > { %v2853_v23 = vadd.f32 %v2852_v21, %v2851_v18  ;;  %v2964_v24 = vpop.f32.mrb[27].mxu1 }
 0x186   : > { %v1464_v25 = vadd.f32 %v2962_v19, %v2850_v16  ;;  %v2965_v26 = vadd.f32 %v2964_v24, %v2963_v20 }
 0x188   : > { %v1554_v28 = vadd.f32 %v1464_v25, %v560_v22  ;;  %v1467_v29 = vadd.f32 %v2965_v26, %v2853_v23 }
 0x189   : > { %v2854_v30 = vpop.f32.mrb[28].mxu0 }
 0x18a   : > { %1586 = vst [vmem:[#allocation2 + $0x60] sm:$0xff] %v1554_v28  ;;  %v1555_v31 = vadd.f32 %v1467_v29, %v561_v27  ;;  %v2966_v32 = vpop.f32.mrb[28].mxu1  ;;  %v2855_v33 = vpop.f32.mrb[29].mxu0 }
 0x18b   : > { %v2856_v34 = vadd.f32 %v2855_v33, %v2854_v30  ;;  %v2967_v35 = vpop.f32.mrb[29].mxu1  ;;  %v2857_v36 = vpop.f32.mrb[30].mxu0  ;;  %v568_v30 = vld [vmem:[#allocation2 + $0xa0] sm:$0xff] }
 0x18c   : > { %1587 = vst [vmem:[#allocation2 + $0x68] sm:$0xff] %v1555_v31  ;;  %v2968_v37 = vadd.f32 %v2967_v35, %v2966_v32  ;;  %v2969_v38 = vpop.f32.mrb[30].mxu1  ;;  %v2858_v39 = vpop.f32.mrb[31].mxu0  ;;  %v569_v35 = vld [vmem:[#allocation2 + $0xa8] sm:$0xff] }
 0x18d   : > { %v2859_v41 = vadd.f32 %v2858_v39, %v2857_v36  ;;  %v2970_v42 = vpop.f32.mrb[31].mxu1 }
 0x18e   : > { %v1472_v43 = vadd.f32 %v2968_v37, %v2856_v34  ;;  %v2971_v44 = vadd.f32 %v2970_v42, %v2969_v38 }
 0x190   : > { %v1556_v46 = vadd.f32 %v1472_v43, %v562_v40  ;;  %v1475_v47 = vadd.f32 %v2971_v44, %v2859_v41 }
 0x191   : > { %v2860_v48 = vpop.f32.mrb[32].mxu0 }
 0x192   : > { %1588 = vst [vmem:[#allocation2 + $0x70] sm:$0xff] %v1556_v46  ;;  %v1557_v49 = vadd.f32 %v1475_v47, %v563_v45  ;;  %v2972_v50 = vpop.f32.mrb[32].mxu1  ;;  %v2861_v51 = vpop.f32.mrb[33].mxu0 }
 0x193   : > { %v2862_v52 = vadd.f32 %v2861_v51, %v2860_v48  ;;  %v2973_v53 = vpop.f32.mrb[33].mxu1  ;;  %v2863_v54 = vpop.f32.mrb[34].mxu0  ;;  %v570_v48 = vld [vmem:[#allocation2 + $0xb0] sm:$0xff] }
 0x194   : > { %1589 = vst [vmem:[#allocation2 + $0x78] sm:$0xff] %v1557_v49  ;;  %v2974_v55 = vadd.f32 %v2973_v53, %v2972_v50  ;;  %v2975_v56 = vpop.f32.mrb[34].mxu1  ;;  %v2864_v57 = vpop.f32.mrb[35].mxu0  ;;  %v571_v53 = vld [vmem:[#allocation2 + $0xb8] sm:$0xff] }
 0x195   : > { %v2865_v59 = vadd.f32 %v2864_v57, %v2863_v54  ;;  %v2976_v60 = vpop.f32.mrb[35].mxu1 }
 0x196   : > { %v1480_v61 = vadd.f32 %v2974_v55, %v2862_v52  ;;  %v2977_v62 = vadd.f32 %v2976_v60, %v2975_v56 }
 0x198   : > { %v1558_v0 = vadd.f32 %v1480_v61, %v564_v58  ;;  %v1483_v1 = vadd.f32 %v2977_v62, %v2865_v59 }
 0x199   : > { %v2866_v2 = vpop.f32.mrb[36].mxu0 }
 0x19a   : > { %1590 = vst [vmem:[#allocation2 + $0x80] sm:$0xff] %v1558_v0  ;;  %v1559_v3 = vadd.f32 %v1483_v1, %v565_v63  ;;  %v2978_v4 = vpop.f32.mrb[36].mxu1  ;;  %v2867_v5 = vpop.f32.mrb[37].mxu0 }
 0x19b   : > { %v2868_v6 = vadd.f32 %v2867_v5, %v2866_v2  ;;  %v2979_v7 = vpop.f32.mrb[37].mxu1  ;;  %v2869_v8 = vpop.f32.mrb[38].mxu0  ;;  %v572_v2 = vld [vmem:[#allocation2 + $0xc0] sm:$0xff] }
 0x19c   : > { %1591 = vst [vmem:[#allocation2 + $0x88] sm:$0xff] %v1559_v3  ;;  %v2980_v9 = vadd.f32 %v2979_v7, %v2978_v4  ;;  %v2981_v10 = vpop.f32.mrb[38].mxu1  ;;  %v2870_v11 = vpop.f32.mrb[39].mxu0  ;;  %v573_v7 = vld [vmem:[#allocation2 + $0xc8] sm:$0xff] }
 0x19d   : > { %v2871_v13 = vadd.f32 %v2870_v11, %v2869_v8  ;;  %v2982_v14 = vpop.f32.mrb[39].mxu1 }
 0x19e   : > { %v1488_v15 = vadd.f32 %v2980_v9, %v2868_v6  ;;  %v2983_v16 = vadd.f32 %v2982_v14, %v2981_v10 }
 0x1a0   : > { %v1560_v18 = vadd.f32 %v1488_v15, %v566_v12  ;;  %v1491_v19 = vadd.f32 %v2983_v16, %v2871_v13 }
 0x1a1   : > { %v2872_v20 = vpop.f32.mrb[40].mxu0 }
 0x1a2   : > { %1592 = vst [vmem:[#allocation2 + $0x90] sm:$0xff] %v1560_v18  ;;  %v1561_v21 = vadd.f32 %v1491_v19, %v567_v17  ;;  %v2984_v22 = vpop.f32.mrb[40].mxu1  ;;  %v2873_v23 = vpop.f32.mrb[41].mxu0 }
 0x1a3   : > { %v2874_v24 = vadd.f32 %v2873_v23, %v2872_v20  ;;  %v2985_v25 = vpop.f32.mrb[41].mxu1  ;;  %v2875_v26 = vpop.f32.mrb[42].mxu0  ;;  %v574_v20 = vld [vmem:[#allocation2 + $0xd0] sm:$0xff] }
 0x1a4   : > { %1593 = vst [vmem:[#allocation2 + $0x98] sm:$0xff] %v1561_v21  ;;  %v2986_v27 = vadd.f32 %v2985_v25, %v2984_v22  ;;  %v2987_v28 = vpop.f32.mrb[42].mxu1  ;;  %v2876_v29 = vpop.f32.mrb[43].mxu0  ;;  %v575_v25 = vld [vmem:[#allocation2 + $0xd8] sm:$0xff] }
 0x1a5   : > { %v2877_v31 = vadd.f32 %v2876_v29, %v2875_v26  ;;  %v2988_v32 = vpop.f32.mrb[43].mxu1 }
 0x1a6   : > { %v1496_v33 = vadd.f32 %v2986_v27, %v2874_v24  ;;  %v2989_v34 = vadd.f32 %v2988_v32, %v2987_v28 }
 0x1a8   : > { %v1562_v36 = vadd.f32 %v1496_v33, %v568_v30  ;;  %v1499_v37 = vadd.f32 %v2989_v34, %v2877_v31 }
 0x1a9   : > { %v2878_v38 = vpop.f32.mrb[44].mxu0 }
 0x1aa   : > { %1594 = vst [vmem:[#allocation2 + $0xa0] sm:$0xff] %v1562_v36  ;;  %v1563_v39 = vadd.f32 %v1499_v37, %v569_v35  ;;  %v2990_v40 = vpop.f32.mrb[44].mxu1  ;;  %v2879_v41 = vpop.f32.mrb[45].mxu0 }
 0x1ab   : > { %v2880_v42 = vadd.f32 %v2879_v41, %v2878_v38  ;;  %v2991_v43 = vpop.f32.mrb[45].mxu1  ;;  %v2881_v44 = vpop.f32.mrb[46].mxu0  ;;  %v576_v38 = vld [vmem:[#allocation2 + $0xe0] sm:$0xff] }
 0x1ac   : > { %1595 = vst [vmem:[#allocation2 + $0xa8] sm:$0xff] %v1563_v39  ;;  %v2992_v45 = vadd.f32 %v2991_v43, %v2990_v40  ;;  %v2993_v46 = vpop.f32.mrb[46].mxu1  ;;  %v2882_v47 = vpop.f32.mrb[47].mxu0  ;;  %v577_v43 = vld [vmem:[#allocation2 + $0xe8] sm:$0xff] }
 0x1ad   : > { %v2883_v49 = vadd.f32 %v2882_v47, %v2881_v44  ;;  %v2994_v50 = vpop.f32.mrb[47].mxu1 }
 0x1ae   : > { %v1504_v51 = vadd.f32 %v2992_v45, %v2880_v42  ;;  %v2995_v52 = vadd.f32 %v2994_v50, %v2993_v46 }
 0x1b0   : > { %v1564_v54 = vadd.f32 %v1504_v51, %v570_v48  ;;  %v1507_v55 = vadd.f32 %v2995_v52, %v2883_v49 }
 0x1b1   : > { %v2884_v56 = vpop.f32.mrb[48].mxu0 }
 0x1b2   : > { %1596 = vst [vmem:[#allocation2 + $0xb0] sm:$0xff] %v1564_v54  ;;  %v1565_v57 = vadd.f32 %v1507_v55, %v571_v53  ;;  %v2996_v58 = vpop.f32.mrb[48].mxu1  ;;  %v2885_v59 = vpop.f32.mrb[49].mxu0 }
 0x1b3   : > { %v2886_v60 = vadd.f32 %v2885_v59, %v2884_v56  ;;  %v2997_v61 = vpop.f32.mrb[49].mxu1  ;;  %v2887_v62 = vpop.f32.mrb[50].mxu0  ;;  %v578_v56 = vld [vmem:[#allocation2 + $0xf0] sm:$0xff] }
 0x1b4   : > { %1597 = vst [vmem:[#allocation2 + $0xb8] sm:$0xff] %v1565_v57  ;;  %v2998_v63 = vadd.f32 %v2997_v61, %v2996_v58  ;;  %v2999_v0 = vpop.f32.mrb[50].mxu1  ;;  %v2888_v1 = vpop.f32.mrb[51].mxu0  ;;  %v579_v61 = vld [vmem:[#allocation2 + $0xf8] sm:$0xff] }
 0x1b5   : > { %v2889_v3 = vadd.f32 %v2888_v1, %v2887_v62  ;;  %v3000_v4 = vpop.f32.mrb[51].mxu1  ;;  %v1644_v1 = vld [vmem:[%s3868_s27 + $0x10] sm:$0xff] (!%p2712_p13) }
 0x1b6   : > { %v1512_v5 = vadd.f32 %v2998_v63, %v2886_v60  ;;  %v3001_v6 = vadd.f32 %v3000_v4, %v2999_v0  ;;  %v1645_v4 = vld [vmem:[%s3868_s27 + $0x18] sm:$0xff] (!%p2712_p13) }
 0x1b8   : > { %v1566_v8 = vadd.f32 %v1512_v5, %v572_v2  ;;  %v1515_v9 = vadd.f32 %v3001_v6, %v2889_v3  ;;  %v1642_v2 = vld [vmem:[%s3868_s27] sm:$0xff] (!%p2712_p13)  ;;  %v3617_v3 = vmov (!%p2712_p13), 0   ;;  %v1643_v5 = vld [vmem:[%s3868_s27 + $0x8] sm:$0xff] (!%p2712_p13) }
 0x1b9   : > { %v2890_v10 = vpop.f32.mrb[52].mxu0  ;;  %3559 = vset.pattern.permute.xlu1 (!%p2712_p13), %v3617_v3  ;;  %3558 = vset.pattern.permute.xlu0 (!%p2712_p13), %v3617_v3  ;;  %v1647_v6 = vld [vmem:[%s3868_s27 + $0x28] sm:$0xff] (!%p2712_p13)  ;;  %v1881_v3 = vld [vmem:[%s4283_s4 + $0x78] sm:$0xff] (!%p2712_p13) }
 0x1ba   : > { %1598 = vst [vmem:[#allocation2 + $0xc0] sm:$0xff] %v1566_v8  ;;  %v1567_v11 = vadd.f32 %v1515_v9, %v573_v7  ;;  %v3002_v12 = vpop.f32.mrb[52].mxu1  ;;  %v2891_v13 = vpop.f32.mrb[53].mxu0  ;;  %1686 = vperm.xlu1 (!%p2712_p13), %3559, %v1644_v1   ;;  %1676 = vperm.xlu0 (!%p2712_p13), %3558, %v1642_v2   ;;  %v1646_v7 = vld [vmem:[%s3868_s27 + $0x20] sm:$0xff] (!%p2712_p13)  ;;  %v1649_v8 = vld [vmem:[%s3868_s27 + $0x38] sm:$0xff] (!%p2712_p13)  ;;  %v1648_v9 = vld [vmem:[%s3868_s27 + $0x30] sm:$0xff] (!%p2712_p13) }
 0x1bb   : > { %v2892_v14 = vadd.f32 %v2891_v13, %v2890_v10  ;;  %v3003_v15 = vpop.f32.mrb[53].mxu1  ;;  %v2893_v16 = vpop.f32.mrb[54].mxu0  ;;  %v1946_v10 = vld [vmem:[%s4284_s5] sm:$0xff] (!%p2712_p13)  ;;  %v1867_v13 = vld [vmem:[%s4283_s4 + $0x8] sm:$0xff] (!%p2712_p13)  ;;  %v1961_v1 = vld [vmem:[%s4284_s5 + $0x78] sm:$0xff] (!%p2712_p13) }
 0x1bc   : > { %1599 = vst [vmem:[#allocation2 + $0xc8] sm:$0xff] %v1567_v11  ;;  %v3004_v17 = vadd.f32 %v3003_v15, %v3002_v12  ;;  %v3005_v18 = vpop.f32.mrb[54].mxu1  ;;  %v2894_v19 = vpop.f32.mrb[55].mxu0  ;;  %v1947_v11 = vld [vmem:[%s4284_s5 + $0x8] sm:$0xff] (!%p2712_p13)  ;;  %v1866_v12 = vld [vmem:[%s4283_s4] sm:$0xff] (!%p2712_p13)  ;;  %v1880_v2 = vld [vmem:[%s4283_s4 + $0x70] sm:$0xff] (!%p2712_p13) }
 0x1bd   : > { %v2895_v21 = vadd.f32 %v2894_v19, %v2893_v16  ;;  %v3006_v22 = vpop.f32.mrb[55].mxu1  ;;  %v3308_v15 = vpack.c.bf16 (!%p2712_p13), %v1867_v13, %v1866_v12  ;;  %v1948_v16 = vld [vmem:[%s4284_s5 + $0x10] sm:$0xff] (!%p2712_p13) }
 0x1be   : > { %v1520_v23 = vadd.f32 %v3004_v17, %v2892_v14  ;;  %v3007_v24 = vadd.f32 %v3006_v22, %v3005_v18  ;;  %1691 = vperm.xlu1 (!%p2712_p13), %3559, %v1645_v4   ;;  %1681 = vperm.xlu0 (!%p2712_p13), %3558, %v1643_v5   ;;  %v3276_v14 = vpack.c.bf16 (!%p2712_p13), %v1947_v11, %v1946_v10  ;;  %v1949_v17 = vld [vmem:[%s4284_s5 + $0x18] sm:$0xff] (!%p2712_p13)  ;;  %v1868_v18 = vld [vmem:[%s4283_s4 + $0x10] sm:$0xff] (!%p2712_p13)  ;;  %v2781_v10 = vld [vmem:[%s3863_s10 + $0x8] sm:$0xff] (!%p2712_p13)  }
 0x1bf   : > { %v3280_v19 = vpack.c.bf16 (!%p2712_p13), %v1949_v17, %v1948_v16  ;;  %3309 = vmatprep.subr.bf16.mxu0 (!%p2712_p13), %v3308_v15  ;;  %v1661_v4 = vld [vmem:[%s3868_s27 + $0x98] sm:$0xff] (!%p2712_p13)  ;;  %v1660_v5 = vld [vmem:[%s3868_s27 + $0x90] sm:$0xff] (!%p2712_p13)  ;;  %v1667_v16 = vld [vmem:[%s3868_s27 + $0xc8] sm:$0xff] (!%p2712_p13) }
 0x1c0   : > { %v1568_v26 = vadd.f32 %v1520_v23, %v574_v20  ;;  %v1523_v27 = vadd.f32 %v3007_v24, %v2895_v21  ;;  %v1869_v20 = vld [vmem:[%s4283_s4 + $0x18] sm:$0xff] (!%p2712_p13)  ;;  %v1950_v21 = vld [vmem:[%s4284_s5 + $0x20] sm:$0xff] (!%p2712_p13)  ;;  %v1951_v23 = vld [vmem:[%s4284_s5 + $0x28] sm:$0xff] (!%p2712_p13)  ;;  %3277 = vmatprep.subr.bf16.mxu1 (!%p2712_p13), %v3276_v14  ;;  %3311 = vmatpush3.bf16.msra.mxu0 (!%p2712_p13), %v3308_v15 }
 0x1c1   : > { %v2896_v28 = vpop.f32.mrb[56].mxu0  ;;  %v3312_v22 = vpack.c.bf16 (!%p2712_p13), %v1869_v20, %v1868_v18  ;;  %v1870_v24 = vld [vmem:[%s4283_s4 + $0x20] sm:$0xff] (!%p2712_p13)  ;;  %3279 = vmatpush3.bf16.msra.mxu1 (!%p2712_p13), %v3276_v14  ;;  %v1665_v11 = vld [vmem:[%s3868_s27 + $0xb8] sm:$0xff] (!%p2712_p13)  ;;  %v1664_v12 = vld [vmem:[%s3868_s27 + $0xb0] sm:$0xff] (!%p2712_p13)  ;;  %v2723_v14 = vunpack.c.l.bf16 (!%p2712_p13), %v2781_v10  ;;  %v2724_v18 = vunpack.c.h.bf16 (!%p2712_p13), %v2781_v10 }
 0x1c2   : > { %1600 = vst [vmem:[#allocation2 + $0xd0] sm:$0xff] %v1568_v26  ;;  %v1569_v29 = vadd.f32 %v1523_v27, %v575_v25  ;;  %v3008_v30 = vpop.f32.mrb[56].mxu1  ;;  %v2897_v31 = vpop.f32.mrb[57].mxu0  ;;  %1701 = vperm.xlu1 (!%p2712_p13), %3559, %v1647_v6   ;;  %1696 = vperm.xlu0 (!%p2712_p13), %3558, %v1646_v7   ;;  %v1871_v25 = vld [vmem:[%s4283_s4 + $0x28] sm:$0xff] (!%p2712_p13)  ;;  %v1650_v27 = vld [vmem:[%s3868_s27 + $0x40] sm:$0xff] (!%p2712_p13)  ;;  %v3336_v7 = vpack.c.bf16 (!%p2712_p13), %v1881_v3, %v1880_v2  ;;  %v2782_v15 = vld [vmem:[%s3863_s10 + $0x10] sm:$0xff] (!%p2712_p13)  }
 0x1c3   : > { %v2898_v32 = vadd.f32 %v2897_v31, %v2896_v28  ;;  %v3009_v33 = vpop.f32.mrb[57].mxu1  ;;  %v2899_v34 = vpop.f32.mrb[58].mxu0  ;;  %v1651_v26 = vld [vmem:[%s3868_s27 + $0x48] sm:$0xff] (!%p2712_p13)  ;;  %3281 = vmatprep.subr.bf16.mxu1 (!%p2712_p13), %v3280_v19  ;;  %3313 = vmatprep.subr.bf16.mxu0 (!%p2712_p13), %v3312_v22  ;;  %v3284_v28 = vpack.c.bf16 (!%p2712_p13), %v1951_v23, %v1950_v21  ;;  %v1953_v31 = vld [vmem:[%s4284_s5 + $0x38] sm:$0xff] (!%p2712_p13)  ;;  %v1666_v17 = vld [vmem:[%s3868_s27 + $0xc0] sm:$0xff] (!%p2712_p13)  ;;  %v2728_v23 = vunpack.c.h.bf16 (!%p2712_p13), %v2782_v15 }
 0x1c4   : > { %1601 = vst [vmem:[#allocation2 + $0xd8] sm:$0xff] %v1569_v29  ;;  %v3010_v35 = vadd.f32 %v3009_v33, %v3008_v30  ;;  %v3011_v36 = vpop.f32.mrb[58].mxu1  ;;  %v2900_v37 = vpop.f32.mrb[59].mxu0  ;;  %v3316_v29 = vpack.c.bf16 (!%p2712_p13), %v1871_v25, %v1870_v24  ;;  %v1952_v30 = vld [vmem:[%s4284_s5 + $0x30] sm:$0xff] (!%p2712_p13)  ;;  %v1873_v33 = vld [vmem:[%s4283_s4 + $0x38] sm:$0xff] (!%p2712_p13)  ;;  %3315 = vmatpush3.bf16.msra.mxu0 (!%p2712_p13), %v3312_v22  ;;  %v2784_v25 = vld [vmem:[%s3863_s10 + $0x20] sm:$0xff] (!%p2712_p13)  }
 0x1c5   : > { %v2901_v39 = vadd.f32 %v2900_v37, %v2899_v34  ;;  %v3012_v40 = vpop.f32.mrb[59].mxu1  ;;  %v1653_v34 = vld [vmem:[%s3868_s27 + $0x58] sm:$0xff] (!%p2712_p13)  ;;  %3283 = vmatpush3.bf16.msra.mxu1 (!%p2712_p13), %v3280_v19  ;;  %v2727_v19 = vunpack.c.l.bf16 (!%p2712_p13), %v2782_v15  ;;  %v1668_v22 = vld [vmem:[%s3868_s27 + $0xd0] sm:$0xff] (!%p2712_p13)  ;;  %v1610_v2 = vld [vmem:[#allocation2] sm:$0xff] (!%p2712_p13) }
 0x1c6   : > { %v1528_v41 = vadd.f32 %v3010_v35, %v2898_v32  ;;  %v3013_v42 = vadd.f32 %v3012_v40, %v3011_v36  ;;  %1711 = vperm.xlu1 (!%p2712_p13), %3559, %v1649_v8   ;;  %1706 = vperm.xlu0 (!%p2712_p13), %3558, %v1648_v9   ;;  %v1872_v32 = vld [vmem:[%s4283_s4 + $0x30] sm:$0xff] (!%p2712_p13)  ;;  %v3288_v36 = vpack.c.bf16 (!%p2712_p13), %v1953_v31, %v1952_v30  ;;  %v1874_v40 = vld [vmem:[%s4283_s4 + $0x40] sm:$0xff] (!%p2712_p13)  ;;  %v1663_v8 = vld [vmem:[%s3868_s27 + $0xa8] sm:$0xff] (!%p2712_p13) }
 0x1c7   : > { %v1652_v35 = vld [vmem:[%s3868_s27 + $0x50] sm:$0xff] (!%p2712_p13)  ;;  %3285 = vmatprep.subr.bf16.mxu1 (!%p2712_p13), %v3284_v28  ;;  %3317 = vmatprep.subr.bf16.mxu0 (!%p2712_p13), %v3316_v29  ;;  %v3320_v37 = vpack.c.bf16 (!%p2712_p13), %v1873_v33, %v1872_v32  ;;  %v1662_v9 = vld [vmem:[%s3868_s27 + $0xa0] sm:$0xff] (!%p2712_p13)  ;;  %v2783_v20 = vld [vmem:[%s3863_s10 + $0x18] sm:$0xff] (!%p2712_p13)   ;;  %v2736_v33 = vunpack.c.h.bf16 (!%p2712_p13), %v2784_v25 }
 0x1c8   : > { %v1570_v44 = vadd.f32 %v1528_v41, %v576_v38  ;;  %v1531_v45 = vadd.f32 %v3013_v42, %v2901_v39  ;;  %v1954_v38 = vld [vmem:[%s4284_s5 + $0x40] sm:$0xff] (!%p2712_p13)  ;;  %v1955_v39 = vld [vmem:[%s4284_s5 + $0x48] sm:$0xff] (!%p2712_p13)  ;;  %3319 = vmatpush3.bf16.msra.mxu0 (!%p2712_p13), %v3316_v29  ;;  %v1669_v21 = vld [vmem:[%s3868_s27 + $0xd8] sm:$0xff] (!%p2712_p13)  ;;  %v2731_v24 = vunpack.c.l.bf16 (!%p2712_p13), %v2783_v20  ;;  %v2735_v29 = vunpack.c.l.bf16 (!%p2712_p13), %v2784_v25 }
 0x1c9   : > { %v2902_v46 = vpop.f32.mrb[60].mxu0  ;;  %v1875_v41 = vld [vmem:[%s4283_s4 + $0x48] sm:$0xff] (!%p2712_p13)  ;;  %v4048_v42 = vld [vmem:[%s3863_s10] sm:$0xff] (!%p2712_p13)   ;;  %3287 = vmatpush3.bf16.msra.mxu1 (!%p2712_p13), %v3284_v28  ;;  %3321 = vmatprep.subr.bf16.mxu0 (!%p2712_p13), %v3320_v37  ;;  %v2732_v28 = vunpack.c.h.bf16 (!%p2712_p13), %v2783_v20  ;;  %v1673_v31 = vld [vmem:[%s3868_s27 + $0xf8] sm:$0xff] (!%p2712_p13) }
 0x1ca   : > { %1602 = vst [vmem:[#allocation2 + $0xe0] sm:$0xff] %v1570_v44  ;;  %v1571_v47 = vadd.f32 %v1531_v45, %v577_v43  ;;  %v3014_v48 = vpop.f32.mrb[60].mxu1  ;;  %v2903_v49 = vpop.f32.mrb[61].mxu0  ;;  %1721 = vperm.xlu1 (!%p2712_p13), %3559, %v1651_v26   ;;  %1716 = vperm.xlu0 (!%p2712_p13), %3558, %v1650_v27   ;;  %v1655_v43 = vld [vmem:[%s3868_s27 + $0x68] sm:$0xff] (!%p2712_p13)  ;;  %v1654_v44 = vld [vmem:[%s3868_s27 + $0x60] sm:$0xff] (!%p2712_p13)  ;;  %v2719_v45 = vunpack.c.l.bf16 (!%p2712_p13), %v4048_v42  ;;  %v2720_v13 = vunpack.c.h.bf16 (!%p2712_p13), %v4048_v42  ;;  %v1672_v32 = vld [vmem:[%s3868_s27 + $0xf0] sm:$0xff] (!%p2712_p13) }
 0x1cb   : > { %v2904_v50 = vadd.f32 %v2903_v49, %v2902_v46  ;;  %v3015_v51 = vpop.f32.mrb[61].mxu1  ;;  %v2905_v52 = vpop.f32.mrb[62].mxu0  ;;  %3289 = vmatprep.subr.bf16.mxu1 (!%p2712_p13), %v3288_v36  ;;  %v3292_v46 = vpack.c.bf16 (!%p2712_p13), %v1955_v39, %v1954_v38  ;;  %v1957_v49 = vld [vmem:[%s4284_s5 + $0x58] sm:$0xff] (!%p2712_p13)  ;;  %v1671_v26 = vld [vmem:[%s3868_s27 + $0xe8] sm:$0xff] (!%p2712_p13)  ;;  %v1670_v27 = vld [vmem:[%s3868_s27 + $0xe0] sm:$0xff] (!%p2712_p13) }
 0x1cc   : > { %1603 = vst [vmem:[#allocation2 + $0xe8] sm:$0xff] %v1571_v47  ;;  %v3016_v53 = vadd.f32 %v3015_v51, %v3014_v48  ;;  %v3017_v54 = vpop.f32.mrb[62].mxu1  ;;  %v2906_v55 = vpop.f32.mrb[63].mxu0  ;;  %v3324_v47 = vpack.c.bf16 (!%p2712_p13), %v1875_v41, %v1874_v40  ;;  %v1956_v48 = vld [vmem:[%s4284_s5 + $0x50] sm:$0xff] (!%p2712_p13)  ;;  %v1877_v51 = vld [vmem:[%s4283_s4 + $0x58] sm:$0xff] (!%p2712_p13)  ;;  %3148 = vmatprep.mubr.f32.mxu1 (!%p2712_p13), %v2719_v45  ;;  %3323 = vmatpush3.bf16.msra.mxu0 (!%p2712_p13), %v3320_v37  ;;  %v2785_v30 = vld [vmem:[%s3863_s10 + $0x28] sm:$0xff] (!%p2712_p13)  }
 0x1cd   : > { %v2907_v57 = vadd.f32 %v2906_v55, %v2905_v52  ;;  %v3018_v58 = vpop.f32.mrb[63].mxu1  ;;  %v1657_v52 = vld [vmem:[%s3868_s27 + $0x78] sm:$0xff] (!%p2712_p13)  ;;  %3291 = vmatpush3.bf16.msra.mxu1 (!%p2712_p13), %v3288_v36  ;;  %v2740_v36 = vunpack.c.h.bf16 (!%p2712_p13), %v2785_v30  ;;  %v2788_v41 = vld [vmem:[%s3863_s10 + $0x40] sm:$0xff] (!%p2712_p13)  }
 0x1ce   : > { %v1536_v59 = vadd.f32 %v3016_v53, %v2904_v50  ;;  %v3019_v60 = vadd.f32 %v3018_v58, %v3017_v54  ;;  %1609 = sbr.rel (%p2712_p13) target bundleno = 854 (0x356), region = 79  ;;  %1731 = vperm.xlu1 (!%p2712_p13), %3559, %v1653_v34   ;;  %1726 = vperm.xlu0 (!%p2712_p13), %3558, %v1652_v35   ;;  %v1876_v50 = vld [vmem:[%s4283_s4 + $0x50] sm:$0xff] (!%p2712_p13)  ;;  %v3296_v54 = vpack.c.bf16 (!%p2712_p13), %v1957_v49, %v1956_v48  ;;  %v1878_v58 = vld [vmem:[%s4283_s4 + $0x60] sm:$0xff] (!%p2712_p13)  ;;  %v2739_v34 = vunpack.c.l.bf16 (!%p2712_p13), %v2785_v30  ;;  %v2787_v38 = vld [vmem:[%s3863_s10 + $0x38] sm:$0xff] (!%p2712_p13)  }
 0x1cf   : > { %v1656_v53 = vld [vmem:[%s3868_s27 + $0x70] sm:$0xff] (!%p2712_p13)  ;;  %3293 = vmatprep.subr.bf16.mxu1 (!%p2712_p13), %v3292_v46  ;;  %3325 = vmatprep.subr.bf16.mxu0 (!%p2712_p13), %v3324_v47  ;;  %v3328_v55 = vpack.c.bf16 (!%p2712_p13), %v1877_v51, %v1876_v50  ;;  %v2747_v40 = vunpack.c.l.bf16 (!%p2712_p13), %v2787_v38  ;;  %v2748_v42 = vunpack.c.h.bf16 (!%p2712_p13), %v2787_v38  ;;  %v2752_v45 = vunpack.c.h.bf16 (!%p2712_p13), %v2788_v41  ;;  %v2791_v50 = vld [vmem:[%s3863_s10 + $0x58] sm:$0xff] (!%p2712_p13)   ;;  %v1618_v25 = vld [vmem:[#allocation2 + $0x40] sm:$0xff] (!%p2712_p13) }
 0x1d0   : > { %v1572_v62 = vadd.f32 %v1536_v59, %v578_v56  ;;  %v1539_v63 = vadd.f32 %v3019_v60, %v2907_v57  ;;  %v1958_v56 = vld [vmem:[%s4284_s5 + $0x60] sm:$0xff] (!%p2712_p13)  ;;  %v1959_v57 = vld [vmem:[%s4284_s5 + $0x68] sm:$0xff] (!%p2712_p13)  ;;  %3327 = vmatpush3.bf16.msra.mxu0 (!%p2712_p13), %v3324_v47  ;;  %v2786_v35 = vld [vmem:[%s3863_s10 + $0x30] sm:$0xff] (!%p2712_p13)  }
 0x1d1   : > { %v1879_v59 = vld [vmem:[%s4283_s4 + $0x68] sm:$0xff] (!%p2712_p13)  ;;  %3295 = vmatpush3.bf16.msra.mxu1 (!%p2712_p13), %v3292_v46  ;;  %3329 = vmatprep.subr.bf16.mxu0 (!%p2712_p13), %v3328_v55  ;;  %v2743_v37 = vunpack.c.l.bf16 (!%p2712_p13), %v2786_v35  ;;  %v2744_v39 = vunpack.c.h.bf16 (!%p2712_p13), %v2786_v35  ;;  %v2790_v47 = vld [vmem:[%s3863_s10 + $0x50] sm:$0xff] (!%p2712_p13)  }
 0x1d2   : > { %1604 = vst [vmem:[#allocation2 + $0xf0] sm:$0xff] %v1572_v62  ;;  %v1573_v0 = vadd.f32 %v1539_v63, %v579_v61  ;;  %1741 = vperm.xlu1 (!%p2712_p13), %3559, %v1655_v43   ;;  %1736 = vperm.xlu0 (!%p2712_p13), %3558, %v1654_v44   ;;  %v1659_v60 = vld [vmem:[%s3868_s27 + $0x88] sm:$0xff] (!%p2712_p13)  ;;  %v1658_v61 = vld [vmem:[%s3868_s27 + $0x80] sm:$0xff] (!%p2712_p13)  ;;  %v3300_v62 = vpack.c.bf16 (!%p2712_p13), %v1959_v57, %v1958_v56  ;;  %v2751_v43 = vunpack.c.l.bf16 (!%p2712_p13), %v2788_v41  ;;  %v2759_v49 = vunpack.c.l.bf16 (!%p2712_p13), %v2790_v47 }
 0x1d3   : > { %3297 = vmatprep.subr.bf16.mxu1 (!%p2712_p13), %v3296_v54  ;;  %v3332_v63 = vpack.c.bf16 (!%p2712_p13), %v1879_v59, %v1878_v58  ;;  %v2789_v44 = vld [vmem:[%s3863_s10 + $0x48] sm:$0xff] (!%p2712_p13)   ;;  %v2760_v51 = vunpack.c.h.bf16 (!%p2712_p13), %v2790_v47  ;;  %v2794_v59 = vld [vmem:[%s3863_s10 + $0x70] sm:$0xff] (!%p2712_p13)  }
 0x1d4   : > { %1605 = vst [vmem:[#allocation2 + $0xf8] sm:$0xff] %v1573_v0  ;;  %v1960_v0 = vld [vmem:[%s4284_s5 + $0x70] sm:$0xff] (!%p2712_p13)  ;;  %3331 = vmatpush3.bf16.msra.mxu0 (!%p2712_p13), %v3328_v55  ;;  %v2755_v46 = vunpack.c.l.bf16 (!%p2712_p13), %v2789_v44  ;;  %v2756_v48 = vunpack.c.h.bf16 (!%p2712_p13), %v2789_v44  ;;  %v2793_v56 = vld [vmem:[%s3863_s10 + $0x68] sm:$0xff] (!%p2712_p13)  }
 0x1d5   : > { %3299 = vmatpush3.bf16.msra.mxu1 %v3296_v54  ;;  %3333 = vmatprep.subr.bf16.mxu0 %v3332_v63  ;;  %v3304_v6 = vpack.c.bf16 %v1961_v1, %v1960_v0  ;;  %v2764_v54 = vunpack.c.h.bf16 %v2791_v50  ;;  %v2771_v58 = vunpack.c.l.bf16 %v2793_v56  ;;  %v1619_v30 = vld [vmem:[#allocation2 + $0x48] sm:$0xff] }
 0x1d6   : > { %1751 = vperm.xlu1 %3559, %v1657_v52   ;;  %1746 = vperm.xlu0 %3558, %v1656_v53   ;;  %v2763_v52 = vunpack.c.l.bf16 %v2791_v50  ;;  %v2792_v53 = vld [vmem:[%s3863_s10 + $0x60] sm:$0xff]  }
 0x1d7   : > { %3301 = vmatprep.subr.bf16.mxu1 %v3300_v62  ;;  %v2767_v55 = vunpack.c.l.bf16 %v2792_v53  ;;  %v2768_v57 = vunpack.c.h.bf16 %v2792_v53 }
 0x1d8   : > { %3335 = vmatpush3.bf16.msra.mxu0 %v3332_v63  ;;  %v2776_v63 = vunpack.c.h.bf16 %v2794_v59 }
 0x1d9   : > { %3303 = vmatpush3.bf16.msra.mxu1 %v3300_v62  ;;  %3337 = vmatprep.subr.bf16.mxu0 %v3336_v7  ;;  %v2795_v62 = vld [vmem:[%s3863_s10 + $0x78] sm:$0xff]  }
 0x1da   : > { %1761 = vperm.xlu1 %3559, %v1659_v60   ;;  %1756 = vperm.xlu0 %3558, %v1658_v61   ;;  %v2772_v60 = vunpack.c.h.bf16 %v2793_v56  ;;  %v2775_v61 = vunpack.c.l.bf16 %v2794_v59  ;;  %v2779_v0 = vunpack.c.l.bf16 %v2795_v62  ;;  %v2780_v1 = vunpack.c.h.bf16 %v2795_v62 }
 0x1db   : > { %3305 = vmatprep.subr.bf16.mxu1 %v3304_v6 }
 0x1dc   : > { %3339 = vmatpush3.bf16.msra.mxu0 %v3336_v7  ;;  %v1611_v7 = vld [vmem:[#allocation2 + $0x8] sm:$0xff] }
 0x1dd   : > { %3307 = vmatpush3.bf16.msra.mxu1 %v3304_v6 }
 0x1de   : > { %1771 = vperm.xlu1 %3559, %v1661_v4   ;;  %1766 = vperm.xlu0 %3558, %v1660_v5   ;;  %v1612_v5 = vld [vmem:[#allocation2 + $0x10] sm:$0xff] }
 0x1e0   : > { %3149 = vmatmul.mubr.f32.vlgmr.msra.gmra.mrb[0].mxu1 %v2720_v13  ;;  %v1614_v13 = vld [vmem:[#allocation2 + $0x20] sm:$0xff] }
 0x1e1   : > { %3151 = vmatprep.mubr.f32.mxu1 %v2723_v14 }
 0x1e2   : > { %1781 = vperm.xlu1 %3559, %v1663_v8   ;;  %1776 = vperm.xlu0 %3558, %v1662_v9  }
 0x1e4   : > { %3152 = vmatmul.mubr.f32.gmra.mrb[2].mxu1 %v2724_v18  ;;  %v1615_v18 = vld [vmem:[#allocation2 + $0x28] sm:$0xff] }
 0x1e5   : > { %3154 = vmatprep.mubr.f32.mxu1 %v2727_v19  ;;  %v1616_v19 = vld [vmem:[#allocation2 + $0x30] sm:$0xff] }
 0x1e6   : > { %1791 = vperm.xlu1 %3559, %v1665_v11   ;;  %1786 = vperm.xlu0 %3558, %v1664_v12   ;;  %v1613_v12 = vld [vmem:[#allocation2 + $0x18] sm:$0xff] }
 0x1e8   : > { %3155 = vmatmul.mubr.f32.gmra.mrb[4].mxu1 %v2728_v23 }
 0x1e9   : > { %3157 = vmatprep.mubr.f32.mxu1 %v2731_v24  ;;  %v1617_v24 = vld [vmem:[#allocation2 + $0x38] sm:$0xff] }
 0x1ea   : > { %1801 = vperm.xlu1 %3559, %v1667_v16   ;;  %1796 = vperm.xlu0 %3558, %v1666_v17  }
 0x1ec   : > { %3158 = vmatmul.mubr.f32.gmra.mrb[6].mxu1 %v2732_v28 }
 0x1ed   : > { %3160 = vmatprep.mubr.f32.mxu1 %v2735_v29 }
 0x1ee   : > { %1811 = vperm.xlu1 %3559, %v1669_v21   ;;  %1806 = vperm.xlu0 %3558, %v1668_v22  }
 0x1f0   : > { %3161 = vmatmul.mubr.f32.gmra.mrb[8].mxu1 %v2736_v33 }
 0x1f1   : > { %3163 = vmatprep.mubr.f32.mxu1 %v2739_v34 }
 0x1f2   : > { %1821 = vperm.xlu1 %3559, %v1671_v26   ;;  %1816 = vperm.xlu0 %3558, %v1670_v27  }
 0x1f4   : > { %3164 = vmatmul.mubr.f32.gmra.mrb[10].mxu1 %v2740_v36  ;;  %v1621_v36 = vld [vmem:[#allocation2 + $0x58] sm:$0xff] }
 0x1f5   : > { %3166 = vmatprep.mubr.f32.mxu1 %v2743_v37  ;;  %v1622_v37 = vld [vmem:[#allocation2 + $0x60] sm:$0xff] }
 0x1f6   : > { %1831 = vperm.xlu1 %3559, %v1673_v31   ;;  %1826 = vperm.xlu0 %3558, %v1672_v32   ;;  %v1620_v31 = vld [vmem:[#allocation2 + $0x50] sm:$0xff] }
 0x1f8   : > { %3167 = vmatmul.mubr.f32.gmra.mrb[12].mxu1 %v2744_v39 }
 0x1f9   : > { %3169 = vmatprep.mubr.f32.mxu1 %v2747_v40 }
 0x1fc   : > { %3170 = vmatmul.mubr.f32.gmra.mrb[14].mxu1 %v2748_v42  ;;  %v1623_v42 = vld [vmem:[#allocation2 + $0x68] sm:$0xff] }
 0x1fd   : > { %3172 = vmatprep.mubr.f32.mxu1 %v2751_v43  ;;  %v1624_v43 = vld [vmem:[#allocation2 + $0x70] sm:$0xff] }
 0x200   : > { %3173 = vmatmul.mubr.f32.gmra.mrb[16].mxu1 %v2752_v45 }
 0x201   : > { %3175 = vmatprep.mubr.f32.mxu1 %v2755_v46 }
 0x204   : > { %3176 = vmatmul.mubr.f32.gmra.mrb[18].mxu1 %v2756_v48  ;;  %v1625_v48 = vld [vmem:[#allocation2 + $0x78] sm:$0xff] }
 0x205   : > { %3178 = vmatprep.mubr.f32.mxu1 %v2759_v49  ;;  %v1626_v49 = vld [vmem:[#allocation2 + $0x80] sm:$0xff] }
 0x208   : > { %3179 = vmatmul.mubr.f32.gmra.mrb[20].mxu1 %v2760_v51 }
 0x209   : > { %3181 = vmatprep.mubr.f32.mxu1 %v2763_v52 }
 0x20c   : > { %3182 = vmatmul.mubr.f32.gmra.mrb[22].mxu1 %v2764_v54  ;;  %v1627_v54 = vld [vmem:[#allocation2 + $0x88] sm:$0xff] }
 0x20d   : > { %3184 = vmatprep.mubr.f32.mxu1 %v2767_v55  ;;  %v1628_v55 = vld [vmem:[#allocation2 + $0x90] sm:$0xff] }
 0x210   : > { %3185 = vmatmul.mubr.f32.gmra.mrb[24].mxu1 %v2768_v57 }
 0x211   : > { %3187 = vmatprep.mubr.f32.mxu1 %v2771_v58 }
 0x214   : > { %3188 = vmatmul.mubr.f32.gmra.mrb[26].mxu1 %v2772_v60  ;;  %v1629_v60 = vld [vmem:[#allocation2 + $0x98] sm:$0xff] }
 0x215   : > { %3190 = vmatprep.mubr.f32.mxu1 %v2775_v61  ;;  %v1630_v61 = vld [vmem:[#allocation2 + $0xa0] sm:$0xff] }
 0x218   : > { %3191 = vmatmul.mubr.f32.gmra.mrb[28].mxu1 %v2776_v63 }
 0x219   : > { %3193 = vmatprep.mubr.f32.mxu1 %v2779_v0 }
 0x21c   : > { %3194 = vmatmul.mubr.f32.gmra.mrb[30].mxu1 %v2780_v1 }
 0x239   : > { %v1687_v3 = vpop.permute.xlu1 %1686  ;;  %v1677_v4 = vpop.permute.xlu0 %1676 }
 0x23a   : > { %v1834_v6 = vmul.f32 %v1677_v4, %v1610_v2  ;;  %v1836_v8 = vmul.f32 %v1687_v3, %v1612_v5  ;;  %v1631_v2 = vld [vmem:[#allocation2 + $0xa8] sm:$0xff]  ;;  %v1632_v3 = vld [vmem:[#allocation2 + $0xb0] sm:$0xff] }
 0x23c   : > { %3228 = vmatprep.mubr.f32.mxu0 %v1834_v6 }
 0x23d   : > { %v1692_v9 = vpop.permute.xlu1 %1691  ;;  %v1682_v10 = vpop.permute.xlu0 %1681 }
 0x23e   : > { %v1835_v11 = vmul.f32 %v1682_v10, %v1611_v7  ;;  %v1837_v16 = vmul.f32 %v1692_v9, %v1613_v12  ;;  %v1634_v9 = vld [vmem:[#allocation2 + $0xc0] sm:$0xff] }
 0x240   : > { %3229 = vmatmul.mubr.f32.vlgmr.msra.gmra.mrb[0].mxu0 %v1835_v11 }
 0x241   : > { %v1702_v14 = vpop.permute.xlu1 %1701  ;;  %v1697_v15 = vpop.permute.xlu0 %1696  ;;  %3231 = vmatprep.mubr.f32.mxu0 %v1836_v8  ;;  %v1633_v8 = vld [vmem:[#allocation2 + $0xb8] sm:$0xff] }
 0x242   : > { %v1838_v17 = vmul.f32 %v1697_v15, %v1614_v13  ;;  %v1839_v22 = vmul.f32 %v1702_v14, %v1615_v18  ;;  %v1635_v14 = vld [vmem:[#allocation2 + $0xc8] sm:$0xff]  ;;  %v1636_v15 = vld [vmem:[#allocation2 + $0xd0] sm:$0xff] }
 0x244   : > { %3232 = vmatmul.mubr.f32.gmra.mrb[2].mxu0 %v1837_v16 }
 0x245   : > { %v1712_v20 = vpop.permute.xlu1 %1711  ;;  %v1707_v21 = vpop.permute.xlu0 %1706  ;;  %3234 = vmatprep.mubr.f32.mxu0 %v1838_v17 }
 0x246   : > { %v1840_v23 = vmul.f32 %v1707_v21, %v1616_v19  ;;  %v1841_v28 = vmul.f32 %v1712_v20, %v1617_v24  ;;  %v1637_v20 = vld [vmem:[#allocation2 + $0xd8] sm:$0xff]  ;;  %v1638_v21 = vld [vmem:[#allocation2 + $0xe0] sm:$0xff] }
 0x248   : > { %3235 = vmatmul.mubr.f32.gmra.mrb[4].mxu0 %v1839_v22 }
 0x249   : > { %v1722_v26 = vpop.permute.xlu1 %1721  ;;  %v1717_v27 = vpop.permute.xlu0 %1716  ;;  %3237 = vmatprep.mubr.f32.mxu0 %v1840_v23 }
 0x24a   : > { %v1842_v29 = vmul.f32 %v1717_v27, %v1618_v25  ;;  %v1843_v34 = vmul.f32 %v1722_v26, %v1619_v30  ;;  %v1639_v26 = vld [vmem:[#allocation2 + $0xe8] sm:$0xff]  ;;  %v1640_v27 = vld [vmem:[#allocation2 + $0xf0] sm:$0xff] }
 0x24c   : > { %3238 = vmatmul.mubr.f32.gmra.mrb[6].mxu0 %v1841_v28 }
 0x24d   : > { %v1732_v32 = vpop.permute.xlu1 %1731  ;;  %v1727_v33 = vpop.permute.xlu0 %1726  ;;  %3240 = vmatprep.mubr.f32.mxu0 %v1842_v29 }
 0x24e   : > { %v1844_v35 = vmul.f32 %v1727_v33, %v1620_v31  ;;  %v1845_v40 = vmul.f32 %v1732_v32, %v1621_v36  ;;  %v1641_v32 = vld [vmem:[#allocation2 + $0xf8] sm:$0xff] }
 0x250   : > { %3241 = vmatmul.mubr.f32.gmra.mrb[8].mxu0 %v1843_v34 }
 0x251   : > { %v1742_v38 = vpop.permute.xlu1 %1741  ;;  %v1737_v39 = vpop.permute.xlu0 %1736  ;;  %3243 = vmatprep.mubr.f32.mxu0 %v1844_v35 }
 0x252   : > { %v1846_v41 = vmul.f32 %v1737_v39, %v1622_v37  ;;  %v1847_v46 = vmul.f32 %v1742_v38, %v1623_v42 }
 0x254   : > { %3244 = vmatmul.mubr.f32.gmra.mrb[10].mxu0 %v1845_v40 }
 0x255   : > { %v1752_v44 = vpop.permute.xlu1 %1751  ;;  %v1747_v45 = vpop.permute.xlu0 %1746  ;;  %3246 = vmatprep.mubr.f32.mxu0 %v1846_v41 }
 0x256   : > { %v1848_v47 = vmul.f32 %v1747_v45, %v1624_v43  ;;  %v1849_v52 = vmul.f32 %v1752_v44, %v1625_v48 }
 0x258   : > { %3247 = vmatmul.mubr.f32.gmra.mrb[12].mxu0 %v1847_v46 }
 0x259   : > { %v1762_v50 = vpop.permute.xlu1 %1761  ;;  %v1757_v51 = vpop.permute.xlu0 %1756  ;;  %3249 = vmatprep.mubr.f32.mxu0 %v1848_v47 }
 0x25a   : > { %v1850_v53 = vmul.f32 %v1757_v51, %v1626_v49  ;;  %v1851_v58 = vmul.f32 %v1762_v50, %v1627_v54 }
 0x25c   : > { %3250 = vmatmul.mubr.f32.gmra.mrb[14].mxu0 %v1849_v52 }
 0x25d   : > { %v1772_v56 = vpop.permute.xlu1 %1771  ;;  %v1767_v57 = vpop.permute.xlu0 %1766  ;;  %3252 = vmatprep.mubr.f32.mxu0 %v1850_v53 }
 0x25e   : > { %v1852_v59 = vmul.f32 %v1767_v57, %v1628_v55  ;;  %v1853_v0 = vmul.f32 %v1772_v56, %v1629_v60 }
 0x260   : > { %3253 = vmatmul.mubr.f32.gmra.mrb[16].mxu0 %v1851_v58 }
 0x261   : > { %v1782_v62 = vpop.permute.xlu1 %1781  ;;  %v1777_v63 = vpop.permute.xlu0 %1776  ;;  %3255 = vmatprep.mubr.f32.mxu0 %v1852_v59 }
 0x262   : > { %v1854_v1 = vmul.f32 %v1777_v63, %v1630_v61  ;;  %v1855_v6 = vmul.f32 %v1782_v62, %v1631_v2 }
 0x264   : > { %3256 = vmatmul.mubr.f32.gmra.mrb[18].mxu0 %v1853_v0 }
 0x265   : > { %v1792_v4 = vpop.permute.xlu1 %1791  ;;  %v1787_v5 = vpop.permute.xlu0 %1786  ;;  %3258 = vmatprep.mubr.f32.mxu0 %v1854_v1 }
 0x266   : > { %v1856_v7 = vmul.f32 %v1787_v5, %v1632_v3  ;;  %v1857_v12 = vmul.f32 %v1792_v4, %v1633_v8  ;;  %v4170_v3 = vld [vmem:[%s4285_s6] ss:$0 sm:$0xff] }
 0x268   : > { %3259 = vmatmul.mubr.f32.gmra.mrb[20].mxu0 %v1855_v6 }
 0x269   : > { %v1802_v10 = vpop.permute.xlu1 %1801  ;;  %v1797_v11 = vpop.permute.xlu0 %1796  ;;  %3261 = vmatprep.mubr.f32.mxu0 %v1856_v7 }
 0x26a   : > { %v1858_v13 = vmul.f32 %v1797_v11, %v1634_v9  ;;  %v1859_v18 = vmul.f32 %v1802_v10, %v1635_v14 }
 0x26c   : > { %3262 = vmatmul.mubr.f32.gmra.mrb[22].mxu0 %v1857_v12 }
 0x26d   : > { %v1812_v16 = vpop.permute.xlu1 %1811  ;;  %v1807_v17 = vpop.permute.xlu0 %1806  ;;  %3264 = vmatprep.mubr.f32.mxu0 %v1858_v13 }
 0x26e   : > { %v1860_v19 = vmul.f32 %v1807_v17, %v1636_v15  ;;  %v1861_v24 = vmul.f32 %v1812_v16, %v1637_v20 }
 0x270   : > { %3265 = vmatmul.mubr.f32.gmra.mrb[24].mxu0 %v1859_v18 }
 0x271   : > { %v1822_v22 = vpop.permute.xlu1 %1821  ;;  %v1817_v23 = vpop.permute.xlu0 %1816  ;;  %3267 = vmatprep.mubr.f32.mxu0 %v1860_v19 }
 0x272   : > { %v1862_v25 = vmul.f32 %v1817_v23, %v1638_v21  ;;  %v1863_v29 = vmul.f32 %v1822_v22, %v1639_v26 }
 0x274   : > { %3268 = vmatmul.mubr.f32.gmra.mrb[26].mxu0 %v1861_v24 }
 0x275   : > { %v1827_v28 = vpop.permute.xlu0 %1826  ;;  %3270 = vmatprep.mubr.f32.mxu0 %v1862_v25  ;;  %v1832_v31 = vpop.permute.xlu1 %1831 }
 0x276   : > { %v1864_v30 = vmul.f32 %v1827_v28, %v1640_v27  ;;  %v1865_v33 = vmul.f32 %v1832_v31, %v1641_v32 }
 0x278   : > { %3271 = vmatmul.mubr.f32.gmra.mrb[28].mxu0 %v1863_v29 }
 0x279   : > { %3273 = vmatprep.mubr.f32.mxu0 %v1864_v30 }
 0x27c   : > { %3274 = vmatmul.mubr.f32.gmra.mrb[30].mxu0 %v1865_v33 }
 0x2b3   : > { %v3150_v34 = vpop.f32.mrb[0].mxu1 }
 0x2b4   : > { %v2028_v35 = vpop.f32.mrb[1].mxu1 }
 0x2b7   : > { %v3153_v36 = vpop.f32.mrb[2].mxu1 }
 0x2b8   : > { %v2038_v37 = vpop.f32.mrb[3].mxu1 }
 0x2bb   : > { %v3156_v38 = vpop.f32.mrb[4].mxu1 }
 0x2bc   : > { %v2048_v39 = vpop.f32.mrb[5].mxu1 }
 0x2bf   : > { %v3159_v40 = vpop.f32.mrb[6].mxu1 }
 0x2c0   : > { %v2058_v41 = vpop.f32.mrb[7].mxu1 }
 0x2c3   : > { %v3162_v42 = vpop.f32.mrb[8].mxu1 }
 0x2c4   : > { %v2068_v43 = vpop.f32.mrb[9].mxu1 }
 0x2c7   : > { %v4123_v44 = vpop.f32.mrb[10].mxu1 }
 0x2c8   : > { %v4125_v45 = vpop.f32.mrb[11].mxu1 }
 0x2cb   : > { %v4127_v46 = vpop.f32.mrb[12].mxu1 }
 0x2cc   : > { %v4129_v47 = vpop.f32.mrb[13].mxu1 }
 0x2cf   : > { %v4131_v48 = vpop.f32.mrb[14].mxu1 }
 0x2d0   : > { %v4133_v49 = vpop.f32.mrb[15].mxu1 }
 0x2d3   : > { %v4135_v50 = vpop.f32.mrb[16].mxu1 }
 0x2d4   : > { %v4137_v51 = vpop.f32.mrb[17].mxu1 }
 0x2d7   : > { %v4139_v52 = vpop.f32.mrb[18].mxu1 }
 0x2d8   : > { %v4141_v53 = vpop.f32.mrb[19].mxu1 }
 0x2db   : > { %v4143_v54 = vpop.f32.mrb[20].mxu1 }
 0x2dc   : > { %v4145_v55 = vpop.f32.mrb[21].mxu1 }
 0x2df   : > { %v4147_v56 = vpop.f32.mrb[22].mxu1 }
 0x2e0   : > { %v4149_v57 = vpop.f32.mrb[23].mxu1 }
 0x2e3   : > { %v4151_v58 = vpop.f32.mrb[24].mxu1 }
 0x2e4   : > { %v4153_v59 = vpop.f32.mrb[25].mxu1 }
 0x2e7   : > { %v4155_v60 = vpop.f32.mrb[26].mxu1 }
 0x2e8   : > { %v4157_v61 = vpop.f32.mrb[27].mxu1 }
 0x2eb   : > { %v4159_v62 = vpop.f32.mrb[28].mxu1 }
 0x2ec   : > { %v4161_v63 = vpop.f32.mrb[29].mxu1 }
 0x2ef   : > { %v4163_v0 = vpop.f32.mrb[30].mxu1 }
 0x2f0   : > { %v4165_v1 = vpop.f32.mrb[31].mxu1 }
 0x313   : > { %v3230_v2 = vpop.f32.mrb[0].mxu0 }
 0x314   : > { %v2259_v4 = vadd.f32 %v3230_v2, %v3150_v34  ;;  %v2253_v5 = vpop.f32.mrb[1].mxu0 }
 0x315   : > { %v2254_v6 = vadd.f32 %v2253_v5, %v2028_v35 }
 0x316   : > { %v2420_v7 = vadd.f32 %v4170_v3, %v2259_v4 }
 0x317   : > { %v2419_v8 = vadd.f32 %v4170_v3, %v2254_v6  ;;  %v3233_v9 = vpop.f32.mrb[2].mxu0 }
 0x318   : > { %2452 = vst [vmem:[%s3873_s9 + $0x8] sm:$0xff] %v2420_v7  ;;  %v2269_v10 = vadd.f32 %v3233_v9, %v3153_v36  ;;  %v2263_v11 = vpop.f32.mrb[3].mxu0 }
 0x319   : > { %2451 = vst [vmem:[%s3873_s9] sm:$0xff] %v2419_v8  ;;  %v2264_v12 = vadd.f32 %v2263_v11, %v2038_v37 }
 0x31a   : > { %v2422_v13 = vadd.f32 %v4170_v3, %v2269_v10 }
 0x31b   : > { %v2421_v14 = vadd.f32 %v4170_v3, %v2264_v12  ;;  %v3236_v15 = vpop.f32.mrb[4].mxu0 }
 0x31c   : > { %2454 = vst [vmem:[%s3873_s9 + $0x18] sm:$0xff] %v2422_v13  ;;  %v2279_v16 = vadd.f32 %v3236_v15, %v3156_v38  ;;  %v2273_v17 = vpop.f32.mrb[5].mxu0 }
 0x31d   : > { %2453 = vst [vmem:[%s3873_s9 + $0x10] sm:$0xff] %v2421_v14  ;;  %v2274_v18 = vadd.f32 %v2273_v17, %v2048_v39 }
 0x31e   : > { %v2424_v19 = vadd.f32 %v4170_v3, %v2279_v16 }
 0x31f   : > { %v2423_v20 = vadd.f32 %v4170_v3, %v2274_v18  ;;  %v3239_v21 = vpop.f32.mrb[6].mxu0 }
 0x320   : > { %2456 = vst [vmem:[%s3873_s9 + $0x28] sm:$0xff] %v2424_v19  ;;  %v2289_v22 = vadd.f32 %v3239_v21, %v3159_v40  ;;  %v2283_v23 = vpop.f32.mrb[7].mxu0 }
 0x321   : > { %2455 = vst [vmem:[%s3873_s9 + $0x20] sm:$0xff] %v2423_v20  ;;  %v2284_v24 = vadd.f32 %v2283_v23, %v2058_v41 }
 0x322   : > { %v2426_v25 = vadd.f32 %v4170_v3, %v2289_v22 }
 0x323   : > { %v2425_v26 = vadd.f32 %v4170_v3, %v2284_v24  ;;  %v3242_v27 = vpop.f32.mrb[8].mxu0 }
 0x324   : > { %2458 = vst [vmem:[%s3873_s9 + $0x38] sm:$0xff] %v2426_v25  ;;  %v2299_v28 = vadd.f32 %v3242_v27, %v3162_v42  ;;  %v2293_v29 = vpop.f32.mrb[9].mxu0 }
 0x325   : > { %2457 = vst [vmem:[%s3873_s9 + $0x30] sm:$0xff] %v2425_v26  ;;  %v2294_v30 = vadd.f32 %v2293_v29, %v2068_v43 }
 0x326   : > { %v2428_v31 = vadd.f32 %v4170_v3, %v2299_v28 }
 0x327   : > { %v2427_v32 = vadd.f32 %v4170_v3, %v2294_v30  ;;  %v3245_v33 = vpop.f32.mrb[10].mxu0 }
 0x328   : > { %2460 = vst [vmem:[%s3873_s9 + $0x48] sm:$0xff] %v2428_v31  ;;  %v2309_v34 = vadd.f32 %v3245_v33, %v4123_v44  ;;  %v2303_v35 = vpop.f32.mrb[11].mxu0 }
 0x329   : > { %2459 = vst [vmem:[%s3873_s9 + $0x40] sm:$0xff] %v2427_v32  ;;  %v2304_v36 = vadd.f32 %v2303_v35, %v4125_v45 }
 0x32a   : > { %v2430_v37 = vadd.f32 %v4170_v3, %v2309_v34 }
 0x32b   : > { %v2429_v38 = vadd.f32 %v4170_v3, %v2304_v36  ;;  %v3248_v39 = vpop.f32.mrb[12].mxu0 }
 0x32c   : > { %2462 = vst [vmem:[%s3873_s9 + $0x58] sm:$0xff] %v2430_v37  ;;  %v2319_v40 = vadd.f32 %v3248_v39, %v4127_v46  ;;  %v2313_v41 = vpop.f32.mrb[13].mxu0 }
 0x32d   : > { %2461 = vst [vmem:[%s3873_s9 + $0x50] sm:$0xff] %v2429_v38  ;;  %v2314_v42 = vadd.f32 %v2313_v41, %v4129_v47 }
 0x32e   : > { %v2432_v43 = vadd.f32 %v4170_v3, %v2319_v40 }
 0x32f   : > { %v2431_v44 = vadd.f32 %v4170_v3, %v2314_v42  ;;  %v3251_v2 = vpop.f32.mrb[14].mxu0 }
 0x330   : > { %2464 = vst [vmem:[%s3873_s9 + $0x68] sm:$0xff] %v2432_v43  ;;  %v2329_v45 = vadd.f32 %v3251_v2, %v4131_v48  ;;  %v2323_v4 = vpop.f32.mrb[15].mxu0 }
 0x331   : > { %2463 = vst [vmem:[%s3873_s9 + $0x60] sm:$0xff] %v2431_v44  ;;  %v2324_v5 = vadd.f32 %v2323_v4, %v4133_v49 }
 0x332   : > { %v2434_v46 = vadd.f32 %v4170_v3, %v2329_v45 }
 0x333   : > { %v2433_v6 = vadd.f32 %v4170_v3, %v2324_v5  ;;  %v3254_v7 = vpop.f32.mrb[16].mxu0 }
 0x334   : > { %2466 = vst [vmem:[%s3873_s9 + $0x78] sm:$0xff] %v2434_v46  ;;  %v2339_v47 = vadd.f32 %v3254_v7, %v4135_v50  ;;  %v2333_v8 = vpop.f32.mrb[17].mxu0 }
 0x335   : > { %2465 = vst [vmem:[%s3873_s9 + $0x70] sm:$0xff] %v2433_v6  ;;  %v2334_v9 = vadd.f32 %v2333_v8, %v4137_v51 }
 0x336   : > { %v2436_v48 = vadd.f32 %v4170_v3, %v2339_v47 }
 0x337   : > { %v2435_v10 = vadd.f32 %v4170_v3, %v2334_v9  ;;  %v3257_v11 = vpop.f32.mrb[18].mxu0 }
 0x338   : > { %2468 = vst [vmem:[%s3873_s9 + $0x88] sm:$0xff] %v2436_v48  ;;  %v2349_v49 = vadd.f32 %v3257_v11, %v4139_v52  ;;  %v2343_v12 = vpop.f32.mrb[19].mxu0 }
 0x339   : > { %2467 = vst [vmem:[%s3873_s9 + $0x80] sm:$0xff] %v2435_v10  ;;  %v2344_v13 = vadd.f32 %v2343_v12, %v4141_v53 }
 0x33a   : > { %v2438_v50 = vadd.f32 %v4170_v3, %v2349_v49 }
 0x33b   : > { %v2437_v14 = vadd.f32 %v4170_v3, %v2344_v13  ;;  %v3260_v15 = vpop.f32.mrb[20].mxu0 }
 0x33c   : > { %2470 = vst [vmem:[%s3873_s9 + $0x98] sm:$0xff] %v2438_v50  ;;  %v2359_v51 = vadd.f32 %v3260_v15, %v4143_v54  ;;  %v2353_v16 = vpop.f32.mrb[21].mxu0 }
 0x33d   : > { %2469 = vst [vmem:[%s3873_s9 + $0x90] sm:$0xff] %v2437_v14  ;;  %v2354_v17 = vadd.f32 %v2353_v16, %v4145_v55 }
 0x33e   : > { %v2440_v52 = vadd.f32 %v4170_v3, %v2359_v51 }
 0x33f   : > { %v2439_v18 = vadd.f32 %v4170_v3, %v2354_v17  ;;  %v3263_v19 = vpop.f32.mrb[22].mxu0 }
 0x340   : > { %2472 = vst [vmem:[%s3873_s9 + $0xa8] sm:$0xff] %v2440_v52  ;;  %v2369_v53 = vadd.f32 %v3263_v19, %v4147_v56  ;;  %v2363_v20 = vpop.f32.mrb[23].mxu0 }
 0x341   : > { %2471 = vst [vmem:[%s3873_s9 + $0xa0] sm:$0xff] %v2439_v18  ;;  %v2364_v21 = vadd.f32 %v2363_v20, %v4149_v57 }
 0x342   : > { %v2442_v54 = vadd.f32 %v4170_v3, %v2369_v53 }
 0x343   : > { %v2441_v22 = vadd.f32 %v4170_v3, %v2364_v21  ;;  %v3266_v23 = vpop.f32.mrb[24].mxu0 }
 0x344   : > { %2474 = vst [vmem:[%s3873_s9 + $0xb8] sm:$0xff] %v2442_v54  ;;  %v2379_v55 = vadd.f32 %v3266_v23, %v4151_v58  ;;  %v2373_v24 = vpop.f32.mrb[25].mxu0 }
 0x345   : > { %2473 = vst [vmem:[%s3873_s9 + $0xb0] sm:$0xff] %v2441_v22  ;;  %v2374_v25 = vadd.f32 %v2373_v24, %v4153_v59 }
 0x346   : > { %v2444_v56 = vadd.f32 %v4170_v3, %v2379_v55 }
 0x347   : > { %v2443_v26 = vadd.f32 %v4170_v3, %v2374_v25  ;;  %v3269_v27 = vpop.f32.mrb[26].mxu0 }
 0x348   : > { %2476 = vst [vmem:[%s3873_s9 + $0xc8] sm:$0xff] %v2444_v56  ;;  %v2389_v57 = vadd.f32 %v3269_v27, %v4155_v60  ;;  %v2383_v28 = vpop.f32.mrb[27].mxu0 }
 0x349   : > { %2475 = vst [vmem:[%s3873_s9 + $0xc0] sm:$0xff] %v2443_v26  ;;  %v2384_v29 = vadd.f32 %v2383_v28, %v4157_v61 }
 0x34a   : > { %v2446_v58 = vadd.f32 %v4170_v3, %v2389_v57 }
 0x34b   : > { %v2445_v30 = vadd.f32 %v4170_v3, %v2384_v29  ;;  %v3272_v31 = vpop.f32.mrb[28].mxu0 }
 0x34c   : > { %2478 = vst [vmem:[%s3873_s9 + $0xd8] sm:$0xff] %v2446_v58  ;;  %v2399_v59 = vadd.f32 %v3272_v31, %v4159_v62  ;;  %v2393_v32 = vpop.f32.mrb[29].mxu0 }
 0x34d   : > { %2477 = vst [vmem:[%s3873_s9 + $0xd0] sm:$0xff] %v2445_v30  ;;  %v2394_v33 = vadd.f32 %v2393_v32, %v4161_v63 }
 0x34e   : > { %v2448_v60 = vadd.f32 %v4170_v3, %v2399_v59 }
 0x34f   : > { %v2447_v34 = vadd.f32 %v4170_v3, %v2394_v33  ;;  %v3275_v35 = vpop.f32.mrb[30].mxu0 }
 0x350   : > { %2480 = vst [vmem:[%s3873_s9 + $0xe8] sm:$0xff] %v2448_v60  ;;  %v2409_v61 = vadd.f32 %v3275_v35, %v4163_v0  ;;  %v2403_v36 = vpop.f32.mrb[31].mxu0 }
 0x351   : > { %2479 = vst [vmem:[%s3873_s9 + $0xe0] sm:$0xff] %v2447_v34  ;;  %v2404_v37 = vadd.f32 %v2403_v36, %v4165_v1 }
 0x352   : > { %v2450_v38 = vadd.f32 %v4170_v3, %v2409_v61 }
 0x353   : > { %v2449_v62 = vadd.f32 %v4170_v3, %v2404_v37 }
 0x354   : > { %2482 = vst [vmem:[%s3873_s9 + $0xf8] sm:$0xff] %v2450_v38 }
 0x355   : > { %2481 = vst [vmem:[%s3873_s9 + $0xf0] sm:$0xff] %v2449_v62 }
 0x356 PF: > { %s17_s30 = sadd.s32 1, %s3614_s30   ;;  %s4291_s17 = sld [smem:[#allocation4_spill]] }
 0x357   : > { %p14_p0 = scmp.ge.s32.totalorder %s17_s30, 10   ;;  %s4292_s24 = smov %s3594_s25 }
 0x358   : > { %s4293_s25 = smov %s3709_s14  ;;  %s4294_s26 = smov %s3606_s28 }
 0x359   : > { %s4295_s27 = smov %s3610_s29  ;;  %s4296_s28 = smov %s4299_s8 }
 0x35a   :  { %16 = sbr.rel (!%p14_p0) target bundleno = 6 (0x6), region = 123 }
 0x35c   : > { %s4297_s29 = smov %s4291_s17 }

</bundles_post_ra>
